<compile_context>
chip_gen: v7x
topology: tpu7x:2x2x1
jax: 0.10.0
libtpu: 0.0.40
codegen_flags: <defaults>
</compile_context>

<pallas_src>
import functools

import jax
import jax.numpy as jnp
from jax.experimental import pallas as pl
from jax.experimental.pallas import tpu as pltpu


def _upsample_conv_kernel(x_ref, w_ref, b_ref, o_ref, xp_ref, *, H, W, C):
    """One batch element: fused nearest-2x upsample + 3x3 conv (sub-pixel form).

    x_ref : (1, H, W, C)        bf16 input tile (channels-last)
    w_ref : (16, C, C)          bf16 folded weights, index = ((a*2+b)*2+ri)*2+rj
    b_ref : (1, C)              f32 bias
    o_ref : (1, 2, 2, H*W, C)   f32 output, [0, a, b, i*W+j, co] = y[2i+a, 2j+b, co]
    xp_ref: (H+2, W+2, C)       bf16 VMEM scratch holding the zero-padded tile
    """
    # Zero-padded copy of the tile in VMEM (halo of 1 pixel on each side).
    # The zero fill is done every grid step (scratch is per-core, so a
    # program_id==0 guard would be unsafe under megacore grid sharding).
    xp_ref[...] = jnp.zeros_like(xp_ref)
    xp_ref[1:H + 1, 1:W + 1, :] = x_ref[0]

    # The nine shifted views, flattened to (H*W, C) so the MXU sees M = H*W
    # rows. Each is loaded from VMEM exactly once and reused below.
    patches = {}
    for r in range(3):
        for c in range(3):
            patches[(r, c)] = xp_ref[r:r + H, c:c + W, :].reshape(H * W, C)

    # Bias broadcast hoisted out of the parity loop; it seeds the accumulator,
    # so no separate bias-add pass is needed per parity.
    bias_tile = jnp.broadcast_to(b_ref[...], (H * W, C)).astype(jnp.float32)

    # Four output parities; each is 4 bf16 matmuls accumulated in f32.
    for a in range(2):
        for b in range(2):
            acc = bias_tile
            for ri in range(2):
                for rj in range(2):
                    t = ((a * 2 + b) * 2 + ri) * 2 + rj
                    acc = acc + jnp.dot(patches[(a + ri, b + rj)], w_ref[t],
                                        preferred_element_type=jnp.float32)
            # Full-block, contiguous, lane-dense store of one parity plane.
            o_ref[0, a, b] = acc.astype(o_ref.dtype)


def upsample_forward(params, x_nchw, temb=None):
    """Pallas implementation of UpSample.forward(x, temb). temb is unused (as in PyTorch)."""
    del temb
    B, C, H, W = x_nchw.shape
    w = params["weight"].astype(jnp.float32)   # (Cout, Cin, 3, 3), PyTorch layout
    bias = params["bias"].astype(jnp.float32)  # (Cout,)

    # Fold the 3x3 kernel into the 4 parity-specific 2x2 kernels (host side, once).
    # S[a, r, d] = 1  iff  kernel-row d of the 3x3 conv lands on effective tap r
    # for output-row parity a (row offset into the padded original image = a + r).
    S = jnp.array([[[1., 0., 0.], [0., 1., 1.]],
                   [[1., 1., 0.], [0., 0., 1.]]], jnp.float32)          # (2, 2, 3)
    wg = jnp.einsum("ard,bse,oide->abrsio", S, S, w)                    # (2,2,2,2,Ci,Co)
    wg = wg.reshape(16, C, C).astype(jnp.bfloat16)

    x_nhwc = jnp.transpose(x_nchw, (0, 2, 3, 1)).astype(jnp.bfloat16)   # channels on lanes
    b2 = bias.reshape(1, C)

    out6 = pl.pallas_call(
        functools.partial(_upsample_conv_kernel, H=H, W=W, C=C),
        out_shape=jax.ShapeDtypeStruct((B, 2, 2, H * W, C), jnp.float32),
        grid=(B,),
        in_specs=[
            pl.BlockSpec((1, H, W, C), lambda i: (i, 0, 0, 0)),
            pl.BlockSpec((16, C, C), lambda i: (0, 0, 0)),
            pl.BlockSpec((1, C), lambda i: (0, 0)),
        ],
        out_specs=pl.BlockSpec((1, 2, 2, H * W, C), lambda i: (i, 0, 0, 0, 0)),
        scratch_shapes=[pltpu.VMEM((H + 2, W + 2, C), jnp.bfloat16)],
        compiler_params=pltpu.CompilerParams(dimension_semantics=("parallel",)),
    )(x_nhwc, wg, b2)

    # Interleave the parity planes back to NCHW: y[b, c, 2i+a, 2j+bb].
    out = out6.reshape(B, 2, 2, H, W, C)
    out = jnp.transpose(out, (0, 5, 3, 1, 4, 2)).reshape(B, C, 2 * H, 2 * W)
    return out.astype(x_nchw.dtype)


def _reference(params, x):
    """Plain-JAX reference: F.interpolate(nearest, 2x) -> Conv2d(3x3, pad=1)."""
    up = jnp.repeat(jnp.repeat(x, 2, axis=2), 2, axis=3)
    y = jax.lax.conv_general_dilated(
        up, params["weight"], window_strides=(1, 1), padding=((1, 1), (1, 1)),
        dimension_numbers=("NCHW", "OIHW", "NCHW"))
    return y + params["bias"].reshape(1, -1, 1, 1)


if __name__ == "__main__":
    # TPU-friendly small shapes: C = 128 keeps matmuls and stores lane-dense,
    # W = 16 keeps the in-kernel (H, W, C) -> (H*W, C) flatten tile-aligned.
    B, C, H, W = 2, 128, 16, 16

    key = jax.random.PRNGKey(0)
    k_w, k_x, k_t = jax.random.split(key, 3)
    fan = C * 3 * 3
    bound = (6.0 / (fan + fan)) ** 0.5                       # xavier_uniform_
    params = {
        "weight": jax.random.uniform(k_w, (C, C, 3, 3), jnp.float32, -bound, bound),
        "bias": jnp.zeros((C,), jnp.float32),                # init.zeros_
    }
    x = jax.random.normal(k_x, (B, C, H, W), jnp.float32)    # NCHW like PyTorch
    temb = jax.random.normal(k_t, (B, 4 * C), jnp.float32)   # unused by UpSample.forward

    fwd = jax.jit(upsample_forward)
    out = jax.block_until_ready(fwd(params, x, temb))

    assert out.shape == (B, C, 2 * H, 2 * W), out.shape
    assert bool(jnp.all(jnp.isfinite(out)))

    # Correctness vs. the exact f32 reference (bf16 MXU operands -> loose tol).
    ref = _reference(params, x)
    err = float(jnp.max(jnp.abs(out - ref)))
    assert err <= 2e-2 * (1.0 + float(jnp.max(jnp.abs(ref)))), err

    print("KERNEL_OK")
</pallas_src>

<mosaic_0001>
module attributes {stable_mosaic.version = 11 : i64} {
  func.func @_upsample_conv_kernel(%arg0: i32, %arg1: memref<1x16x16x128xbf16, #tpu.memory_space<vmem>>, %arg2: memref<16x128x128xbf16, #tpu.memory_space<vmem>>, %arg3: memref<1x128xf32, #tpu.memory_space<vmem>>, %arg4: memref<1x2x2x256x128xf32, #tpu.memory_space<vmem>>, %arg5: memref<18x18x128xbf16, #tpu.memory_space<vmem>>) attributes {dimension_semantics = [#tpu.dimension_semantics<parallel>], iteration_bounds = array<i64: 2>, scalar_prefetch = 0 : i64, scratch_operands = 1 : i64, tpu.core_type = #tpu.core_type<tc>, window_params = [{transform_indices = @transform_0, window_bounds = array<i64: 1, 16, 16, 128>}, {pipeline_mode = #tpu.pipeline_mode<synchronous>, transform_indices = @transform_1, window_bounds = array<i64: 16, 128, 128>}, {pipeline_mode = #tpu.pipeline_mode<synchronous>, transform_indices = @transform_2, window_bounds = array<i64: 1, 128>}, {transform_indices = @transform_3, window_bounds = array<i64: 1, 2, 2, 256, 128>}]} {
    %cst = arith.constant 0.000000e+00 : bf16
    %0 = vector.broadcast %cst : bf16 to vector<18x18x128xbf16>
    %c0 = arith.constant 0 : index
    %c0_0 = arith.constant 0 : index
    %c0_1 = arith.constant 0 : index
    %1 = vector.load %arg5[%c0, %c0_0, %c0_1] : memref<18x18x128xbf16, #tpu.memory_space<vmem>>, vector<18x18x128xbf16>
    tpu.vector_store %arg5[%c0, %c0_0, %c0_1], %0 {strides = array<i32>} : memref<18x18x128xbf16, #tpu.memory_space<vmem>>, vector<18x18x128xbf16>,
    %c0_2 = arith.constant 0 : index
    %c0_3 = arith.constant 0 : index
    %c0_4 = arith.constant 0 : index
    %c0_5 = arith.constant 0 : index
    %2 = vector.load %arg1[%c0_2, %c0_3, %c0_4, %c0_5] : memref<1x16x16x128xbf16, #tpu.memory_space<vmem>>, vector<1x16x16x128xbf16>
    %3 = vector.shape_cast %2 : vector<1x16x16x128xbf16> to vector<16x16x128xbf16>
    %c1 = arith.constant 1 : index
    %c1_6 = arith.constant 1 : index
    %c0_7 = arith.constant 0 : index
    %4 = vector.load %arg5[%c1, %c1_6, %c0_7] : memref<18x18x128xbf16, #tpu.memory_space<vmem>>, vector<16x16x128xbf16>
    tpu.vector_store %arg5[%c1, %c1_6, %c0_7], %3 {strides = array<i32>} : memref<18x18x128xbf16, #tpu.memory_space<vmem>>, vector<16x16x128xbf16>,
    %c0_8 = arith.constant 0 : index
    %c0_9 = arith.constant 0 : index
    %c0_10 = arith.constant 0 : index
    %5 = vector.load %arg5[%c0_8, %c0_9, %c0_10] : memref<18x18x128xbf16, #tpu.memory_space<vmem>>, vector<16x16x128xbf16>
    %6 = vector.shape_cast %5 : vector<16x16x128xbf16> to vector<256x128xbf16>
    %c0_11 = arith.constant 0 : index
    %c1_12 = arith.constant 1 : index
    %c0_13 = arith.constant 0 : index
    %7 = vector.load %arg5[%c0_11, %c1_12, %c0_13] : memref<18x18x128xbf16, #tpu.memory_space<vmem>>, vector<16x16x128xbf16>
    %8 = vector.shape_cast %7 : vector<16x16x128xbf16> to vector<256x128xbf16>
    %c0_14 = arith.constant 0 : index
    %c2 = arith.constant 2 : index
    %c0_15 = arith.constant 0 : index
    %9 = vector.load %arg5[%c0_14, %c2, %c0_15] : memref<18x18x128xbf16, #tpu.memory_space<vmem>>, vector<16x16x128xbf16>
    %10 = vector.shape_cast %9 : vector<16x16x128xbf16> to vector<256x128xbf16>
    %c1_16 = arith.constant 1 : index
    %c0_17 = arith.constant 0 : index
    %c0_18 = arith.constant 0 : index
    %11 = vector.load %arg5[%c1_16, %c0_17, %c0_18] : memref<18x18x128xbf16, #tpu.memory_space<vmem>>, vector<16x16x128xbf16>
    %12 = vector.shape_cast %11 : vector<16x16x128xbf16> to vector<256x128xbf16>
    %c1_19 = arith.constant 1 : index
    %c1_20 = arith.constant 1 : index
    %c0_21 = arith.constant 0 : index
    %13 = vector.load %arg5[%c1_19, %c1_20, %c0_21] : memref<18x18x128xbf16, #tpu.memory_space<vmem>>, vector<16x16x128xbf16>
    %14 = vector.shape_cast %13 : vector<16x16x128xbf16> to vector<256x128xbf16>
    %c1_22 = arith.constant 1 : index
    %c2_23 = arith.constant 2 : index
    %c0_24 = arith.constant 0 : index
    %15 = vector.load %arg5[%c1_22, %c2_23, %c0_24] : memref<18x18x128xbf16, #tpu.memory_space<vmem>>, vector<16x16x128xbf16>
    %16 = vector.shape_cast %15 : vector<16x16x128xbf16> to vector<256x128xbf16>
    %c2_25 = arith.constant 2 : index
    %c0_26 = arith.constant 0 : index
    %c0_27 = arith.constant 0 : index
    %17 = vector.load %arg5[%c2_25, %c0_26, %c0_27] : memref<18x18x128xbf16, #tpu.memory_space<vmem>>, vector<16x16x128xbf16>
    %18 = vector.shape_cast %17 : vector<16x16x128xbf16> to vector<256x128xbf16>
    %c2_28 = arith.constant 2 : index
    %c1_29 = arith.constant 1 : index
    %c0_30 = arith.constant 0 : index
    %19 = vector.load %arg5[%c2_28, %c1_29, %c0_30] : memref<18x18x128xbf16, #tpu.memory_space<vmem>>, vector<16x16x128xbf16>
    %20 = vector.shape_cast %19 : vector<16x16x128xbf16> to vector<256x128xbf16>
    %c2_31 = arith.constant 2 : index
    %c2_32 = arith.constant 2 : index
    %c0_33 = arith.constant 0 : index
    %21 = vector.load %arg5[%c2_31, %c2_32, %c0_33] : memref<18x18x128xbf16, #tpu.memory_space<vmem>>, vector<16x16x128xbf16>
    %22 = vector.shape_cast %21 : vector<16x16x128xbf16> to vector<256x128xbf16>
    %c0_34 = arith.constant 0 : index
    %c0_35 = arith.constant 0 : index
    %23 = vector.load %arg3[%c0_34, %c0_35] : memref<1x128xf32, #tpu.memory_space<vmem>>, vector<1x128xf32>
    %24 = vector.shape_cast %23 : vector<1x128xf32> to vector<1x128xf32>
    %25 = vector.broadcast %24 : vector<1x128xf32> to vector<256x128xf32>
    %c0_36 = arith.constant 0 : index
    %c0_37 = arith.constant 0 : index
    %c0_38 = arith.constant 0 : index
    %26 = vector.load %arg2[%c0_36, %c0_37, %c0_38] : memref<16x128x128xbf16, #tpu.memory_space<vmem>>, vector<1x128x128xbf16>
    %27 = vector.shape_cast %26 : vector<1x128x128xbf16> to vector<128x128xbf16>
    %cst_39 = arith.constant dense<0.000000e+00> : vector<256x128xf32>
    %28 = tpu.matmul %6, %27, %cst_39 {dimension_numbers = #tpu.dot_dimension_numbers<[1], [0], [0], [1], [0, 0, 1, 1], [], []>} : vector<256x128xbf16>, vector<128x128xbf16>, vector<256x128xf32> -> vector<256x128xf32>
    %29 = arith.addf %25, %28 : vector<256x128xf32>
    %c1_40 = arith.constant 1 : index
    %c0_41 = arith.constant 0 : index
    %c0_42 = arith.constant 0 : index
    %30 = vector.load %arg2[%c1_40, %c0_41, %c0_42] : memref<16x128x128xbf16, #tpu.memory_space<vmem>>, vector<1x128x128xbf16>
    %31 = vector.shape_cast %30 : vector<1x128x128xbf16> to vector<128x128xbf16>
    %cst_43 = arith.constant dense<0.000000e+00> : vector<256x128xf32>
    %32 = tpu.matmul %8, %31, %cst_43 {dimension_numbers = #tpu.dot_dimension_numbers<[1], [0], [0], [1], [0, 0, 1, 1], [], []>} : vector<256x128xbf16>, vector<128x128xbf16>, vector<256x128xf32> -> vector<256x128xf32>
    %33 = arith.addf %29, %32 : vector<256x128xf32>
    %c2_44 = arith.constant 2 : index
    %c0_45 = arith.constant 0 : index
    %c0_46 = arith.constant 0 : index
    %34 = vector.load %arg2[%c2_44, %c0_45, %c0_46] : memref<16x128x128xbf16, #tpu.memory_space<vmem>>, vector<1x128x128xbf16>
    %35 = vector.shape_cast %34 : vector<1x128x128xbf16> to vector<128x128xbf16>
    %cst_47 = arith.constant dense<0.000000e+00> : vector<256x128xf32>
    %36 = tpu.matmul %12, %35, %cst_47 {dimension_numbers = #tpu.dot_dimension_numbers<[1], [0], [0], [1], [0, 0, 1, 1], [], []>} : vector<256x128xbf16>, vector<128x128xbf16>, vector<256x128xf32> -> vector<256x128xf32>
    %37 = arith.addf %33, %36 : vector<256x128xf32>
    %c3 = arith.constant 3 : index
    %c0_48 = arith.constant 0 : index
    %c0_49 = arith.constant 0 : index
    %38 = vector.load %arg2[%c3, %c0_48, %c0_49] : memref<16x128x128xbf16, #tpu.memory_space<vmem>>, vector<1x128x128xbf16>
    %39 = vector.shape_cast %38 : vector<1x128x128xbf16> to vector<128x128xbf16>
    %cst_50 = arith.constant dense<0.000000e+00> : vector<256x128xf32>
    %40 = tpu.matmul %14, %39, %cst_50 {dimension_numbers = #tpu.dot_dimension_numbers<[1], [0], [0], [1], [0, 0, 1, 1], [], []>} : vector<256x128xbf16>, vector<128x128xbf16>, vector<256x128xf32> -> vector<256x128xf32>
    %41 = arith.addf %37, %40 : vector<256x128xf32>
    %c0_51 = arith.constant 0 : index
    %c0_52 = arith.constant 0 : index
    %c0_53 = arith.constant 0 : index
    %c0_54 = arith.constant 0 : index
    %c0_55 = arith.constant 0 : index
    %42 = vector.load %arg4[%c0_51, %c0_52, %c0_53, %c0_54, %c0_55] : memref<1x2x2x256x128xf32, #tpu.memory_space<vmem>>, vector<1x1x1x256x128xf32>
    %43 = vector.shape_cast %42 : vector<1x1x1x256x128xf32> to vector<256x128xf32>
    %44 = vector.shape_cast %41 : vector<256x128xf32> to vector<1x1x1x256x128xf32>
    tpu.vector_store %arg4[%c0_51, %c0_52, %c0_53, %c0_54, %c0_55], %44 {strides = array<i32>} : memref<1x2x2x256x128xf32, #tpu.memory_space<vmem>>, vector<1x1x1x256x128xf32>,
    %c4 = arith.constant 4 : index
    %c0_56 = arith.constant 0 : index
    %c0_57 = arith.constant 0 : index
    %45 = vector.load %arg2[%c4, %c0_56, %c0_57] : memref<16x128x128xbf16, #tpu.memory_space<vmem>>, vector<1x128x128xbf16>
    %46 = vector.shape_cast %45 : vector<1x128x128xbf16> to vector<128x128xbf16>
    %cst_58 = arith.constant dense<0.000000e+00> : vector<256x128xf32>
    %47 = tpu.matmul %8, %46, %cst_58 {dimension_numbers = #tpu.dot_dimension_numbers<[1], [0], [0], [1], [0, 0, 1, 1], [], []>} : vector<256x128xbf16>, vector<128x128xbf16>, vector<256x128xf32> -> vector<256x128xf32>
    %48 = arith.addf %25, %47 : vector<256x128xf32>
    %c5 = arith.constant 5 : index
    %c0_59 = arith.constant 0 : index
    %c0_60 = arith.constant 0 : index
    %49 = vector.load %arg2[%c5, %c0_59, %c0_60] : memref<16x128x128xbf16, #tpu.memory_space<vmem>>, vector<1x128x128xbf16>
    %50 = vector.shape_cast %49 : vector<1x128x128xbf16> to vector<128x128xbf16>
    %cst_61 = arith.constant dense<0.000000e+00> : vector<256x128xf32>
    %51 = tpu.matmul %10, %50, %cst_61 {dimension_numbers = #tpu.dot_dimension_numbers<[1], [0], [0], [1], [0, 0, 1, 1], [], []>} : vector<256x128xbf16>, vector<128x128xbf16>, vector<256x128xf32> -> vector<256x128xf32>
    %52 = arith.addf %48, %51 : vector<256x128xf32>
    %c6 = arith.constant 6 : index
    %c0_62 = arith.constant 0 : index
    %c0_63 = arith.constant 0 : index
    %53 = vector.load %arg2[%c6, %c0_62, %c0_63] : memref<16x128x128xbf16, #tpu.memory_space<vmem>>, vector<1x128x128xbf16>
    %54 = vector.shape_cast %53 : vector<1x128x128xbf16> to vector<128x128xbf16>
    %cst_64 = arith.constant dense<0.000000e+00> : vector<256x128xf32>
    %55 = tpu.matmul %14, %54, %cst_64 {dimension_numbers = #tpu.dot_dimension_numbers<[1], [0], [0], [1], [0, 0, 1, 1], [], []>} : vector<256x128xbf16>, vector<128x128xbf16>, vector<256x128xf32> -> vector<256x128xf32>
    %56 = arith.addf %52, %55 : vector<256x128xf32>
    %c7 = arith.constant 7 : index
    %c0_65 = arith.constant 0 : index
    %c0_66 = arith.constant 0 : index
    %57 = vector.load %arg2[%c7, %c0_65, %c0_66] : memref<16x128x128xbf16, #tpu.memory_space<vmem>>, vector<1x128x128xbf16>
    %58 = vector.shape_cast %57 : vector<1x128x128xbf16> to vector<128x128xbf16>
    %cst_67 = arith.constant dense<0.000000e+00> : vector<256x128xf32>
    %59 = tpu.matmul %16, %58, %cst_67 {dimension_numbers = #tpu.dot_dimension_numbers<[1], [0], [0], [1], [0, 0, 1, 1], [], []>} : vector<256x128xbf16>, vector<128x128xbf16>, vector<256x128xf32> -> vector<256x128xf32>
    %60 = arith.addf %56, %59 : vector<256x128xf32>
    %c0_68 = arith.constant 0 : index
    %c0_69 = arith.constant 0 : index
    %c1_70 = arith.constant 1 : index
    %c0_71 = arith.constant 0 : index
    %c0_72 = arith.constant 0 : index
    %61 = vector.load %arg4[%c0_68, %c0_69, %c1_70, %c0_71, %c0_72] : memref<1x2x2x256x128xf32, #tpu.memory_space<vmem>>, vector<1x1x1x256x128xf32>
    %62 = vector.shape_cast %61 : vector<1x1x1x256x128xf32> to vector<256x128xf32>
    %63 = vector.shape_cast %60 : vector<256x128xf32> to vector<1x1x1x256x128xf32>
    tpu.vector_store %arg4[%c0_68, %c0_69, %c1_70, %c0_71, %c0_72], %63 {strides = array<i32>} : memref<1x2x2x256x128xf32, #tpu.memory_space<vmem>>, vector<1x1x1x256x128xf32>,
    %c8 = arith.constant 8 : index
    %c0_73 = arith.constant 0 : index
    %c0_74 = arith.constant 0 : index
    %64 = vector.load %arg2[%c8, %c0_73, %c0_74] : memref<16x128x128xbf16, #tpu.memory_space<vmem>>, vector<1x128x128xbf16>
    %65 = vector.shape_cast %64 : vector<1x128x128xbf16> to vector<128x128xbf16>
    %cst_75 = arith.constant dense<0.000000e+00> : vector<256x128xf32>
    %66 = tpu.matmul %12, %65, %cst_75 {dimension_numbers = #tpu.dot_dimension_numbers<[1], [0], [0], [1], [0, 0, 1, 1], [], []>} : vector<256x128xbf16>, vector<128x128xbf16>, vector<256x128xf32> -> vector<256x128xf32>
    %67 = arith.addf %25, %66 : vector<256x128xf32>
    %c9 = arith.constant 9 : index
    %c0_76 = arith.constant 0 : index
    %c0_77 = arith.constant 0 : index
    %68 = vector.load %arg2[%c9, %c0_76, %c0_77] : memref<16x128x128xbf16, #tpu.memory_space<vmem>>, vector<1x128x128xbf16>
    %69 = vector.shape_cast %68 : vector<1x128x128xbf16> to vector<128x128xbf16>
    %cst_78 = arith.constant dense<0.000000e+00> : vector<256x128xf32>
    %70 = tpu.matmul %14, %69, %cst_78 {dimension_numbers = #tpu.dot_dimension_numbers<[1], [0], [0], [1], [0, 0, 1, 1], [], []>} : vector<256x128xbf16>, vector<128x128xbf16>, vector<256x128xf32> -> vector<256x128xf32>
    %71 = arith.addf %67, %70 : vector<256x128xf32>
    %c10 = arith.constant 10 : index
    %c0_79 = arith.constant 0 : index
    %c0_80 = arith.constant 0 : index
    %72 = vector.load %arg2[%c10, %c0_79, %c0_80] : memref<16x128x128xbf16, #tpu.memory_space<vmem>>, vector<1x128x128xbf16>
    %73 = vector.shape_cast %72 : vector<1x128x128xbf16> to vector<128x128xbf16>
    %cst_81 = arith.constant dense<0.000000e+00> : vector<256x128xf32>
    %74 = tpu.matmul %18, %73, %cst_81 {dimension_numbers = #tpu.dot_dimension_numbers<[1], [0], [0], [1], [0, 0, 1, 1], [], []>} : vector<256x128xbf16>, vector<128x128xbf16>, vector<256x128xf32> -> vector<256x128xf32>
    %75 = arith.addf %71, %74 : vector<256x128xf32>
    %c11 = arith.constant 11 : index
    %c0_82 = arith.constant 0 : index
    %c0_83 = arith.constant 0 : index
    %76 = vector.load %arg2[%c11, %c0_82, %c0_83] : memref<16x128x128xbf16, #tpu.memory_space<vmem>>, vector<1x128x128xbf16>
    %77 = vector.shape_cast %76 : vector<1x128x128xbf16> to vector<128x128xbf16>
    %cst_84 = arith.constant dense<0.000000e+00> : vector<256x128xf32>
    %78 = tpu.matmul %20, %77, %cst_84 {dimension_numbers = #tpu.dot_dimension_numbers<[1], [0], [0], [1], [0, 0, 1, 1], [], []>} : vector<256x128xbf16>, vector<128x128xbf16>, vector<256x128xf32> -> vector<256x128xf32>
    %79 = arith.addf %75, %78 : vector<256x128xf32>
    %c0_85 = arith.constant 0 : index
    %c1_86 = arith.constant 1 : index
    %c0_87 = arith.constant 0 : index
    %c0_88 = arith.constant 0 : index
    %c0_89 = arith.constant 0 : index
    %80 = vector.load %arg4[%c0_85, %c1_86, %c0_87, %c0_88, %c0_89] : memref<1x2x2x256x128xf32, #tpu.memory_space<vmem>>, vector<1x1x1x256x128xf32>
    %81 = vector.shape_cast %80 : vector<1x1x1x256x128xf32> to vector<256x128xf32>
    %82 = vector.shape_cast %79 : vector<256x128xf32> to vector<1x1x1x256x128xf32>
    tpu.vector_store %arg4[%c0_85, %c1_86, %c0_87, %c0_88, %c0_89], %82 {strides = array<i32>} : memref<1x2x2x256x128xf32, #tpu.memory_space<vmem>>, vector<1x1x1x256x128xf32>,
    %c12 = arith.constant 12 : index
    %c0_90 = arith.constant 0 : index
    %c0_91 = arith.constant 0 : index
    %83 = vector.load %arg2[%c12, %c0_90, %c0_91] : memref<16x128x128xbf16, #tpu.memory_space<vmem>>, vector<1x128x128xbf16>
    %84 = vector.shape_cast %83 : vector<1x128x128xbf16> to vector<128x128xbf16>
    %cst_92 = arith.constant dense<0.000000e+00> : vector<256x128xf32>
    %85 = tpu.matmul %14, %84, %cst_92 {dimension_numbers = #tpu.dot_dimension_numbers<[1], [0], [0], [1], [0, 0, 1, 1], [], []>} : vector<256x128xbf16>, vector<128x128xbf16>, vector<256x128xf32> -> vector<256x128xf32>
    %86 = arith.addf %25, %85 : vector<256x128xf32>
    %c13 = arith.constant 13 : index
    %c0_93 = arith.constant 0 : index
    %c0_94 = arith.constant 0 : index
    %87 = vector.load %arg2[%c13, %c0_93, %c0_94] : memref<16x128x128xbf16, #tpu.memory_space<vmem>>, vector<1x128x128xbf16>
    %88 = vector.shape_cast %87 : vector<1x128x128xbf16> to vector<128x128xbf16>
    %cst_95 = arith.constant dense<0.000000e+00> : vector<256x128xf32>
    %89 = tpu.matmul %16, %88, %cst_95 {dimension_numbers = #tpu.dot_dimension_numbers<[1], [0], [0], [1], [0, 0, 1, 1], [], []>} : vector<256x128xbf16>, vector<128x128xbf16>, vector<256x128xf32> -> vector<256x128xf32>
    %90 = arith.addf %86, %89 : vector<256x128xf32>
    %c14 = arith.constant 14 : index
    %c0_96 = arith.constant 0 : index
    %c0_97 = arith.constant 0 : index
    %91 = vector.load %arg2[%c14, %c0_96, %c0_97] : memref<16x128x128xbf16, #tpu.memory_space<vmem>>, vector<1x128x128xbf16>
    %92 = vector.shape_cast %91 : vector<1x128x128xbf16> to vector<128x128xbf16>
    %cst_98 = arith.constant dense<0.000000e+00> : vector<256x128xf32>
    %93 = tpu.matmul %20, %92, %cst_98 {dimension_numbers = #tpu.dot_dimension_numbers<[1], [0], [0], [1], [0, 0, 1, 1], [], []>} : vector<256x128xbf16>, vector<128x128xbf16>, vector<256x128xf32> -> vector<256x128xf32>
    %94 = arith.addf %90, %93 : vector<256x128xf32>
    %c15 = arith.constant 15 : index
    %c0_99 = arith.constant 0 : index
    %c0_100 = arith.constant 0 : index
    %95 = vector.load %arg2[%c15, %c0_99, %c0_100] : memref<16x128x128xbf16, #tpu.memory_space<vmem>>, vector<1x128x128xbf16>
    %96 = vector.shape_cast %95 : vector<1x128x128xbf16> to vector<128x128xbf16>
    %cst_101 = arith.constant dense<0.000000e+00> : vector<256x128xf32>
    %97 = tpu.matmul %22, %96, %cst_101 {dimension_numbers = #tpu.dot_dimension_numbers<[1], [0], [0], [1], [0, 0, 1, 1], [], []>} : vector<256x128xbf16>, vector<128x128xbf16>, vector<256x128xf32> -> vector<256x128xf32>
    %98 = arith.addf %94, %97 : vector<256x128xf32>
    %c0_102 = arith.constant 0 : index
    %c1_103 = arith.constant 1 : index
    %c1_104 = arith.constant 1 : index
    %c0_105 = arith.constant 0 : index
    %c0_106 = arith.constant 0 : index
    %99 = vector.load %arg4[%c0_102, %c1_103, %c1_104, %c0_105, %c0_106] : memref<1x2x2x256x128xf32, #tpu.memory_space<vmem>>, vector<1x1x1x256x128xf32>
    %100 = vector.shape_cast %99 : vector<1x1x1x256x128xf32> to vector<256x128xf32>
    %101 = vector.shape_cast %98 : vector<256x128xf32> to vector<1x1x1x256x128xf32>
    tpu.vector_store %arg4[%c0_102, %c1_103, %c1_104, %c0_105, %c0_106], %101 {strides = array<i32>} : memref<1x2x2x256x128xf32, #tpu.memory_space<vmem>>, vector<1x1x1x256x128xf32>,
    return
  }
  func.func @transform_0(%arg0: i32) -> (i32, i32, i32, i32) {
    %c0_i32 = arith.constant 0 : i32
    %c0_i32_0 = arith.constant 0 : i32
    %c0_i32_1 = arith.constant 0 : i32
    %c0_i32_2 = arith.constant 0 : i32
    return %arg0, %c0_i32, %c0_i32_0, %c0_i32_1 : i32, i32, i32, i32
  }
  func.func @transform_1(%arg0: i32) -> (i32, i32, i32) {
    %c0_i32 = arith.constant 0 : i32
    %c0_i32_0 = arith.constant 0 : i32
    %c0_i32_1 = arith.constant 0 : i32
    %c0_i32_2 = arith.constant 0 : i32
    return %c0_i32, %c0_i32_0, %c0_i32_1 : i32, i32, i32
  }
  func.func @transform_2(%arg0: i32) -> (i32, i32) {
    %c0_i32 = arith.constant 0 : i32
    %c0_i32_0 = arith.constant 0 : i32
    %c0_i32_1 = arith.constant 0 : i32
    return %c0_i32, %c0_i32_0 : i32, i32
  }
  func.func @transform_3(%arg0: i32) -> (i32, i32, i32, i32, i32) {
    %c0_i32 = arith.constant 0 : i32
    %c0_i32_0 = arith.constant 0 : i32
    %c0_i32_1 = arith.constant 0 : i32
    %c0_i32_2 = arith.constant 0 : i32
    %c0_i32_3 = arith.constant 0 : i32
    return %arg0, %c0_i32, %c0_i32_0, %c0_i32_1, %c0_i32_2 : i32, i32, i32, i32, i32
  }
}

</mosaic_0001>

<bundles_post_ra>
// kernel: upsample_forward.1
= control target key start
LH: loop header
LB: loop body
LE: loop exit
PB: predicated region body
PF: predicated region fallthrough
CT: control target
= control target key end

     0   :  { %s10052_s12 = smov 0   ;;  %s12913_s0 = inlined_call_operand.vmem [shape: bf16[2,16,16,128], index: 0, kind: input, shape index: {}]   ;;  %s12914_s1 = inlined_call_operand.vmem [shape: bf16[16,128,128], index: 1, kind: input, shape index: {}]   ;;  %s12915_s2 = inlined_call_operand.vmem [shape: f32[1,128], index: 2, kind: input, shape index: {}]   ;;  %s12916_s3 = inlined_call_operand.vmem [shape: f32[2,2,2,256,128], index: 3, kind: output, shape index: {}]  }
   0x1 LB: > { %s7474_s13 = sadd.s32 4294967295, %s10029_s12   ;;  %p7478_p0 = scmp.ge.s32.totalorder %s10029_s12, 1  ;;  %s10029_s12 = sphi %s10052_s12, %s13_s12  }
   0x2   : > { %p137_p1 = scmp.lt.s32.totalorder %s10029_s12, 3 }
   0x4   : > { %p138_p2 = pnand %p7478_p0, %p137_p1 }
   0x6   : > { %141 = sbr.rel (%p138_p2) target bundleno = 844 (0x34c), region = 32 }
   0xd   : > { %v9817_v0 = vld [vmem:[%s12914_s1] sm:$0xff]   ;;  %v10031_v2 = vmov 0   ;;  %v9819_v3 = vld [vmem:[%s12914_s1 + $0x8] sm:$0xff]   ;;  %p161_p3 = scmp.lt.s32.totalorder %s7474_s13, 1  ;;  %v9821_v5 = vld [vmem:[%s12914_s1 + $0x10] sm:$0xff]   ;;  %vm582_vm0 = vcmask 1043456  }
   0xe   : > { %v9818_v1 = vld [vmem:[%s12914_s1 + $0x100] sm:$0xff]   ;;  %172 = vst [vmem:[#allocation2] sm:$0xf] %v10031_v2  ;;  %173 = vst [vmem:[#allocation2 + $0x4] sm:$0xf] %v10031_v2  ;;  %8528 = vmatprep.subr.bf16.mxu0 %v9817_v0  ;;  %v9820_v4 = vld [vmem:[%s12914_s1 + $0x108] sm:$0xff]  }
   0xf   : > { %174 = vst [vmem:[#allocation2 + $0x8] sm:$0x1] %v10031_v2  ;;  %175 = vst [vmem:[#allocation2 + $0xc] sm:$0xf] %v10031_v2  ;;  %8720 = vmatprep.subr.bf16.mxu1 %v9818_v1  ;;  %8529 = vmatpush3.bf16.msra.mxu0 %v9817_v0  ;;  %v9822_v6 = vld [vmem:[%s12914_s1 + $0x110] sm:$0xff]   ;;  %s13186_s13 = smov (!%p161_p3, %s7474_s13), 1 }
  0x10   : > { %176 = vst [vmem:[#allocation2 + $0x10] sm:$0xf] %v10031_v2  ;;  %177 = vst [vmem:[#allocation2 + $0x14] sm:$0x1] %v10031_v2  ;;  %8721 = vmatpush3.bf16.msra.mxu1 %v9818_v1  ;;  %8530 = vmatprep.subr.bf16.mxu0 %v9819_v3  ;;  %v9823_v7 = vld [vmem:[%s12914_s1 + $0x18] sm:$0xff]   ;;  %s8142_s30 = sshll.u32 %s13186_s13, 7 }
  0x11   : > { %178 = vst [vmem:[#allocation2 + $0x18] sm:$0xf] %v10031_v2  ;;  %179 = vst [vmem:[#allocation2 + $0x1c] sm:$0xf] %v10031_v2  ;;  %8722 = vmatprep.subr.bf16.mxu1 %v9820_v4  ;;  %v9824_v8 = vld [vmem:[%s12914_s1 + $0x118] sm:$0xff]   ;;  %v9825_v9 = vld [vmem:[%s12914_s1 + $0x20] sm:$0xff]   ;;  %s10100_s10 = scalar_lea.vmem %s12913_s0, %s8142_s30 }
  0x12   : > { %180 = vst [vmem:[#allocation2 + $0x20] sm:$0x1] %v10031_v2  ;;  %181 = vst [vmem:[#allocation2 + $0x24] sm:$0xf] %v10031_v2  ;;  %v9826_v10 = vld [vmem:[%s12914_s1 + $0x120] sm:$0xff]   ;;  %v9827_v11 = vld [vmem:[%s12914_s1 + $0x28] sm:$0xff]  }
  0x13   : > { %182 = vst [vmem:[#allocation2 + $0x28] sm:$0xf] %v10031_v2  ;;  %183 = vst [vmem:[#allocation2 + $0x2c] sm:$0x1] %v10031_v2  ;;  %8531 = vmatpush3.bf16.msra.mxu0 %v9819_v3  ;;  %vm589_vm1 = vcmask 1040384   ;;  %v9828_v15 = vld [vmem:[%s12914_s1 + $0x128] sm:$0xff]  }
  0x14   : > { %184 = vst [vmem:[#allocation2 + $0x30] sm:$0xf] %v10031_v2  ;;  %185 = vst [vmem:[#allocation2 + $0x34] sm:$0xf] %v10031_v2  ;;  %8723 = vmatpush3.bf16.msra.mxu1 %v9820_v4  ;;  %8532 = vmatprep.subr.bf16.mxu0 %v9821_v5  ;;  %v226_v19 = vld [vmem:[%s10100_s10] sm:$0xf] }
  0x15   : > { %186 = vst [vmem:[#allocation2 + $0x38] sm:$0x1] %v10031_v2  ;;  %187 = vst [vmem:[#allocation2 + $0x3c] sm:$0xf] %v10031_v2  ;;  %8724 = vmatprep.subr.bf16.mxu1 %v9822_v6  ;;  %v699_v12 = vld [vmem:[#allocation2] sm:$0xf] }
  0x16   : > { %188 = vst [vmem:[#allocation2 + $0x40] sm:$0xf] %v10031_v2  ;;  %189 = vst [vmem:[#allocation2 + $0x44] sm:$0x1] %v10031_v2  ;;  %v700_v13 = vld [vmem:[#allocation2 + $0x4] sm:$0xf] }
  0x17   : > { %190 = vst [vmem:[#allocation2 + $0x48] sm:$0xf] %v10031_v2  ;;  %191 = vst [vmem:[#allocation2 + $0x4c] sm:$0xf] %v10031_v2  ;;  %8533 = vmatpush3.bf16.msra.mxu0 %v9821_v5  ;;  %v731_v14 = vld [vmem:[#allocation2 + $0x8] sm:$0x1]  ;;  %v7532_v21 = vcombine.low %v699_v12, %v700_v13 }
  0x18   : > { %192 = vst [vmem:[#allocation2 + $0x50] sm:$0x1] %v10031_v2  ;;  %193 = vst [vmem:[#allocation2 + $0x54] sm:$0xf] %v10031_v2  ;;  %8725 = vmatpush3.bf16.msra.mxu1 %v9822_v6  ;;  %8534 = vmatprep.subr.bf16.mxu0 %v9823_v7  ;;  %v751_v16 = vshrl.u32 %v699_v12, 16  ;;  %v754_v17 = vshll.u32 %v699_v12, 16 }
  0x19   : > { %194 = vst [vmem:[#allocation2 + $0x58] sm:$0xf] %v10031_v2  ;;  %195 = vst [vmem:[#allocation2 + $0x5c] sm:$0x1] %v10031_v2  ;;  %8726 = vmatprep.subr.bf16.mxu1 %v9824_v8  ;;  %v764_v18 = vshrl.u32 %v700_v13, 16  ;;  %v9829_v20 = vld [vmem:[%s12914_s1 + $0x30] sm:$0xff]   ;;  %8544 = vmatprep.mubr.bf16.mxu0 %v7532_v21 }
  0x1a   : > { %196 = vst [vmem:[#allocation2 + $0x60] sm:$0xf] %v10031_v2  ;;  %197 = vst [vmem:[#allocation2 + $0x64] sm:$0xf] %v10031_v2  ;;  %vm747_vm2 = vsmask.f32 3328 }
  0x1b   : > { %198 = vst [vmem:[#allocation2 + $0x68] sm:$0x1] %v10031_v2  ;;  %199 = vst [vmem:[#allocation2 + $0x6c] sm:$0xf] %v10031_v2  ;;  %8535 = vmatpush3.bf16.msra.mxu0 %v9823_v7  ;;  %vm748_vm3 = vsmask.f32 7440 }
  0x1c   : > { %200 = vst [vmem:[#allocation2 + $0x70] sm:$0xf] %v10031_v2  ;;  %201 = vst [vmem:[#allocation2 + $0x74] sm:$0x1] %v10031_v2  ;;  %8727 = vmatpush3.bf16.msra.mxu1 %v9824_v8  ;;  %8536 = vmatprep.subr.bf16.mxu0 %v9825_v9  ;;  %v760_v22 = vshll.u32 %v700_v13, 16  ;;  %v753_v23 = vrot.slane %v751_v16, 4 }
  0x1d   : > { %202 = vst [vmem:[#allocation2 + $0x78] sm:$0xf] %v10031_v2  ;;  %203 = vst [vmem:[#allocation2 + $0x7c] sm:$0xf] %v10031_v2  ;;  %8728 = vmatprep.subr.bf16.mxu1 %v9826_v10  ;;  %v756_v24 = vrot.slane %v754_v17, 5  ;;  %v766_v25 = vrot.slane %v764_v18, 4 }
  0x1e   : > { %204 = vst [vmem:[#allocation2 + $0x80] sm:$0x1] %v10031_v2  ;;  %205 = vst [vmem:[#allocation2 + $0x84] sm:$0xf] %v10031_v2  ;;  %v770_v26 = vshll.u32 %v731_v14, 16  ;;  %v762_v28 = vrot.slane %v760_v22, 5 }
  0x1f   : > { %206 = vst [vmem:[#allocation2 + $0x88] sm:$0xf] %v10031_v2  ;;  %207 = vst [vmem:[#allocation2 + $0x8c] sm:$0x1] %v10031_v2  ;;  %8537 = vmatpush3.bf16.msra.mxu0 %v9825_v9  ;;  %v227_v27 = vld [vmem:[%s10100_s10 + $0x4] sm:$0xf]  ;;  %v757_v31 = vor.u32 %v756_v24, %v753_v23 }
  0x20   : > { %208 = vst [vmem:[#allocation2 + $0x90] sm:$0xf] %v10031_v2  ;;  %209 = vst [vmem:[#allocation2 + $0x94] sm:$0xf] %v10031_v2  ;;  %8729 = vmatpush3.bf16.msra.mxu1 %v9826_v10  ;;  %8538 = vmatprep.subr.bf16.mxu0 %v9827_v11  ;;  %vm258_vm4 = vsmask.f32 256  ;;  %v767_v38 = vor.u32 %v766_v25, %v762_v28 }
  0x21   : > { %210 = vst [vmem:[#allocation2 + $0x98] sm:$0x1] %v10031_v2  ;;  %211 = vst [vmem:[#allocation2 + $0x9c] sm:$0xf] %v10031_v2  ;;  %vm259_vm5 = vsmask.f32 4368  ;;  %8730 = vmatprep.subr.bf16.mxu1 %v9828_v15 }
  0x22   : > { %212 = vst [vmem:[#allocation2 + $0xa0] sm:$0xf] %v10031_v2  ;;  %213 = vst [vmem:[#allocation2 + $0xa4] sm:$0x1] %v10031_v2  ;;  %v262_v29 = vshrl.u32 %v226_v19, 16  ;;  %v9830_v30 = vld [vmem:[%s12914_s1 + $0x130] sm:$0xff]  }
  0x23   : > { %214 = vst [vmem:[#allocation2 + $0xa8] sm:$0xf] %v10031_v2  ;;  %215 = vst [vmem:[#allocation2 + $0xac] sm:$0xf] %v10031_v2  ;;  %v772_v33 = vrot.slane %v770_v26, 5  ;;  %v265_v34 = vshll.u32 %v226_v19, 16  ;;  %8539 = vmatpush3.bf16.msra.mxu0 %v9827_v11 }
  0x24   : > { %216 = vst [vmem:[#allocation2 + $0xb0] sm:$0x1] %v10031_v2  ;;  %217 = vst [vmem:[#allocation2 + $0xb4] sm:$0xf] %v10031_v2  ;;  %v270_v35 = vshrl.u32 %v227_v27, 16  ;;  %v9831_v37 = vld [vmem:[%s12914_s1 + $0x38] sm:$0xff]   ;;  %8731 = vmatpush3.bf16.msra.mxu1 %v9828_v15  ;;  %8540 = vmatprep.subr.bf16.mxu0 %v9829_v20 }
  0x25   : > { %218 = vst [vmem:[#allocation2 + $0xb8] sm:$0xf] %v10031_v2  ;;  %219 = vst [vmem:[#allocation2 + $0xbc] sm:$0x1] %v10031_v2  ;;  %v585_v36 = vld [vmem:[#allocation2 + $0xc] sm:$0xf]  ;;  %8732 = vmatprep.subr.bf16.mxu1 %v9830_v30 }
  0x26   : > { %220 = vst [vmem:[#allocation2 + $0xc0] sm:$0xf] %v10031_v2  ;;  %221 = vst [vmem:[#allocation2 + $0xc4] sm:$0xf] %v10031_v2  ;;  %v13002_v39 = vmov 0  ;;  %v264_v40 = vrot.slane %v262_v29, 7 }
  0x27   : > { %222 = vst [vmem:[#allocation2 + $0xc8] sm:$0x1] %v10031_v2  ;;  %223 = vst [vmem:[#allocation2 + $0xcc] sm:$0xf] %v10031_v2  ;;  %v273_v41 = vshll.u32 %v227_v27, 16  ;;  %v758_v42 = vrot.slane %v757_v31, 4  ;;  %8541 = vmatpush3.bf16.msra.mxu0 %v9829_v20 }
  0x28   : > { %224 = vst [vmem:[#allocation2 + $0xd0] sm:$0xf] %v10031_v2  ;;  %225 = vst [vmem:[#allocation2 + $0xd4] sm:$0x1] %v10031_v2  ;;  %vm583_vm8 = vsmask.f32 7938  ;;  %v267_v47 = vor.u32 %v265_v34, %v264_v40  ;;  %8733 = vmatpush3.bf16.msra.mxu1 %v9830_v30  ;;  %8542 = vmatprep.subr.bf16.mxu0 %v9831_v37 }
  0x29   : > { %vm10118_vm6 = vmor %vm747_vm2, %vm748_vm3  ;;  %v272_v43 = vrot.slane %v270_v35, 7  ;;  %v13005_v44 = vmov 0  ;;  %v591_v45 = vld [vmem:[#allocation2 + $0x14] sm:$0x1]  ;;  %v768_v46 = vrot.slane %v767_v38, 4  ;;  %v268_v48 = vrot.slane %v264_v40, 4 }
  0x2a   : > { %vm10126_vm7 = vmor %vm258_vm4, %vm259_vm5  ;;  %v13008_v49 = vmov 0  ;;  %v9832_v50 = vld [vmem:[%s12914_s1 + $0x138] sm:$0xff]   ;;  %v763_v51 = vsel %vm10118_vm6, %v758_v42, %v762_v28  ;;  %v228_v54 = vld [vmem:[%s10100_s10 + $0x8] sm:$0xf]  ;;  %vm1198_vm11 = vcmask 1042432   ;;  %vm1199_vm12 = vcmask 1046532  }
  0x2b   : > { %v13003_v39 = vsel %vm10126_vm7, 4294967295, %v13002_v39  ;;  %vm10131_vm9 = vmand %vm582_vm0, %vm583_vm8  ;;  %v275_v52 = vor.u32 %v273_v41, %v272_v43  ;;  %v277_v53 = vrot.slane %v272_v43, 4  ;;  %v229_v55 = vld [vmem:[%s10100_s10 + $0xc] sm:$0xf]  ;;  %v773_v56 = vsel %vm10118_vm6, %v768_v46, %v772_v33  ;;  %v10159_v62 = vld [vmem:[%s12914_s1 + $0x40] sm:$0xff]   ;;  %8734 = vmatprep.subr.bf16.mxu1 %v9832_v50  ;;  %8543 = vmatpush3.bf16.msra.mxu0 %v9831_v37  ;;  %s8143_s17 = sshll.u32 %s13186_s13, 10 }
  0x2c   : > { %13004 = vst [vmem:[#allocation3_spill] sm:$0xff] %v13003_v39  ;;  %v13006_v44 = vsel %vm10131_vm9, 4294967295, %v13005_v44  ;;  %vm10137_vm10 = vmand %vm589_vm1, %vm258_vm4  ;;  %v586_v57 = vsel %vm10131_vm9, %v267_v47, %v585_v36  ;;  %v279_v58 = vshrl.u32 %v228_v54, 16  ;;  %v282_v59 = vshll.u32 %v228_v54, 16  ;;  %v594_v1 = vld [vmem:[#allocation2 + $0x18] sm:$0xf]  ;;  %8735 = vmatpush3.bf16.msra.mxu1 %v9832_v50  ;;  %8576 = vmatprep.subr.bf16.mxu0 %v10159_v62  ;;  %s12404_s23 = scalar_lea.vmem %s12916_s3, %s8143_s17 }
  0x2d   : > { %13007 = vst [vmem:[#allocation4_spill] sm:$0xff] %v13006_v44  ;;  %v13009_v49 = vsel %vm10137_vm10, 4294967295, %v13008_v49  ;;  %v10152_v60 = vcombine.low %v763_v51, %v773_v56  ;;  %v276_v61 = vsel %vm10126_vm7, %v268_v48, %v275_v52  ;;  %587 = vst [vmem:[#allocation2 + $0xc] sm:$0xf] %v586_v57  ;;  %v592_v63 = vsel %vm10137_vm10, %v277_v53, %v591_v45  ;;  %v230_v2 = vld [vmem:[%s10100_s10 + $0x10] sm:$0xf] }
  0x2e   : > { %13010 = vst [vmem:[#allocation5_spill] sm:$0xff] %v13009_v49  ;;  %v287_v0 = vshrl.u32 %v229_v55, 16  ;;  %v231_v3 = vld [vmem:[%s10100_s10 + $0x14] sm:$0xf]  ;;  %588 = vst [vmem:[#allocation2 + $0x10] sm:$0xf] %v276_v61 }
  0x2f   : > { %593 = vst [vmem:[#allocation2 + $0x14] sm:$0x1] %v592_v63  ;;  %v281_v4 = vrot.slane %v279_v58, 7  ;;  %v290_v5 = vshll.u32 %v229_v55, 16  ;;  %v598_v6 = vld [vmem:[#allocation2 + $0x20] sm:$0x1]  ;;  %8736 = vmatprep.mubr.bf16.mxu1 %v10152_v60  ;;  %vm10567_vm13 = vmor %vm1198_vm11, %vm1199_vm12 }
  0x30   : > { %v296_v7 = vshrl.u32 %v230_v2, 16  ;;  %v299_v8 = vshll.u32 %v230_v2, 16  ;;  %v10169_v9 = vld [vmem:[%s12914_s1 + $0x140] sm:$0xff]   ;;  %v289_v10 = vrot.slane %v287_v0, 7  ;;  %v304_v11 = vshrl.u32 %v231_v3, 16  ;;  %v9839_v46 = vld [vmem:[%s12914_s1 + $0x48] sm:$0xff]  }
  0x31   : > { %v307_v12 = vshll.u32 %v231_v3, 16  ;;  %v601_v13 = vld [vmem:[#allocation2 + $0x24] sm:$0xf]  ;;  %v284_v14 = vor.u32 %v282_v59, %v281_v4  ;;  %v285_v15 = vrot.slane %v281_v4, 4  ;;  %v605_v17 = vld [vmem:[#allocation2 + $0x2c] sm:$0x1]  ;;  %8768 = vmatprep.subr.bf16.mxu1 %v10169_v9 }
  0x32   : > { %v298_v16 = vrot.slane %v296_v7, 7  ;;  %v292_v18 = vor.u32 %v290_v5, %v289_v10  ;;  %v294_v19 = vrot.slane %v289_v10, 4  ;;  %v306_v20 = vrot.slane %v304_v11, 7  ;;  %v232_v24 = vld [vmem:[%s10100_s10 + $0x18] sm:$0xf]  ;;  %v9843_v63 = vld [vmem:[%s12914_s1 + $0x50] sm:$0xff]  }
  0x33   : > { %v595_v21 = vsel %vm10131_vm9, %v284_v14, %v594_v1  ;;  %v233_v25 = vld [vmem:[%s10100_s10 + $0x1c] sm:$0xf]  ;;  %v313_v33 = vshrl.u32 %v232_v24, 16  ;;  %v316_v47 = vshll.u32 %v232_v24, 16  ;;  %v10196_v52 = vld [vmem:[%s10100_s10 + $0x20] sm:$0xf] }
  0x34   : > { %v301_v22 = vor.u32 %v299_v8, %v298_v16  ;;  %v302_v23 = vrot.slane %v298_v16, 4  ;;  %v293_v26 = vsel %vm10126_vm7, %v285_v15, %v292_v18  ;;  %596 = vst [vmem:[#allocation2 + $0x18] sm:$0xf] %v595_v21  ;;  %v599_v27 = vsel %vm10137_vm10, %v294_v19, %v598_v6  ;;  %v701_v30 = vld [vmem:[#allocation2 + $0xc] sm:$0xf] }
  0x35   : > { %v309_v28 = vor.u32 %v307_v12, %v306_v20  ;;  %v311_v29 = vrot.slane %v306_v20, 4  ;;  %597 = vst [vmem:[#allocation2 + $0x1c] sm:$0xf] %v293_v26  ;;  %600 = vst [vmem:[#allocation2 + $0x20] sm:$0x1] %v599_v27  ;;  %v321_v34 = vshrl.u32 %v233_v25, 16 }
  0x36   : > { %v602_v31 = vsel %vm10131_vm9, %v301_v22, %v601_v13  ;;  %v10183_v35 = vld [vmem:[#allocation2 + $0x10] sm:$0xf]  ;;  %v775_v36 = vshrl.u32 %v701_v30, 16  ;;  %v778_v37 = vshll.u32 %v701_v30, 16  ;;  %v732_v38 = vld [vmem:[#allocation2 + $0x14] sm:$0x1] }
  0x37   : > { %v310_v40 = vsel %vm10126_vm7, %v302_v23, %v309_v28  ;;  %603 = vst [vmem:[#allocation2 + $0x24] sm:$0xf] %v602_v31  ;;  %v606_v41 = vsel %vm10137_vm10, %v311_v29, %v605_v17  ;;  %v788_v42 = vshrl.u32 %v10183_v35, 16  ;;  %v7533_v43 = vcombine.low %v701_v30, %v10183_v35  ;;  %v9840_v30 = vld [vmem:[%s12914_s1 + $0x148] sm:$0xff]   ;;  %v608_v31 = vld [vmem:[#allocation2 + $0x30] sm:$0xf] }
  0x38   : > { %v784_v45 = vshll.u32 %v10183_v35, 16  ;;  %604 = vst [vmem:[#allocation2 + $0x28] sm:$0xf] %v310_v40  ;;  %607 = vst [vmem:[#allocation2 + $0x2c] sm:$0x1] %v606_v41  ;;  %v777_v48 = vrot.slane %v775_v36, 4 }
  0x39   : > { %v780_v50 = vrot.slane %v778_v37, 5  ;;  %v794_v51 = vshll.u32 %v732_v38, 16  ;;  %v1210_v53 = vrot.slane %v10183_v35, 5  ;;  %8545 = vmatmul.mubr.bf16.vlgmr.msra.gmra.mrb[0].mxu0 %v7533_v43  ;;  %v790_v55 = vrot.slane %v788_v42, 4 }
  0x3a   : > { %v786_v54 = vrot.slane %v784_v45, 5  ;;  %v315_v56 = vrot.slane %v313_v33, 7  ;;  %8577 = vmatpush3.bf16.msra.mxu0 %v10159_v62  ;;  %v10200_v59 = vrot.slane %v321_v34, 7  ;;  %v324_v61 = vshll.u32 %v233_v25, 16  ;;  %v9847_v33 = vld [vmem:[%s12914_s1 + $0x58] sm:$0xff]  }
  0x3b   : > { %v781_v57 = vor.u32 %v780_v50, %v777_v48  ;;  %v796_v58 = vrot.slane %v794_v51, 5  ;;  %v703_v1 = vld [vmem:[#allocation2 + $0x18] sm:$0xf]  ;;  %8578 = vmatprep.subr.bf16.mxu0 %v9839_v46  ;;  %v330_v4 = vshrl.u32 %v10196_v52, 16  ;;  %v9844_v51 = vld [vmem:[%s12914_s1 + $0x150] sm:$0xff]  }
  0x3c   : > { %v791_v0 = vor.u32 %v790_v55, %v786_v54  ;;  %v10205_v2 = vor.u32 %v316_v47, %v315_v56  ;;  %v319_v3 = vrot.slane %v315_v56, 4  ;;  %v704_v6 = vld [vmem:[#allocation2 + $0x1c] sm:$0xf]  ;;  %v799_v7 = vshrl.u32 %v703_v1, 16  ;;  %v733_v13 = vld [vmem:[#allocation2 + $0x20] sm:$0x1] }
  0x3d   : > { %v782_v5 = vrot.slane %v781_v57, 4  ;;  %v802_v8 = vshll.u32 %v703_v1, 16  ;;  %v326_v62 = vor.u32 %v324_v61, %v10200_v59  ;;  %v812_v11 = vshrl.u32 %v704_v6, 16  ;;  %v612_v45 = vld [vmem:[#allocation2 + $0x38] sm:$0x1] }
  0x3e   : > { %v792_v10 = vrot.slane %v791_v0, 4  ;;  %v7534_v12 = vcombine.low %v703_v1, %v704_v6  ;;  %v808_v14 = vshll.u32 %v704_v6, 16  ;;  %v801_v16 = vrot.slane %v799_v7, 4  ;;  %v705_v19 = vld [vmem:[#allocation2 + $0x24] sm:$0xf]  ;;  %8579 = vmatpush3.bf16.msra.mxu0 %v9839_v46  ;;  %v10251_v6 = vld [vmem:[%s12914_s1 + $0x68] sm:$0xff]  }
  0x3f   : > { %v787_v15 = vsel %vm10118_vm6, %v782_v5, %v786_v54  ;;  %v804_v17 = vrot.slane %v802_v8, 5  ;;  %v818_v18 = vshll.u32 %v733_v13, 16  ;;  %v814_v22 = vrot.slane %v812_v11, 4  ;;  %v706_v23 = vld [vmem:[#allocation2 + $0x28] sm:$0xf]  ;;  %8580 = vmatprep.subr.bf16.mxu0 %v9843_v63  ;;  %v9851_v54 = vld [vmem:[%s12914_s1 + $0x60] sm:$0xff]  }
  0x40   : > { %v797_v20 = vsel %vm10118_vm6, %v792_v10, %v796_v58  ;;  %8548 = vmatprep.mubr.bf16.mxu0 %v7534_v12  ;;  %v810_v21 = vrot.slane %v808_v14, 5  ;;  %v823_v24 = vshrl.u32 %v705_v19, 16  ;;  %v826_v28 = vshll.u32 %v705_v19, 16  ;;  %v734_v29 = vld [vmem:[#allocation2 + $0x2c] sm:$0x1] }
  0x41   : > { %v10213_v25 = vcombine.low %v787_v15, %v797_v20  ;;  %v805_v26 = vor.u32 %v804_v17, %v801_v16  ;;  %v820_v27 = vrot.slane %v818_v18, 5  ;;  %v836_v37 = vshrl.u32 %v706_v23, 16  ;;  %v235_v58 = vld [vmem:[%s10100_s10 + $0x24] sm:$0xf]  ;;  %v10246_v5 = vld [vmem:[%s10100_s10 + $0x2c] sm:$0xf] }
  0x42   : > { %v815_v34 = vor.u32 %v814_v22, %v810_v21  ;;  %v825_v36 = vrot.slane %v823_v24, 4  ;;  %v7535_v38 = vcombine.low %v705_v19, %v706_v23  ;;  %v828_v41 = vrot.slane %v826_v28, 5  ;;  %8581 = vmatpush3.bf16.msra.mxu0 %v9843_v63  ;;  %v10257_v10 = vld [vmem:[%s10100_s10 + $0x30] sm:$0xf]  ;;  %v619_v24 = vld [vmem:[#allocation2 + $0x44] sm:$0x1] }
  0x43   : > { %8737 = vmatmul.mubr.bf16.vlgmr.msra.gmra.mrb[0].mxu1 %v10213_v25  ;;  %v806_v40 = vrot.slane %v805_v26, 4  ;;  %v832_v42 = vshll.u32 %v706_v23, 16  ;;  %v842_v43 = vshll.u32 %v734_v29, 16  ;;  %v838_v47 = vrot.slane %v836_v37, 4  ;;  %8582 = vmatprep.subr.bf16.mxu0 %v9847_v33  ;;  %v622_v26 = vld [vmem:[#allocation2 + $0x48] sm:$0xf] }
  0x44   : > { %8769 = vmatpush3.bf16.msra.mxu1 %v10169_v9  ;;  %v816_v46 = vrot.slane %v815_v34, 4  ;;  %8549 = vmatmul.mubr.bf16.gmra.mrb[4].mxu0 %v7535_v38  ;;  %v327_v48 = vsel %vm10126_vm7, %v319_v3, %v326_v62  ;;  %v328_v50 = vrot.slane %v10200_v59, 4  ;;  %v829_v55 = vor.u32 %v828_v41, %v825_v36  ;;  %v236_v59 = vld [vmem:[%s10100_s10 + $0x28] sm:$0xf]  ;;  %v615_v3 = vld [vmem:[#allocation2 + $0x3c] sm:$0xf] }
  0x45   : > { %v811_v9 = vsel %vm10118_vm6, %v806_v40, %v810_v21  ;;  %v834_v56 = vrot.slane %v832_v42, 5  ;;  %v844_v57 = vrot.slane %v842_v43, 5  ;;  %8770 = vmatprep.subr.bf16.mxu1 %v9840_v30  ;;  %611 = vst [vmem:[#allocation2 + $0x34] sm:$0xf] %v327_v48  ;;  %v609_v63 = vsel %vm10131_vm9, %v10205_v2, %v608_v31  ;;  %v9852_v36 = vld [vmem:[%s12914_s1 + $0x160] sm:$0xff]   ;;  %v9859_v37 = vld [vmem:[%s12914_s1 + $0x70] sm:$0xff]  }
  0x46   : > { %v821_v61 = vsel %vm10118_vm6, %v816_v46, %v820_v27  ;;  %v613_v0 = vsel %vm10137_vm10, %v328_v50, %v612_v45  ;;  %v332_v1 = vrot.slane %v330_v4, 7  ;;  %v830_v8 = vrot.slane %v829_v55, 4  ;;  %610 = vst [vmem:[#allocation2 + $0x30] sm:$0xf] %v609_v63  ;;  %8583 = vmatpush3.bf16.msra.mxu0 %v9847_v33  ;;  %v626_v43 = vld [vmem:[#allocation2 + $0x50] sm:$0x1] }
  0x47   : > { %v10253_v7 = vcombine.low %v811_v9, %v821_v61  ;;  %v839_v62 = vor.u32 %v838_v47, %v834_v56  ;;  %614 = vst [vmem:[#allocation2 + $0x38] sm:$0x1] %v613_v0  ;;  %v333_v2 = vshll.u32 %v10196_v52, 16  ;;  %v338_v11 = vshrl.u32 %v235_v58, 16  ;;  %8584 = vmatprep.subr.bf16.mxu0 %v9851_v54  ;;  %v9848_v52 = vld [vmem:[%s12914_s1 + $0x158] sm:$0xff]  }
  0x48   : > { %8771 = vmatpush3.bf16.msra.mxu1 %v9840_v30  ;;  %v336_v4 = vrot.slane %v332_v1, 4  ;;  %v341_v12 = vshll.u32 %v235_v58, 16  ;;  %v347_v13 = vshrl.u32 %v236_v59, 16  ;;  %v835_v14 = vsel %vm10118_vm6, %v830_v8, %v834_v56  ;;  %v629_v58 = vld [vmem:[#allocation2 + $0x54] sm:$0xf] }
  0x49   : > { %8740 = vmatprep.mubr.bf16.mxu1 %v10253_v7  ;;  %v840_v15 = vrot.slane %v839_v62, 4  ;;  %v335_v16 = vor.u32 %v333_v2, %v332_v1  ;;  %8772 = vmatprep.subr.bf16.mxu1 %v9844_v51  ;;  %v350_v17 = vshll.u32 %v236_v59, 16  ;;  %v340_v18 = vrot.slane %v338_v11, 7  ;;  %v10300_v1 = vld [vmem:[%s10100_s10 + $0x38] sm:$0xf] }
  0x4a   : > { %v10265_v19 = vrot.slane %v347_v13, 7  ;;  %v355_v20 = vshrl.u32 %v10246_v5, 16  ;;  %v358_v21 = vshll.u32 %v10246_v5, 16  ;;  %v364_v27 = vshrl.u32 %v10257_v10, 16  ;;  %8585 = vmatpush3.bf16.msra.mxu0 %v9851_v54  ;;  %v10000_v44 = vld [vmem:[#allocation2 + $0x2c] sm:$0x1] }
  0x4b   : > { %v845_v22 = vsel %vm10118_vm6, %v840_v15, %v844_v57  ;;  %v616_v23 = vsel %vm10131_vm9, %v335_v16, %v615_v3  ;;  %v367_v28 = vshll.u32 %v10257_v10, 16  ;;  %v343_v31 = vor.u32 %v341_v12, %v340_v18  ;;  %8586 = vmatprep.subr.bf16.mxu0 %v10251_v6  ;;  %v9863_v3 = vld [vmem:[%s12914_s1 + $0x78] sm:$0xff]   ;;  %v9856_v10 = vld [vmem:[%s12914_s1 + $0x168] sm:$0xff]  }
  0x4c   : > { %v10275_v29 = vcombine.low %v835_v14, %v845_v22  ;;  %v708_v30 = vld [vmem:[#allocation2 + $0x34] sm:$0xf]  ;;  %v345_v33 = vrot.slane %v340_v18, 4  ;;  %617 = vst [vmem:[#allocation2 + $0x3c] sm:$0xf] %v616_v23  ;;  %8773 = vmatpush3.bf16.msra.mxu1 %v9844_v51  ;;  %v352_v34 = vor.u32 %v350_v17, %v10265_v19  ;;  %v353_v41 = vrot.slane %v10265_v19, 4 }
  0x4d   : > { %v860_v38 = vshrl.u32 %v708_v30, 16  ;;  %v856_v40 = vshll.u32 %v708_v30, 16  ;;  %v357_v42 = vrot.slane %v355_v20, 7  ;;  %8774 = vmatprep.subr.bf16.mxu1 %v9848_v52  ;;  %v707_v45 = vld [vmem:[#allocation2 + $0x30] sm:$0xf]  ;;  %v344_v47 = vsel %vm10126_vm7, %v336_v4, %v343_v31  ;;  %v9865_v19 = vld [vmem:[%s12914_s1 + $0x80] sm:$0xff]  }
  0x4e   : > { %8741 = vmatmul.mubr.bf16.gmra.mrb[4].mxu1 %v10275_v29  ;;  %v735_v46 = vld [vmem:[#allocation2 + $0x38] sm:$0x1]  ;;  %v620_v48 = vsel %vm10137_vm10, %v345_v33, %v619_v24  ;;  %v623_v50 = vsel %vm10131_vm9, %v352_v34, %v622_v26  ;;  %v10294_v51 = vld [vmem:[%s10100_s10 + $0x34] sm:$0xf]  ;;  %v10296_v54 = vrot.slane %v364_v27, 7  ;;  %v847_v9 = vshrl.u32 %v707_v45, 16  ;;  %8587 = vmatpush3.bf16.msra.mxu0 %v10251_v6 }
  0x4f   : > { %v850_v55 = vshll.u32 %v707_v45, 16  ;;  %v7536_v56 = vcombine.low %v707_v45, %v708_v30  ;;  %v858_v57 = vrot.slane %v856_v40, 5  ;;  %618 = vst [vmem:[#allocation2 + $0x40] sm:$0xf] %v344_v47  ;;  %621 = vst [vmem:[#allocation2 + $0x44] sm:$0x1] %v620_v48  ;;  %v360_v63 = vor.u32 %v358_v21, %v357_v42  ;;  %8588 = vmatprep.subr.bf16.mxu0 %v9859_v37 }
  0x50   : > { %624 = vst [vmem:[#allocation2 + $0x48] sm:$0xf] %v623_v50  ;;  %v862_v59 = vrot.slane %v860_v38, 4  ;;  %v866_v61 = vshll.u32 %v735_v46, 16  ;;  %v362_v0 = vrot.slane %v357_v42, 4  ;;  %8775 = vmatpush3.bf16.msra.mxu1 %v9848_v52  ;;  %v849_v5 = vrot.slane %v847_v9, 4 }
  0x51   : > { %v852_v8 = vrot.slane %v850_v55, 5  ;;  %8552 = vmatprep.mubr.bf16.mxu0 %v7536_v56  ;;  %v369_v62 = vor.u32 %v367_v28, %v10296_v54  ;;  %v370_v2 = vrot.slane %v10296_v54, 4  ;;  %v10308_v6 = vld [vmem:[%s10100_s10 + $0x3c] sm:$0xf]  ;;  %8776 = vmatprep.subr.bf16.mxu1 %v9852_v36  ;;  %v361_v12 = vsel %vm10126_vm7, %v353_v41, %v360_v63  ;;  %v9860_v18 = vld [vmem:[%s12914_s1 + $0x170] sm:$0xff]  }
  0x52   : > { %v863_v4 = vor.u32 %v862_v59, %v858_v57  ;;  %v868_v11 = vrot.slane %v866_v61, 5  ;;  %v627_v13 = vsel %vm10137_vm10, %v362_v0, %v626_v43  ;;  %625 = vst [vmem:[#allocation2 + $0x4c] sm:$0xf] %v361_v12  ;;  %v372_v16 = vshrl.u32 %v10294_v51, 16  ;;  %8589 = vmatpush3.bf16.msra.mxu0 %v9859_v37  ;;  %v633_v55 = vld [vmem:[#allocation2 + $0x5c] sm:$0x1] }
  0x53   : > { %v853_v14 = vor.u32 %v852_v8, %v849_v5  ;;  %v709_v15 = vld [vmem:[#allocation2 + $0x3c] sm:$0xf]  ;;  %628 = vst [vmem:[#allocation2 + $0x50] sm:$0x1] %v627_v13  ;;  %v375_v17 = vshll.u32 %v10294_v51, 16  ;;  %v630_v52 = vsel %vm10131_vm9, %v369_v62, %v629_v58  ;;  %v381_v23 = vshrl.u32 %v10300_v1, 16  ;;  %8590 = vmatprep.subr.bf16.mxu0 %v9863_v3 }
  0x54   : > { %v864_v20 = vrot.slane %v863_v4, 4  ;;  %v871_v21 = vshrl.u32 %v709_v15, 16  ;;  %v874_v22 = vshll.u32 %v709_v15, 16  ;;  %631 = vst [vmem:[#allocation2 + $0x54] sm:$0xf] %v630_v52  ;;  %8777 = vmatpush3.bf16.msra.mxu1 %v9852_v36  ;;  %v374_v26 = vrot.slane %v372_v16, 7 }
  0x55   : > { %v854_v24 = vrot.slane %v853_v14, 4  ;;  %v384_v27 = vshll.u32 %v10300_v1, 16  ;;  %v389_v28 = vshrl.u32 %v10308_v6, 16  ;;  %8778 = vmatprep.subr.bf16.mxu1 %v9856_v10  ;;  %v9864_v56 = vld [vmem:[%s12914_s1 + $0x178] sm:$0xff]   ;;  %v242_v52 = vld [vmem:[%s10100_s10 + $0x40] sm:$0xf] }
  0x56   : > { %v869_v30 = vsel %vm10118_vm6, %v864_v20, %v868_v11  ;;  %v10332_v31 = vld [vmem:[#allocation2 + $0x40] sm:$0xf]  ;;  %v873_v33 = vrot.slane %v871_v21, 4  ;;  %v876_v34 = vrot.slane %v874_v22, 5  ;;  %v736_v37 = vld [vmem:[#allocation2 + $0x44] sm:$0x1]  ;;  %8591 = vmatpush3.bf16.msra.mxu0 %v9863_v3  ;;  %v377_v9 = vor.u32 %v375_v17, %v374_v26 }
  0x57   : > { %v859_v38 = vsel %vm10118_vm6, %v854_v24, %v858_v57  ;;  %v884_v36 = vshrl.u32 %v10332_v31, 16  ;;  %v7537_v40 = vcombine.low %v709_v15, %v10332_v31  ;;  %v880_v41 = vshll.u32 %v10332_v31, 16  ;;  %v711_v42 = vld [vmem:[#allocation2 + $0x48] sm:$0xf]  ;;  %8624 = vmatprep.subr.bf16.mxu0 %v9865_v19  ;;  %v9866_v19 = vld [vmem:[%s12914_s1 + $0x180] sm:$0xff]  }
  0x58   : > { %v10339_v43 = vcombine.low %v859_v38, %v869_v30  ;;  %v877_v45 = vor.u32 %v876_v34, %v873_v33  ;;  %v890_v46 = vshll.u32 %v736_v37, 16  ;;  %v895_v47 = vshrl.u32 %v711_v42, 16  ;;  %8779 = vmatpush3.bf16.msra.mxu1 %v9856_v10 }
  0x59   : > { %8553 = vmatmul.mubr.bf16.gmra.mrb[8].mxu0 %v7537_v40  ;;  %v882_v48 = vrot.slane %v880_v41, 5  ;;  %v886_v50 = vrot.slane %v884_v36, 4  ;;  %v898_v51 = vshll.u32 %v711_v42, 16  ;;  %8780 = vmatprep.subr.bf16.mxu1 %v9860_v18  ;;  %v10345_v59 = vld [vmem:[#allocation2 + $0x4c] sm:$0xf]  ;;  %v379_v63 = vrot.slane %v374_v26, 4 }
  0x5a   : > { %8744 = vmatprep.mubr.bf16.mxu1 %v10339_v43  ;;  %v878_v57 = vrot.slane %v877_v45, 4  ;;  %v892_v58 = vrot.slane %v890_v46, 5  ;;  %v897_v61 = vrot.slane %v895_v47, 4  ;;  %v908_v5 = vshrl.u32 %v10345_v59, 16  ;;  %v10349_v62 = vld [vmem:[#allocation2 + $0x50] sm:$0x1] }
  0x5b   : > { %v887_v0 = vor.u32 %v886_v50, %v882_v48  ;;  %v900_v3 = vrot.slane %v898_v51, 5  ;;  %v7538_v8 = vcombine.low %v711_v42, %v10345_v59  ;;  %v10351_v10 = vld [vmem:[#allocation2 + $0x54] sm:$0xf]  ;;  %v904_v11 = vshll.u32 %v10345_v59, 16  ;;  %v243_v36 = vld [vmem:[%s10100_s10 + $0x44] sm:$0xf] }
  0x5c   : > { %v883_v4 = vsel %vm10118_vm6, %v878_v57, %v882_v48  ;;  %v914_v12 = vshll.u32 %v10349_v62, 16  ;;  %v378_v13 = vsel %vm10126_vm7, %v370_v2, %v377_v9  ;;  %8781 = vmatpush3.bf16.msra.mxu1 %v9860_v18  ;;  %v910_v16 = vrot.slane %v908_v5, 4  ;;  %v636_v18 = vld [vmem:[#allocation2 + $0x60] sm:$0xf]  ;;  %v640_v46 = vld [vmem:[#allocation2 + $0x68] sm:$0x1] }
  0x5d   : > { %v888_v14 = vrot.slane %v887_v0, 4  ;;  %8556 = vmatprep.mubr.bf16.mxu0 %v7538_v8  ;;  %v901_v15 = vor.u32 %v900_v3, %v897_v61  ;;  %632 = vst [vmem:[#allocation2 + $0x58] sm:$0xf] %v378_v13  ;;  %v919_v17 = vshrl.u32 %v10351_v10, 16  ;;  %8782 = vmatprep.subr.bf16.mxu1 %v9864_v56  ;;  %v906_v20 = vrot.slane %v904_v11, 5 }
  0x5e   : > { %v916_v54 = vrot.slane %v914_v12, 5  ;;  %v922_v21 = vshll.u32 %v10351_v10, 16  ;;  %v634_v2 = vsel %vm10137_vm10, %v379_v63, %v633_v55  ;;  %v383_v30 = vrot.slane %v381_v23, 7  ;;  %v647_v5 = vld [vmem:[#allocation2 + $0x74] sm:$0x1] }
  0x5f   : > { %v893_v22 = vsel %vm10118_vm6, %v888_v14, %v892_v58  ;;  %v902_v24 = vrot.slane %v901_v15, 4  ;;  %v921_v26 = vrot.slane %v919_v17, 4  ;;  %635 = vst [vmem:[#allocation2 + $0x5c] sm:$0x1] %v634_v2  ;;  %v911_v34 = vor.u32 %v910_v16, %v906_v20  ;;  %v643_v58 = vld [vmem:[#allocation2 + $0x6c] sm:$0xf] }
  0x60   : > { %v10373_v33 = vcombine.low %v883_v4, %v893_v22  ;;  %v924_v37 = vrot.slane %v922_v21, 5  ;;  %v391_v38 = vrot.slane %v389_v28, 7  ;;  %8783 = vmatpush3.bf16.msra.mxu1 %v9864_v56  ;;  %v386_v41 = vor.u32 %v384_v27, %v383_v30  ;;  %v244_v8 = vld [vmem:[%s10100_s10 + $0x48] sm:$0xf]  ;;  %v245_v4 = vld [vmem:[%s10100_s10 + $0x4c] sm:$0xf] }
  0x61   : > { %v907_v40 = vsel %vm10118_vm6, %v902_v24, %v906_v20  ;;  %v387_v42 = vrot.slane %v383_v30, 4  ;;  %v392_v45 = vshll.u32 %v10308_v6, 16  ;;  %8816 = vmatprep.subr.bf16.mxu1 %v9866_v19  ;;  %v912_v23 = vrot.slane %v911_v34, 4  ;;  %v246_v2 = vld [vmem:[%s10100_s10 + $0x50] sm:$0xf] }
  0x62   : > { %8745 = vmatmul.mubr.bf16.gmra.mrb[8].mxu1 %v10373_v33  ;;  %v925_v47 = vor.u32 %v924_v37, %v921_v26  ;;  %v396_v48 = vrot.slane %v391_v38, 4  ;;  %v398_v50 = vshrl.u32 %v242_v52, 16  ;;  %v637_v51 = vsel %vm10131_vm9, %v386_v41, %v636_v18 }
  0x63   : > { %v394_v28 = vor.u32 %v392_v45, %v391_v38  ;;  %v401_v9 = vshll.u32 %v242_v52, 16  ;;  %v406_v1 = vshrl.u32 %v243_v36, 16  ;;  %v917_v27 = vsel %vm10118_vm6, %v912_v23, %v916_v54  ;;  %638 = vst [vmem:[#allocation2 + $0x60] sm:$0xf] %v637_v51 }
  0x64   : > { %v10388_v6 = vld [vmem:[#allocation2 + $0x58] sm:$0xf]  ;;  %v926_v55 = vrot.slane %v925_v47, 4  ;;  %v641_v56 = vsel %vm10137_vm10, %v396_v48, %v640_v46  ;;  %v400_v57 = vrot.slane %v398_v50, 7  ;;  %v10392_v61 = vcombine.low %v907_v40, %v917_v27 }
  0x65   : > { %v932_v63 = vshrl.u32 %v10388_v6, 16  ;;  %v7539_v0 = vcombine.low %v10351_v10, %v10388_v6  ;;  %v928_v3 = vshll.u32 %v10388_v6, 16  ;;  %642 = vst [vmem:[#allocation2 + $0x68] sm:$0x1] %v641_v56  ;;  %v395_v12 = vsel %vm10126_vm7, %v387_v42, %v394_v28 }
  0x66   : > { %v738_v11 = vld [vmem:[#allocation2 + $0x5c] sm:$0x1]  ;;  %v403_v13 = vor.u32 %v401_v9, %v400_v57  ;;  %v404_v14 = vrot.slane %v400_v57, 4  ;;  %v408_v15 = vrot.slane %v406_v1, 7  ;;  %8748 = vmatprep.mubr.bf16.mxu1 %v10392_v61  ;;  %639 = vst [vmem:[#allocation2 + $0x64] sm:$0xf] %v395_v12 }
  0x67   : > { %8557 = vmatmul.mubr.bf16.gmra.mrb[12].mxu0 %v7539_v0  ;;  %v930_v16 = vrot.slane %v928_v3, 5  ;;  %v934_v17 = vrot.slane %v932_v63, 4  ;;  %v938_v10 = vshll.u32 %v738_v11, 16  ;;  %v409_v52 = vshll.u32 %v243_v36, 16  ;;  %v650_v36 = vld [vmem:[#allocation2 + $0x78] sm:$0xf] }
  0x68   : > { %v413_v19 = vrot.slane %v408_v15, 4  ;;  %v644_v20 = vsel %vm10131_vm9, %v403_v13, %v643_v58  ;;  %v415_v54 = vshrl.u32 %v244_v8, 16  ;;  %v418_v21 = vshll.u32 %v244_v8, 16 }
  0x69   : > { %v931_v18 = vsel %vm10118_vm6, %v926_v55, %v930_v16  ;;  %v935_v22 = vor.u32 %v934_v17, %v930_v16  ;;  %v940_v24 = vrot.slane %v938_v10, 5  ;;  %v411_v26 = vor.u32 %v409_v52, %v408_v15  ;;  %645 = vst [vmem:[#allocation2 + $0x6c] sm:$0xf] %v644_v20 }
  0x6a   : > { %v648_v30 = vsel %vm10137_vm10, %v413_v19, %v647_v5  ;;  %v417_v34 = vrot.slane %v415_v54, 7  ;;  %v423_v37 = vshrl.u32 %v245_v4, 16  ;;  %v426_v38 = vshll.u32 %v245_v4, 16  ;;  %v715_v41 = vld [vmem:[#allocation2 + $0x60] sm:$0xf] }
  0x6b   : > { %v936_v40 = vrot.slane %v935_v22, 4  ;;  %v412_v42 = vsel %vm10126_vm7, %v404_v14, %v411_v26  ;;  %649 = vst [vmem:[#allocation2 + $0x74] sm:$0x1] %v648_v30  ;;  %v432_v45 = vshrl.u32 %v246_v2, 16  ;;  %v435_v46 = vshll.u32 %v246_v2, 16 }
  0x6c   : > { %v943_v23 = vshrl.u32 %v715_v41, 16  ;;  %v946_v47 = vshll.u32 %v715_v41, 16  ;;  %v739_v48 = vld [vmem:[#allocation2 + $0x68] sm:$0x1]  ;;  %646 = vst [vmem:[#allocation2 + $0x70] sm:$0xf] %v412_v42  ;;  %v420_v50 = vor.u32 %v418_v21, %v417_v34 }
  0x6d   : > { %v421_v28 = vrot.slane %v417_v34, 4  ;;  %v941_v51 = vsel %vm10118_vm6, %v936_v40, %v940_v24  ;;  %v962_v9 = vshll.u32 %v739_v48, 16  ;;  %v425_v1 = vrot.slane %v423_v37, 7  ;;  %v10418_v56 = vld [vmem:[#allocation2 + $0x64] sm:$0xf] }
  0x6e   : > { %v10414_v27 = vrot.slane %v432_v45, 7  ;;  %v10416_v55 = vcombine.low %v931_v18, %v941_v51  ;;  %v945_v57 = vrot.slane %v943_v23, 4  ;;  %v948_v58 = vrot.slane %v946_v47, 5  ;;  %v654_v4 = vld [vmem:[#allocation2 + $0x80] sm:$0x1] }
  0x6f   : > { %v651_v63 = vsel %vm10131_vm9, %v420_v50, %v650_v36  ;;  %v956_v0 = vshrl.u32 %v10418_v56, 16  ;;  %v7540_v3 = vcombine.low %v715_v41, %v10418_v56  ;;  %v952_v5 = vshll.u32 %v10418_v56, 16  ;;  %v247_v19 = vld [vmem:[%s10100_s10 + $0x54] sm:$0xf]  ;;  %v657_v22 = vld [vmem:[#allocation2 + $0x84] sm:$0xf] }
  0x70   : > { %v964_v8 = vrot.slane %v962_v9, 5  ;;  %652 = vst [vmem:[#allocation2 + $0x78] sm:$0xf] %v651_v63  ;;  %8749 = vmatmul.mubr.bf16.gmra.mrb[12].mxu1 %v10416_v55  ;;  %v949_v11 = vor.u32 %v948_v58, %v945_v57  ;;  %v717_v12 = vld [vmem:[#allocation2 + $0x6c] sm:$0xf]  ;;  %v428_v13 = vor.u32 %v426_v38, %v425_v1  ;;  %v430_v14 = vrot.slane %v425_v1, 4 }
  0x71   : > { %v437_v15 = vor.u32 %v435_v46, %v10414_v27  ;;  %8560 = vmatprep.mubr.bf16.mxu0 %v7540_v3  ;;  %v954_v16 = vrot.slane %v952_v5, 5  ;;  %v958_v17 = vrot.slane %v956_v0, 4  ;;  %v967_v10 = vshrl.u32 %v717_v12, 16  ;;  %v248_v23 = vld [vmem:[%s10100_s10 + $0x58] sm:$0xf] }
  0x72   : > { %v970_v52 = vshll.u32 %v717_v12, 16  ;;  %v950_v20 = vrot.slane %v949_v11, 4  ;;  %v10428_v54 = vld [vmem:[#allocation2 + $0x74] sm:$0x1]  ;;  %v429_v21 = vsel %vm10126_vm7, %v421_v28, %v428_v13  ;;  %v655_v2 = vsel %vm10137_vm10, %v430_v14, %v654_v4  ;;  %v661_v5 = vld [vmem:[#allocation2 + $0x8c] sm:$0x1] }
  0x73   : > { %v438_v18 = vrot.slane %v10414_v27, 4  ;;  %v959_v24 = vor.u32 %v958_v17, %v954_v16  ;;  %v10435_v26 = vld [vmem:[#allocation2 + $0x70] sm:$0xf]  ;;  %v969_v30 = vrot.slane %v967_v10, 4  ;;  %v986_v37 = vshll.u32 %v10428_v54, 16 }
  0x74   : > { %v972_v34 = vrot.slane %v970_v52, 5  ;;  %653 = vst [vmem:[#allocation2 + $0x7c] sm:$0xf] %v429_v21  ;;  %656 = vst [vmem:[#allocation2 + $0x80] sm:$0x1] %v655_v2  ;;  %v980_v38 = vshrl.u32 %v10435_v26, 16  ;;  %v7541_v36 = vcombine.low %v717_v12, %v10435_v26  ;;  %v955_v41 = vsel %vm10118_vm6, %v950_v20, %v954_v16 }
  0x75   : > { %v976_v40 = vshll.u32 %v10435_v26, 16  ;;  %v960_v42 = vrot.slane %v959_v24, 4  ;;  %v440_v46 = vshrl.u32 %v247_v19, 16  ;;  %v443_v28 = vshll.u32 %v247_v19, 16  ;;  %v249_v2 = vld [vmem:[%s10100_s10 + $0x5c] sm:$0xf] }
  0x76   : > { %v973_v45 = vor.u32 %v972_v34, %v969_v30  ;;  %8561 = vmatmul.mubr.bf16.gmra.mrb[16].mxu0 %v7541_v36  ;;  %v982_v48 = vrot.slane %v980_v38, 4  ;;  %v658_v51 = vsel %vm10131_vm9, %v437_v15, %v657_v22  ;;  %v988_v0 = vrot.slane %v986_v37, 5 }
  0x77   : > { %v978_v47 = vrot.slane %v976_v40, 5  ;;  %v719_v50 = vld [vmem:[#allocation2 + $0x78] sm:$0xf]  ;;  %v965_v9 = vsel %vm10118_vm6, %v960_v42, %v964_v8  ;;  %659 = vst [vmem:[#allocation2 + $0x84] sm:$0xf] %v658_v51  ;;  %v442_v3 = vrot.slane %v440_v46, 7 }
  0x78   : > { %v974_v1 = vrot.slane %v973_v45, 4  ;;  %v991_v27 = vshrl.u32 %v719_v50, 16  ;;  %v994_v57 = vshll.u32 %v719_v50, 16  ;;  %v10448_v58 = vcombine.low %v955_v41, %v965_v9  ;;  %v664_v41 = vld [vmem:[#allocation2 + $0x90] sm:$0xf] }
  0x79   : > { %v983_v63 = vor.u32 %v982_v48, %v978_v47  ;;  %v449_v12 = vshrl.u32 %v248_v23, 16  ;;  %v452_v13 = vshll.u32 %v248_v23, 16  ;;  %v445_v17 = vor.u32 %v443_v28, %v442_v3  ;;  %v250_v42 = vld [vmem:[%s10100_s10 + $0x60] sm:$0xf]  ;;  %v668_v9 = vld [vmem:[#allocation2 + $0x98] sm:$0x1] }
  0x7a   : > { %v993_v4 = vrot.slane %v991_v27, 4  ;;  %v996_v11 = vrot.slane %v994_v57, 5  ;;  %8752 = vmatprep.mubr.bf16.mxu1 %v10448_v58  ;;  %v979_v8 = vsel %vm10118_vm6, %v974_v1, %v978_v47  ;;  %v447_v10 = vrot.slane %v442_v3, 4 }
  0x7b   : > { %v984_v14 = vrot.slane %v983_v63, 4  ;;  %v10453_v15 = vld [vmem:[#allocation2 + $0x7c] sm:$0xf]  ;;  %v10455_v16 = vld [vmem:[#allocation2 + $0x80] sm:$0x1]  ;;  %v446_v30 = vsel %vm10126_vm7, %v438_v18, %v445_v17  ;;  %v451_v23 = vrot.slane %v449_v12, 7 }
  0x7c   : > { %v1004_v52 = vshrl.u32 %v10453_v15, 16  ;;  %v7542_v19 = vcombine.low %v719_v50, %v10453_v15  ;;  %v997_v20 = vor.u32 %v996_v11, %v993_v4  ;;  %v1000_v21 = vshll.u32 %v10453_v15, 16  ;;  %660 = vst [vmem:[#allocation2 + $0x88] sm:$0xf] %v446_v30  ;;  %v251_v63 = vld [vmem:[%s10100_s10 + $0x64] sm:$0xf] }
  0x7d   : > { %v989_v22 = vsel %vm10118_vm6, %v984_v14, %v988_v0  ;;  %v1010_v24 = vshll.u32 %v10455_v16, 16  ;;  %v662_v34 = vsel %vm10137_vm10, %v447_v10, %v661_v5  ;;  %v457_v47 = vshrl.u32 %v249_v2, 16  ;;  %v671_v12 = vld [vmem:[#allocation2 + $0x9c] sm:$0xf] }
  0x7e   : > { %v10468_v37 = vcombine.low %v979_v8, %v989_v22  ;;  %8564 = vmatprep.mubr.bf16.mxu0 %v7542_v19  ;;  %v998_v38 = vrot.slane %v997_v20, 4  ;;  %v1002_v36 = vrot.slane %v1000_v21, 5  ;;  %v1006_v40 = vrot.slane %v1004_v52, 4  ;;  %663 = vst [vmem:[#allocation2 + $0x8c] sm:$0x1] %v662_v34 }
  0x7f   : > { %v1012_v45 = vrot.slane %v1010_v24, 5  ;;  %v721_v46 = vld [vmem:[#allocation2 + $0x84] sm:$0xf]  ;;  %v460_v48 = vshll.u32 %v249_v2, 16  ;;  %v454_v1 = vor.u32 %v452_v13, %v451_v23  ;;  %v455_v27 = vrot.slane %v451_v23, 4 }
  0x80   : > { %8753 = vmatmul.mubr.bf16.gmra.mrb[16].mxu1 %v10468_v37  ;;  %v1003_v18 = vsel %vm10118_vm6, %v998_v38, %v1002_v36  ;;  %v1007_v50 = vor.u32 %v1006_v40, %v1002_v36  ;;  %v1015_v28 = vshrl.u32 %v721_v46, 16  ;;  %v1018_v51 = vshll.u32 %v721_v46, 16  ;;  %v252_v52 = vld [vmem:[%s10100_s10 + $0x68] sm:$0xf]  ;;  %v253_v36 = vld [vmem:[%s10100_s10 + $0x6c] sm:$0xf] }
  0x81   : > { %v459_v57 = vrot.slane %v457_v47, 7  ;;  %v466_v0 = vshrl.u32 %v250_v42, 16  ;;  %v469_v11 = vshll.u32 %v250_v42, 16  ;;  %v665_v17 = vsel %vm10131_vm9, %v454_v1, %v664_v41  ;;  %v675_v23 = vld [vmem:[#allocation2 + $0xa4] sm:$0x1] }
  0x82   : > { %v1008_v3 = vrot.slane %v1007_v50, 4  ;;  %v1017_v5 = vrot.slane %v1015_v28, 4  ;;  %v1020_v4 = vrot.slane %v1018_v51, 5  ;;  %666 = vst [vmem:[#allocation2 + $0x90] sm:$0xf] %v665_v17  ;;  %v474_v20 = vshrl.u32 %v251_v63, 16 }
  0x83   : > { %v462_v8 = vor.u32 %v460_v48, %v459_v57  ;;  %v464_v14 = vrot.slane %v459_v57, 4  ;;  %v468_v10 = vrot.slane %v466_v0, 7  ;;  %v477_v21 = vshll.u32 %v251_v63, 16  ;;  %v10482_v22 = vld [vmem:[#allocation2 + $0x88] sm:$0xf] }
  0x84   : > { %v1013_v13 = vsel %vm10118_vm6, %v1008_v3, %v1012_v45  ;;  %v1021_v19 = vor.u32 %v1020_v4, %v1017_v5  ;;  %v1028_v40 = vshrl.u32 %v10482_v22, 16  ;;  %v7543_v41 = vcombine.low %v721_v46, %v10482_v22  ;;  %v10498_v28 = vld [vmem:[#allocation2 + $0x14] sm:$0x1] }
  0x85   : > { %v10480_v2 = vcombine.low %v1003_v18, %v1013_v13  ;;  %v10484_v24 = vld [vmem:[#allocation2 + $0x8c] sm:$0x1]  ;;  %v463_v30 = vsel %vm10126_vm7, %v455_v27, %v462_v8  ;;  %v669_v34 = vsel %vm10137_vm10, %v464_v14, %v668_v9  ;;  %v471_v38 = vor.u32 %v469_v11, %v468_v10  ;;  %v10502_v27 = vld [vmem:[%s10100_s10 + $0x70] sm:$0xf] }
  0x86   : > { %v1022_v42 = vrot.slane %v1021_v19, 4  ;;  %v1024_v45 = vshll.u32 %v10482_v22, 16  ;;  %667 = vst [vmem:[#allocation2 + $0x94] sm:$0xf] %v463_v30  ;;  %670 = vst [vmem:[#allocation2 + $0x98] sm:$0x1] %v669_v34  ;;  %8565 = vmatmul.mubr.bf16.gmra.mrb[20].mxu0 %v7543_v41 }
  0x87   : > { %8756 = vmatprep.mubr.bf16.mxu1 %v10480_v2  ;;  %v1034_v47 = vshll.u32 %v10484_v24, 16  ;;  %v472_v48 = vrot.slane %v468_v10, 4  ;;  %v476_v18 = vrot.slane %v474_v20, 7  ;;  %v672_v50 = vsel %vm10131_vm9, %v471_v38, %v671_v12 }
  0x88   : > { %v1213_v46 = vrot.slane %v10498_v28, 5  ;;  %v1026_v51 = vrot.slane %v1024_v45, 5  ;;  %v1030_v9 = vrot.slane %v1028_v40, 4  ;;  %673 = vst [vmem:[#allocation2 + $0x9c] sm:$0xf] %v672_v50  ;;  %v483_v1 = vshrl.u32 %v252_v52, 16 }
  0x89   : > { %v479_v57 = vor.u32 %v477_v21, %v476_v18  ;;  %v481_v63 = vrot.slane %v476_v18, 4  ;;  %v486_v0 = vshll.u32 %v252_v52, 16  ;;  %v491_v3 = vshrl.u32 %v253_v36, 16  ;;  %v723_v14 = vld [vmem:[#allocation2 + $0x90] sm:$0xf] }
  0x8a   : > { %v1031_v5 = vor.u32 %v1030_v9, %v1026_v51  ;;  %v1036_v4 = vrot.slane %v1034_v47, 5  ;;  %v485_v11 = vrot.slane %v483_v1, 7  ;;  %v494_v8 = vshll.u32 %v253_v36, 16  ;;  %v678_v52 = vld [vmem:[#allocation2 + $0xa8] sm:$0xf] }
  0x8b   : > { %v1027_v12 = vsel %vm10118_vm6, %v1022_v42, %v1026_v51  ;;  %v480_v17 = vsel %vm10126_vm7, %v472_v48, %v479_v57  ;;  %v676_v10 = vsel %vm10137_vm10, %v481_v63, %v675_v23  ;;  %v493_v13 = vrot.slane %v491_v3, 7  ;;  %v682_v18 = vld [vmem:[#allocation2 + $0xb0] sm:$0x1]  ;;  %v9995_v28 = vld [vmem:[#allocation2 + $0x1c] sm:$0xf] }
  0x8c   : > { %v1032_v19 = vrot.slane %v1031_v5, 4  ;;  %v1039_v20 = vshrl.u32 %v723_v14, 16  ;;  %v1042_v21 = vshll.u32 %v723_v14, 16  ;;  %674 = vst [vmem:[#allocation2 + $0xa0] sm:$0xf] %v480_v17  ;;  %v500_v30 = vshrl.u32 %v10502_v27, 16 }
  0x8d   : > { %677 = vst [vmem:[#allocation2 + $0xa4] sm:$0x1] %v676_v10  ;;  %v10511_v34 = vld [vmem:[#allocation2 + $0x94] sm:$0xf]  ;;  %v10513_v38 = vld [vmem:[#allocation2 + $0x98] sm:$0x1]  ;;  %v488_v36 = vor.u32 %v486_v0, %v485_v11  ;;  %v496_v41 = vor.u32 %v494_v8, %v493_v13 }
  0x8e   : > { %v489_v40 = vrot.slane %v485_v11, 4  ;;  %v498_v42 = vrot.slane %v493_v13, 4  ;;  %v1037_v45 = vsel %vm10118_vm6, %v1032_v19, %v1036_v4  ;;  %v1041_v23 = vrot.slane %v1039_v20, 4 }
  0x8f   : > { %v1044_v47 = vrot.slane %v1042_v21, 5  ;;  %v1052_v48 = vshrl.u32 %v10511_v34, 16  ;;  %v10518_v50 = vcombine.low %v1027_v12, %v1037_v45  ;;  %v7544_v51 = vcombine.low %v723_v14, %v10511_v34  ;;  %v725_v57 = vld [vmem:[#allocation2 + $0x9c] sm:$0xf]  ;;  %v255_v14 = vld [vmem:[%s10100_s10 + $0x74] sm:$0xf] }
  0x90   : > { %v1048_v9 = vshll.u32 %v10511_v34, 16  ;;  %v1058_v1 = vshll.u32 %v10513_v38, 16  ;;  %v1063_v3 = vshrl.u32 %v725_v57, 16  ;;  %v1066_v5 = vshll.u32 %v725_v57, 16 }
  0x91   : > { %13011 = vst [vmem:[#allocation6_spill] sm:$0xff] %v10518_v50  ;;  %v1045_v63 = vor.u32 %v1044_v47, %v1041_v23  ;;  %v1054_v0 = vrot.slane %v1052_v48, 4  ;;  %8757 = vmatmul.mubr.bf16.gmra.mrb[20].mxu1 %v10518_v50  ;;  %8568 = vmatprep.mubr.bf16.mxu0 %v7544_v51  ;;  %v497_v8 = vsel %vm10126_vm7, %v489_v40, %v496_v41  ;;  %v502_v23 = vrot.slane %v500_v30, 7  ;;  %v685_v48 = vld [vmem:[#allocation2 + $0xb4] sm:$0xf] }
  0x92   : > { %v1050_v4 = vrot.slane %v1048_v9, 5  ;;  %v1060_v11 = vrot.slane %v1058_v1, 5  ;;  %v679_v12 = vsel %vm10131_vm9, %v488_v36, %v678_v52  ;;  %v1065_v10 = vrot.slane %v1063_v3, 4  ;;  %681 = vst [vmem:[#allocation2 + $0xac] sm:$0xf] %v497_v8 }
  0x93   : > { %v1046_v17 = vrot.slane %v1045_v63, 4  ;;  %v1068_v13 = vrot.slane %v1066_v5, 5  ;;  %680 = vst [vmem:[#allocation2 + $0xa8] sm:$0xf] %v679_v12  ;;  %v683_v19 = vsel %vm10137_vm10, %v498_v42, %v682_v18  ;;  %v10531_v21 = vld [vmem:[#allocation2 + $0xa0] sm:$0xf] }
  0x94   : > { %v1055_v20 = vor.u32 %v1054_v0, %v1050_v4  ;;  %v10533_v45 = vld [vmem:[#allocation2 + $0xa4] sm:$0x1]  ;;  %684 = vst [vmem:[#allocation2 + $0xb0] sm:$0x1] %v683_v19  ;;  %v503_v40 = vshll.u32 %v10502_v27, 16  ;;  %v1076_v36 = vshrl.u32 %v10531_v21, 16  ;;  %v7545_v41 = vcombine.low %v725_v57, %v10531_v21 }
  0x95   : > { %v1051_v52 = vsel %vm10118_vm6, %v1046_v17, %v1050_v4  ;;  %v1069_v47 = vor.u32 %v1068_v13, %v1065_v10  ;;  %v1072_v42 = vshll.u32 %v10531_v21, 16  ;;  %v1082_v18 = vshll.u32 %v10533_v45, 16 }
  0x96   : > { %v1056_v51 = vrot.slane %v1055_v20, 4  ;;  %v505_v9 = vor.u32 %v503_v40, %v502_v23  ;;  %v1212_v30 = vrot.slane %v1210_v53, 4  ;;  %8569 = vmatmul.mubr.bf16.gmra.mrb[24].mxu0 %v7545_v41  ;;  %v1078_v1 = vrot.slane %v1076_v36, 4  ;;  %v689_v40 = vld [vmem:[#allocation2 + $0xbc] sm:$0x1] }
  0x97   : > { %v1070_v27 = vrot.slane %v1069_v47, 4  ;;  %v508_v63 = vshrl.u32 %v255_v14, 16  ;;  %v1074_v3 = vrot.slane %v1072_v42, 5  ;;  %v506_v57 = vrot.slane %v502_v23, 4  ;;  %v1135_v41 = vld [vmem:[#allocation2 + $0xc] sm:$0xe] }
  0x98   : > { %v1061_v0 = vsel %vm10118_vm6, %v1056_v51, %v1060_v11  ;;  %v511_v5 = vshll.u32 %v255_v14, 16  ;;  %v1084_v8 = vrot.slane %v1082_v18, 5  ;;  %v686_v17 = vsel %vm10131_vm9, %v505_v9, %v685_v48 }
  0x99   : > { %v10546_v4 = vcombine.low %v1051_v52, %v1061_v0  ;;  %v510_v12 = vrot.slane %v508_v63, 7  ;;  %v1075_v10 = vsel %vm10118_vm6, %v1070_v27, %v1074_v3  ;;  %v1079_v13 = vor.u32 %v1078_v1, %v1074_v3  ;;  %v10552_v20 = vld [vmem:[#allocation2 + $0xac] sm:$0xf]  ;;  %687 = vst [vmem:[#allocation2 + $0xb4] sm:$0xf] %v686_v17 }
  0x9a   : > { %v727_v19 = vld [vmem:[#allocation2 + $0xa8] sm:$0xf]  ;;  %v1100_v23 = vshrl.u32 %v10552_v20, 16  ;;  %v1096_v48 = vshll.u32 %v10552_v20, 16  ;;  %v13013_v17 = vmov 0 }
  0x9b   : > { %13012 = vst [vmem:[#allocation7_spill] sm:$0xff] %v10546_v4  ;;  %8760 = vmatprep.mubr.bf16.mxu1 %v10546_v4  ;;  %v1087_v11 = vshrl.u32 %v727_v19, 16  ;;  %v1090_v14 = vshll.u32 %v727_v19, 16  ;;  %v7546_v52 = vcombine.low %v727_v19, %v10552_v20  ;;  %v10557_v36 = vld [vmem:[#allocation2 + $0xb0] sm:$0x1]  ;;  %v1080_v47 = vrot.slane %v1079_v13, 4 }
  0x9c   : > { %v1106_v51 = vshll.u32 %v10557_v36, 16  ;;  %v513_v42 = vor.u32 %v511_v5, %v510_v12  ;;  %v1102_v27 = vrot.slane %v1100_v23, 4  ;;  %v515_v1 = vrot.slane %v510_v12, 4 }
  0x9d   : > { %v1089_v18 = vrot.slane %v1087_v11, 4  ;;  %v1092_v9 = vrot.slane %v1090_v14, 5  ;;  %8572 = vmatprep.mubr.bf16.mxu0 %v7546_v52  ;;  %v1085_v63 = vsel %vm10118_vm6, %v1080_v47, %v1084_v8  ;;  %v1098_v0 = vrot.slane %v1096_v48, 5 }
  0x9e   : > { %v514_v3 = vsel %vm10126_vm7, %v506_v57, %v513_v42  ;;  %v13014_v17 = vsel %vm10567_vm13, 4294967295, %v13013_v17  ;;  %v10571_v13 = vcombine.low %v1075_v10, %v1085_v63  ;;  %v690_v12 = vsel %vm10137_vm10, %v515_v1, %v689_v40  ;;  %v9994_v10 = vld [vmem:[#allocation2 + $0x4] sm:$0xf]  ;;  %v1134_v40 = vld [vmem:[#allocation2] sm:$0xe] }
  0x9f   : > { %13015 = vst [vmem:[#allocation8_spill] sm:$0xff] %v13014_v17  ;;  %v1093_v5 = vor.u32 %v1092_v9, %v1089_v18  ;;  %688 = vst [vmem:[#allocation2 + $0xb8] sm:$0xf] %v514_v3  ;;  %v1103_v19 = vor.u32 %v1102_v27, %v1098_v0  ;;  %v1108_v11 = vrot.slane %v1106_v51, 5  ;;  %v7484_v8 = vrot.slane %v1135_v41, 9 }
  0xa0   : > { %13016 = vst [vmem:[#allocation9_spill] sm:$0xff] %v10571_v13  ;;  %691 = vst [vmem:[#allocation2 + $0xbc] sm:$0x1] %v690_v12  ;;  %8761 = vmatmul.mubr.bf16.gmra.mrb[24].mxu1 %v10571_v13  ;;  %v729_v14 = vld [vmem:[#allocation2 + $0xb4] sm:$0xf]  ;;  %v10580_v23 = vsel %vm10567_vm13, %v1212_v30, %v1213_v46  ;;  %v1203_v52 = vrot.slane %v9994_v10, 5 }
  0xa1   : > { %v1094_v57 = vrot.slane %v1093_v5, 4  ;;  %v1104_v47 = vrot.slane %v1103_v19, 4  ;;  %v1111_v48 = vshrl.u32 %v729_v14, 16  ;;  %v1114_v42 = vshll.u32 %v729_v14, 16  ;;  %v1136_v1 = vld [vmem:[#allocation2 + $0x18] sm:$0xe] }
  0xa2   : > { %v10588_v41 = vsel %vm10567_vm13, %v7484_v8, %v1210_v53  ;;  %v1217_v18 = vrot.slane %v9995_v28, 5  ;;  %v1137_v3 = vld [vmem:[#allocation2 + $0x24] sm:$0xe]  ;;  %v1205_v53 = vrot.slane %v1203_v52, 4  ;;  %v9996_v12 = vld [vmem:[#allocation2 + $0x8] sm:$0x1] }
  0xa3   : > { %v1099_v51 = vsel %vm10118_vm6, %v1094_v57, %v1098_v0  ;;  %v1109_v46 = vsel %vm10118_vm6, %v1104_v47, %v1108_v11  ;;  %v1113_v30 = vrot.slane %v1111_v48, 4  ;;  %v1116_v9 = vrot.slane %v1114_v42, 5  ;;  %v9997_v8 = vld [vmem:[#allocation2 + $0x28] sm:$0xf]  ;;  %v9999_v27 = vld [vmem:[#allocation2 + $0x20] sm:$0x1] }
  0xa4   : > { %v10594_v63 = vcombine.low %v1099_v51, %v1109_v46  ;;  %v7483_v0 = vrot.slane %v1134_v40, 9  ;;  %v1206_v19 = vrot.slane %v9996_v12, 5  ;;  %v1224_v57 = vrot.slane %v9997_v8, 5  ;;  %v9998_v12 = vld [vmem:[#allocation2 + $0x34] sm:$0xf] }
  0xa5   : > { %v1117_v5 = vor.u32 %v1116_v9, %v1113_v30  ;;  %v7485_v42 = vrot.slane %v1136_v1, 9  ;;  %v1219_v51 = vrot.slane %v1217_v18, 4  ;;  %v1138_v9 = vld [vmem:[#allocation2 + $0x30] sm:$0xe]  ;;  %v1231_v8 = vrot.slane %v9998_v12, 5 }
  0xa6   : > { %13017 = vst [vmem:[#allocation10_spill] sm:$0xff] %v10594_v63  ;;  %v10596_v35 = vld [vmem:[#allocation2 + $0xb8] sm:$0xf]  ;;  %8764 = vmatprep.mubr.bf16.mxu1 %v10594_v63  ;;  %v1220_v49 = vrot.slane %v9999_v27, 5  ;;  %v1226_v39 = vrot.slane %v1224_v57, 4  ;;  %v1227_v63 = vrot.slane %v10000_v44, 5  ;;  %v1204_v4 = vsel %vm10567_vm13, %v7483_v0, %v1203_v52 }
  0xa7   : > { %v1124_v11 = vshrl.u32 %v10596_v35, 16  ;;  %v7547_v10 = vcombine.low %v729_v14, %v10596_v35  ;;  %v10601_v47 = vld [vmem:[#allocation2 + $0xbc] sm:$0x1]  ;;  %v1120_v48 = vshll.u32 %v10596_v35, 16  ;;  %v1118_v28 = vrot.slane %v1117_v5, 4 }
  0xa8   : > { %v1130_v40 = vshll.u32 %v10601_v47, 16  ;;  %v7486_v14 = vrot.slane %v1137_v3, 9  ;;  %v1238_v5 = vrot.slane %v10332_v31, 5  ;;  %v1233_v12 = vrot.slane %v1231_v8, 4 }
  0xa9   : > { %8573 = vmatmul.mubr.bf16.gmra.mrb[28].mxu0 %v7547_v10  ;;  %v1122_v46 = vrot.slane %v1120_v48, 5  ;;  %v1126_v30 = vrot.slane %v1124_v11, 4  ;;  %v1139_v10 = vld [vmem:[#allocation2 + $0x3c] sm:$0xe]  ;;  %v1207_v11 = vsel %vm10567_vm13, %v1205_v53, %v1206_v19  ;;  %v7487_v48 = vrot.slane %v1138_v9, 9 }
  0xaa   : > { %8592 = vmatprep.mubr.bf16.mxu0 %v10152_v60  ;;  %v1132_v1 = vrot.slane %v1130_v40, 5  ;;  %v10001_v60 = vld [vmem:[#allocation2 + $0x38] sm:$0x1]  ;;  %v10615_v44 = vsel %vm10567_vm13, %v7485_v42, %v1217_v18  ;;  %v1140_v40 = vld [vmem:[#allocation2 + $0x48] sm:$0xe]  ;;  %v10619_v52 = vsel %vm10567_vm13, %v1219_v51, %v1220_v49  ;;  %v10623_v31 = vsel %vm10567_vm13, %v7486_v14, %v1224_v57 }
  0xab   : > { %v1127_v13 = vor.u32 %v1126_v30, %v1122_v46  ;;  %v1234_v50 = vrot.slane %v10001_v60, 5  ;;  %v1123_v27 = vsel %vm10118_vm6, %v1118_v28, %v1122_v46  ;;  %v10627_v0 = vsel %vm10567_vm13, %v1226_v39, %v1227_v63  ;;  %v1143_v19 = vld [vmem:[#allocation2 + $0x6c] sm:$0xe]  ;;  %v10002_v28 = vld [vmem:[#allocation2 + $0x44] sm:$0x1] }
  0xac   : > { %v7488_v53 = vrot.slane %v1139_v10, 9  ;;  %v7716_v18 = vcombine.low %v1204_v4, %v1207_v11  ;;  %v1240_v42 = vrot.slane %v1238_v5, 4  ;;  %v1241_v46 = vrot.slane %v10002_v28, 5  ;;  %v9867_v49 = vld [vmem:[%s12914_s1 + $0x88] sm:$0xff]   ;;  %v10644_v51 = vld [vmem:[#allocation2 + $0x54] sm:$0xe] }
  0xad   : > { %v1128_v3 = vrot.slane %v1127_v13, 4  ;;  %v10638_v57 = vsel %vm10567_vm13, %v7487_v48, %v1231_v8  ;;  %v10642_v39 = vsel %vm10567_vm13, %v1233_v12, %v1234_v50  ;;  %v7489_v63 = vrot.slane %v1140_v40, 9  ;;  %v10003_v50 = vld [vmem:[%s12914_s1 + $0x80] sm:$0xff]   ;;  %v9869_v8 = vld [vmem:[%s12914_s1 + $0x90] sm:$0xff]   ;;  %v1144_v11 = vld [vmem:[#allocation2 + $0x78] sm:$0xe] }
  0xae   : > { %v7718_v4 = vcombine.low %v10615_v44, %v10619_v52  ;;  %v7719_v9 = vcombine.low %v10623_v31, %v10627_v0  ;;  %v1245_v14 = vrot.slane %v10345_v59, 5  ;;  %v7492_v10 = vrot.slane %v1143_v19, 9  ;;  %v10830_v31 = vld [vmem:[#allocation2 + $0x24] sm:$0xf] }
  0xaf   : > { %v1133_v13 = vsel %vm10118_vm6, %v1128_v3, %v1132_v1  ;;  %v1248_v1 = vrot.slane %v10349_v62, 5  ;;  %v1266_v59 = vrot.slane %v10435_v26, 5  ;;  %v7720_v48 = vcombine.low %v10638_v57, %v10642_v39  ;;  %v1146_v3 = vld [vmem:[#allocation2 + $0x90] sm:$0xe]  ;;  %v10850_v62 = vld [vmem:[#allocation2 + $0x14] sm:$0x1] }
  0xb0   : > { %v10631_v30 = vcombine.low %v1123_v27, %v1133_v13  ;;  %v10670_v12 = vsel %vm10567_vm13, %v1240_v42, %v1241_v46  ;;  %v7490_v60 = vrot.slane %v10644_v51, 9  ;;  %v1145_v27 = vld [vmem:[#allocation2 + $0x84] sm:$0xe]  ;;  %v10676_v26 = vsel %vm10567_vm13, %v7489_v63, %v1245_v14  ;;  %v9877_v57 = vld [vmem:[%s12914_s1 + $0xb0] sm:$0xff]   ;;  %13019 = vst [vmem:[#allocation11_spill] sm:$0xff] %v10850_v62 }
  0xb1   : > { %8593 = vmatmul.mubr.bf16.vlgmr.msra.gmra.mrb[0].mxu0 %v10213_v25  ;;  %v10661_v25 = vsel %vm10567_vm13, %v7488_v53, %v1238_v5  ;;  %v1252_v5 = vrot.slane %v10388_v6, 5  ;;  %v1268_v44 = vrot.slane %v1266_v59, 4  ;;  %v1269_v40 = vrot.slane %v10428_v54, 5  ;;  %v10006_v6 = vld [vmem:[#allocation2 + $0x68] sm:$0x1] }
  0xb2   : > { %8765 = vmatmul.mubr.bf16.gmra.mrb[28].mxu1 %v10631_v30  ;;  %8625 = vmatpush3.bf16.msra.mxu0 %v10003_v50  ;;  %v10683_v52 = vrot.slane %v1245_v14, 4  ;;  %v7493_v53 = vrot.slane %v1144_v11, 9  ;;  %v1273_v19 = vrot.slane %v10453_v15, 5  ;;  %v1276_v13 = vrot.slane %v10455_v16, 5  ;;  %v9868_v14 = vld [vmem:[%s12914_s1 + $0x188] sm:$0xff]   ;;  %v9871_v11 = vld [vmem:[%s12914_s1 + $0x98] sm:$0xff]  }
  0xb3   : > { %8784 = vmatprep.mubr.bf16.mxu1 %v7716_v18  ;;  %8596 = vmatprep.mubr.bf16.mxu0 %v10253_v7  ;;  %v10680_v7 = vsel %vm10567_vm13, %v7492_v10, %v1266_v59  ;;  %v1147_v18 = vld [vmem:[#allocation2 + $0x9c] sm:$0xe]  ;;  %v7721_v42 = vcombine.low %v10661_v25, %v10670_v12  ;;  %v10691_v28 = vsel %vm10567_vm13, %v1268_v44, %v1269_v40  ;;  %v7494_v46 = vrot.slane %v1145_v27, 9 }
  0xb4   : > { %8626 = vmatprep.subr.bf16.mxu0 %v9867_v49  ;;  %v1280_v63 = vrot.slane %v10482_v22, 5  ;;  %v10698_v15 = vsel %vm10567_vm13, %v7493_v53, %v1273_v19  ;;  %v1275_v16 = vrot.slane %v1273_v19, 4  ;;  %v7495_v10 = vrot.slane %v1146_v3, 9  ;;  %v1148_v53 = vld [vmem:[#allocation2 + $0xa8] sm:$0xe] }
  0xb5   : > { %v1287_v59 = vrot.slane %v10511_v34, 5  ;;  %v1290_v27 = vrot.slane %v10513_v38, 5  ;;  %v7496_v44 = vrot.slane %v1147_v18, 9  ;;  %v1294_v40 = vrot.slane %v10531_v21, 5  ;;  %v1149_v21 = vld [vmem:[#allocation2 + $0xb4] sm:$0xe] }
  0xb6   : > { %8627 = vmatpush3.bf16.msra.mxu0 %v9867_v49  ;;  %v1283_v49 = vrot.slane %v10484_v24, 5  ;;  %v10706_v50 = vsel %vm10567_vm13, %v7494_v46, %v1280_v63  ;;  %v1282_v22 = vrot.slane %v1280_v63, 4  ;;  %v10715_v24 = vsel %vm10567_vm13, %v1275_v16, %v1276_v13 }
  0xb7   : > { %8628 = vmatprep.subr.bf16.mxu0 %v9869_v8  ;;  %v13018_v3 = vcombine.low %v10588_v41, %v10580_v23  ;;  %v10731_v38 = vsel %vm10567_vm13, %v7495_v10, %v1287_v59  ;;  %v1289_v19 = vrot.slane %v1287_v59, 4  ;;  %v10004_v23 = vld [vmem:[%s12914_s1 + $0x180] sm:$0xff]   ;;  %v10743_v13 = vsel %vm10567_vm13, %v7496_v44, %v1294_v40  ;;  %v10879_v41 = vld [vmem:[#allocation2 + $0x34] sm:$0xf] }
  0xb8   : > { %v10727_v34 = vsel %vm10567_vm13, %v1282_v22, %v1283_v49  ;;  %v1296_v18 = vrot.slane %v1294_v40, 4  ;;  %v1297_v46 = vrot.slane %v10533_v45, 5  ;;  %v7497_v16 = vrot.slane %v1148_v53, 9  ;;  %v10755_v10 = vld [vmem:[#allocation2 + $0x60] sm:$0xe] }
  0xb9   : > { %8597 = vmatmul.mubr.bf16.gmra.mrb[4].mxu0 %v10275_v29  ;;  %v10751_v63 = vsel %vm10567_vm13, %v1289_v19, %v1290_v27  ;;  %v1301_v49 = vrot.slane %v10552_v20, 5  ;;  %v1304_v22 = vrot.slane %v10557_v36, 5  ;;  %v7498_v59 = vrot.slane %v1149_v21, 9  ;;  %v10764_v27 = vld [vmem:[#allocation2 + $0xc] sm:$0xf] }
  0xba   : > { %8785 = vmatmul.mubr.bf16.vlgmr.msra.gmra.mrb[0].mxu1 %v13018_v3  ;;  %8600 = vmatprep.mubr.bf16.mxu0 %v10339_v43  ;;  %v9870_v43 = vld [vmem:[%s12914_s1 + $0x190] sm:$0xff]   ;;  %v1308_v44 = vrot.slane %v10596_v35, 5  ;;  %v1311_v53 = vrot.slane %v10601_v47, 5  ;;  %v10775_v19 = vld [vmem:[#allocation2 + $0x18] sm:$0xf]  ;;  %v1254_v35 = vrot.slane %v1252_v5, 4 }
  0xbb   : > { %8817 = vmatpush3.bf16.msra.mxu1 %v10004_v23  ;;  %8788 = vmatprep.mubr.bf16.mxu1 %v7718_v4  ;;  %v9873_v4 = vld [vmem:[%s12914_s1 + $0xa0] sm:$0xff]   ;;  %v10770_v36 = vsel %vm10567_vm13, %v7497_v16, %v1301_v49  ;;  %v1303_v40 = vrot.slane %v1301_v49, 4  ;;  %v10773_v3 = vld [vmem:[#allocation2 + $0x10] sm:$0xf]  ;;  %v10005_v21 = vld [vmem:[#allocation2 + $0x5c] sm:$0x1] }
  0xbc   : > { %8818 = vmatprep.subr.bf16.mxu1 %v9868_v14  ;;  %8629 = vmatpush3.bf16.msra.mxu0 %v9869_v8  ;;  %v10761_v8 = vsel %vm10567_vm13, %v1296_v18, %v1297_v46  ;;  %v1255_v23 = vrot.slane %v10005_v21, 5  ;;  %v10781_v18 = vsel %vm10567_vm13, %v7498_v59, %v1308_v44  ;;  %v1310_v46 = vrot.slane %v1308_v44, 4  ;;  %v10783_v16 = vld [vmem:[#allocation2 + $0x1c] sm:$0xf]  ;;  %v9875_v44 = vld [vmem:[%s12914_s1 + $0xa8] sm:$0xff]  }
  0xbd   : > { %8630 = vmatprep.subr.bf16.mxu0 %v9871_v11  ;;  %v9872_v47 = vld [vmem:[%s12914_s1 + $0x198] sm:$0xff]   ;;  %v10791_v49 = vsel %vm10567_vm13, %v1303_v40, %v1304_v22  ;;  %v1362_v21 = vshrl.u32 %v10764_v27, 16  ;;  %v1365_v59 = vshll.u32 %v10764_v27, 16  ;;  %v1371_v22 = vshll.u32 %v10773_v3, 16 }
  0xbe   : > { %v1375_v40 = vshrl.u32 %v10773_v3, 16  ;;  %v1262_v0 = vrot.slane %v10006_v6, 5  ;;  %v1386_v51 = vshrl.u32 %v10775_v19, 16  ;;  %v1410_v45 = vshrl.u32 %v10830_v31, 16 }
  0xbf   : > { %8819 = vmatpush3.bf16.msra.mxu1 %v9868_v14  ;;  %v1259_v14 = vrot.slane %v10418_v56, 5  ;;  %v10803_v56 = vsel %vm10567_vm13, %v1310_v46, %v1311_v53  ;;  %v10822_v53 = vsel %vm10567_vm13, %v7490_v60, %v1252_v5  ;;  %v7491_v46 = vrot.slane %v10755_v10, 9 }
  0xc0   : > { %8820 = vmatprep.subr.bf16.mxu1 %v9870_v43  ;;  %8631 = vmatpush3.bf16.msra.mxu0 %v9871_v11  ;;  %v10840_v60 = vsel %vm10567_vm13, %v1254_v35, %v1255_v23  ;;  %v1364_v39 = vrot.slane %v1362_v21, 4  ;;  %v10848_v10 = vrot.slane %v1371_v22, 5  ;;  %v1377_v6 = vrot.slane %v1375_v40, 4  ;;  %v1346_v11 = vld [vmem:[#allocation2 + $0x20] sm:$0x1] }
  0xc1   : > { %8601 = vmatmul.mubr.bf16.gmra.mrb[8].mxu0 %v10373_v33  ;;  %8632 = vmatprep.subr.bf16.mxu0 %v9873_v4  ;;  %v1249_v33 = vsel %vm10567_vm13, %v10683_v52, %v1248_v1  ;;  %v1399_v1 = vshrl.u32 %v10783_v16, 16  ;;  %v1261_v5 = vrot.slane %v1259_v14, 4  ;;  %v10846_v52 = vld [vmem:[#allocation2 + $0x28] sm:$0xf]  ;;  %v1388_v35 = vrot.slane %v1386_v51, 4 }
  0xc2   : > { %8789 = vmatmul.mubr.bf16.gmra.mrb[4].mxu1 %v7719_v9  ;;  %8604 = vmatprep.mubr.bf16.mxu0 %v10392_v61  ;;  %v9874_v61 = vld [vmem:[%s12914_s1 + $0x1a0] sm:$0xff]   ;;  %v1389_v9 = vshll.u32 %v10775_v19, 16  ;;  %v7722_v21 = vcombine.low %v10676_v26, %v1249_v33  ;;  %v1413_v22 = vshll.u32 %v10830_v31, 16  ;;  %v1419_v40 = vshll.u32 %v10846_v52, 16  ;;  %v9879_v26 = vld [vmem:[%s12914_s1 + $0xb8] sm:$0xff]  }
  0xc3   : > { %8792 = vmatprep.mubr.bf16.mxu1 %v7720_v48  ;;  %8821 = vmatpush3.bf16.msra.mxu1 %v9870_v43  ;;  %v1395_v48 = vshll.u32 %v10783_v16, 16  ;;  %v1367_v43 = vrot.slane %v1365_v59, 5  ;;  %v1401_v20 = vrot.slane %v1399_v1, 4  ;;  %v9876_v59 = vld [vmem:[%s12914_s1 + $0x1a8] sm:$0xff]   ;;  %v10869_v1 = vsel %vm10567_vm13, %v1261_v5, %v1262_v0 }
  0xc4   : > { %8822 = vmatprep.subr.bf16.mxu1 %v9872_v47  ;;  %8633 = vmatpush3.bf16.msra.mxu0 %v9873_v4  ;;  %v1391_v23 = vrot.slane %v1389_v9, 5  ;;  %v10865_v9 = vsel %vm10567_vm13, %v7491_v46, %v1259_v14  ;;  %v1381_v14 = vshll.u32 %v10850_v62, 16  ;;  %v1405_v46 = vshll.u32 %v1346_v11, 16  ;;  %v1347_v11 = vld [vmem:[#allocation2 + $0x2c] sm:$0x1] }
  0xc5   : > { %8634 = vmatprep.subr.bf16.mxu0 %v9875_v44  ;;  %v10852_v4 = vrot.slane %v1395_v48, 5  ;;  %v1368_v33 = vor.u32 %v1367_v43, %v1364_v39  ;;  %v1378_v48 = vor.u32 %v1377_v6, %v10848_v10  ;;  %v1412_v5 = vrot.slane %v1410_v45, 4 }
  0xc6   : > { %v1415_v39 = vrot.slane %v1413_v22, 5  ;;  %v10887_v43 = vrot.slane %v1419_v40, 5  ;;  %v7724_v25 = vcombine.low %v10865_v9, %v10869_v1  ;;  %v10898_v12 = vcombine.low %v10764_v27, %v10773_v3  ;;  %v9880_v27 = vld [vmem:[%s12914_s1 + $0x1b8] sm:$0xff]  }
  0xc7   : > { %8823 = vmatpush3.bf16.msra.mxu1 %v9872_v47  ;;  %v10874_v47 = vld [vmem:[#allocation2 + $0x30] sm:$0xf]  ;;  %v1402_v0 = vor.u32 %v1401_v20, %v10852_v4  ;;  %v1443_v20 = vshll.u32 %v10879_v41, 16  ;;  %v1407_v22 = vrot.slane %v1405_v46, 5  ;;  %v1429_v1 = vshll.u32 %v1347_v11, 16 }
  0xc8   : > { %8824 = vmatprep.subr.bf16.mxu1 %v9874_v61  ;;  %8635 = vmatpush3.bf16.msra.mxu0 %v9875_v44  ;;  %v1392_v44 = vor.u32 %v1391_v23, %v1388_v35  ;;  %v1434_v6 = vshrl.u32 %v10874_v47, 16  ;;  %v1437_v29 = vshll.u32 %v10874_v47, 16  ;;  %13020 = vst [vmem:[#allocation12_spill] sm:$0xff] %v10898_v12  ;;  %v1369_v35 = vrot.slane %v1368_v33, 4  ;;  %v10950_v11 = vld [vmem:[#allocation2 + $0x4c] sm:$0xf] }
  0xc9   : > { %8605 = vmatmul.mubr.bf16.gmra.mrb[12].mxu0 %v10416_v55  ;;  %8636 = vmatprep.subr.bf16.mxu0 %v9877_v57  ;;  %v1423_v55 = vshrl.u32 %v10846_v52, 16  ;;  %v1379_v23 = vrot.slane %v1378_v48, 4  ;;  %v1403_v9 = vrot.slane %v1402_v0, 4  ;;  %v1416_v54 = vor.u32 %v1415_v39, %v1412_v5  ;;  %v10915_v48 = vld [vmem:[#allocation2 + $0x38] sm:$0x1] }
  0xca   : > { %8793 = vmatmul.mubr.bf16.gmra.mrb[8].mxu1 %v7721_v42  ;;  %8608 = vmatprep.mubr.bf16.mxu0 %v10448_v58  ;;  %v9878_v58 = vld [vmem:[%s12914_s1 + $0x1b0] sm:$0xff]   ;;  %v10903_v42 = vld [vmem:[%s12914_s1 + $0xc0] sm:$0xff]   ;;  %v1393_v40 = vrot.slane %v1392_v44, 4  ;;  %v1436_v17 = vrot.slane %v1434_v6, 4  ;;  %v1439_v33 = vrot.slane %v1437_v29, 5  ;;  %v10927_v29 = vcombine.low %v10775_v19, %v10783_v16 }
  0xcb   : > { %8796 = vmatprep.mubr.bf16.mxu1 %v7722_v21  ;;  %8825 = vmatpush3.bf16.msra.mxu1 %v9874_v61  ;;  %v1425_v45 = vrot.slane %v1423_v55, 4  ;;  %v10906_v61 = vld [vmem:[#allocation2 + $0x3c] sm:$0xf]  ;;  %v1383_v21 = vrot.slane %v1381_v14, 5  ;;  %v1447_v55 = vshrl.u32 %v10879_v41, 16  ;;  %v10917_v14 = vrot.slane %v1443_v20, 5 }
  0xcc   : > { %8826 = vmatprep.subr.bf16.mxu1 %v9876_v59  ;;  %8637 = vmatpush3.bf16.msra.mxu0 %v9877_v57  ;;  %v10908_v57 = vld [vmem:[#allocation2 + $0x40] sm:$0xf]  ;;  %v1458_v62 = vshrl.u32 %v10906_v61, 16  ;;  %v1461_v44 = vshll.u32 %v10906_v61, 16  ;;  %13021 = vst [vmem:[#allocation13_spill] sm:$0xff] %v10927_v29  ;;  %v13022_v5 = vcombine.low %v10822_v53, %v10840_v60  ;;  %v1398_v19 = vsel %vm10118_vm6, %v1393_v40, %v10852_v4 }
  0xcd   : > { %8638 = vmatprep.subr.bf16.mxu0 %v9879_v26  ;;  %v1426_v51 = vor.u32 %v1425_v45, %v10887_v43  ;;  %v1449_v46 = vrot.slane %v1447_v55, 4  ;;  %v1471_v0 = vshrl.u32 %v10908_v57, 16  ;;  %v1408_v16 = vsel %vm10118_vm6, %v1403_v9, %v1407_v22  ;;  %v10955_v4 = vld [vmem:[%s12914_s1 + $0x1c0] sm:$0xff]  }
  0xce   : > { %v10945_v39 = vrot.slane %v1416_v54, 4  ;;  %v10947_v53 = vrot.slane %v1429_v1, 5  ;;  %v1440_v60 = vor.u32 %v1439_v33, %v1436_v17  ;;  %v1463_v54 = vrot.slane %v1461_v44, 5  ;;  %v10960_v45 = vld [vmem:[#allocation2 + $0x44] sm:$0x1] }
  0xcf   : > { %8827 = vmatpush3.bf16.msra.mxu1 %v9876_v59  ;;  %v1374_v59 = vsel %vm10118_vm6, %v1369_v35, %v10848_v10  ;;  %v10943_v10 = vld [vmem:[#allocation2 + $0x48] sm:$0xf]  ;;  %v10957_v6 = vrot.slane %v1426_v51, 4  ;;  %v1473_v35 = vrot.slane %v1471_v0, 4  ;;  %v10971_v22 = vcombine.low %v10830_v31, %v10846_v52 }
  0xd0   : > { %8828 = vmatprep.subr.bf16.mxu1 %v9878_v58  ;;  %8639 = vmatpush3.bf16.msra.mxu0 %v9879_v26  ;;  %v1467_v26 = vshll.u32 %v10908_v57, 16  ;;  %v1485_v51 = vshll.u32 %v10943_v10, 16  ;;  %v1495_v40 = vshrl.u32 %v10950_v11, 16  ;;  %v10976_v9 = vcombine.low %v1398_v19, %v1408_v16 }
  0xd1   : > { %8609 = vmatmul.mubr.bf16.gmra.mrb[16].mxu0 %v10468_v37  ;;  %8672 = vmatprep.subr.bf16.mxu0 %v10903_v42  ;;  %v1384_v37 = vsel %vm10118_vm6, %v1379_v23, %v1383_v21  ;;  %v1482_v23 = vshrl.u32 %v10943_v10, 16  ;;  %v10967_v21 = vld [vmem:[#allocation2 + $0x54] sm:$0xf]  ;;  %13024 = vst [vmem:[#allocation15_spill] sm:$0xff] %v10971_v22  ;;  %v1422_v1 = vsel %vm10118_vm6, %v10945_v39, %v10887_v43  ;;  %v1441_v55 = vrot.slane %v1440_v60, 4  ;;  %v13030_v39 = vld [vmem:[#allocation7_spill] sm:$0xff] }
  0xd2   : > { %8797 = vmatmul.mubr.bf16.gmra.mrb[12].mxu1 %v13022_v5  ;;  %8612 = vmatprep.mubr.bf16.mxu0 %v10480_v2  ;;  %v1453_v2 = vshll.u32 %v10915_v48, 16  ;;  %v10962_v20 = vcombine.low %v1374_v59, %v1384_v37  ;;  %v10964_v17 = vrot.slane %v1467_v26, 5  ;;  %13025 = vst [vmem:[#allocation16_spill] sm:$0xff] %v10976_v9  ;;  %v1432_v31 = vsel %vm10118_vm6, %v10957_v6, %v10947_v53  ;;  %v10990_v59 = vld [vmem:[#allocation2 + $0x50] sm:$0x1] }
  0xd3   : > { %8800 = vmatprep.mubr.bf16.mxu1 %v7724_v25  ;;  %8829 = vmatpush3.bf16.msra.mxu1 %v9878_v58  ;;  %v1450_v25 = vor.u32 %v1449_v46, %v10917_v14  ;;  %v1460_v58 = vrot.slane %v1458_v62, 4  ;;  %v1491_v62 = vshll.u32 %v10950_v11, 16  ;;  %v10982_v46 = vld [vmem:[#allocation2 + $0x58] sm:$0xf]  ;;  %v1477_v44 = vshll.u32 %v10960_v45, 16  ;;  %13027 = vst [vmem:[#allocation18_spill] sm:$0xff] %v10990_v59 }
  0xd4   : > { %8830 = vmatprep.subr.bf16.mxu1 %v9880_v27  ;;  %13023 = vst [vmem:[#allocation14_spill] sm:$0xff] %v10962_v20  ;;  %v1455_v33 = vrot.slane %v1453_v2, 5  ;;  %13026 = vst [vmem:[#allocation17_spill] sm:$0xff] %v10982_v46  ;;  %v10992_v26 = vld [vmem:[#allocation2 + $0x60] sm:$0xf]  ;;  %v13028_v43 = vld [vmem:[#allocation6_spill] sm:$0xff]  ;;  %v1474_v0 = vor.u32 %v1473_v35, %v10964_v17  ;;  %v13029_v16 = vcombine.low %v10680_v7, %v10691_v28 }
  0xd5   : > { %v1451_v52 = vrot.slane %v1450_v25, 4  ;;  %v1484_v5 = vrot.slane %v1482_v23, 4  ;;  %v1506_v37 = vshrl.u32 %v10967_v21, 16  ;;  %v1509_v19 = vshll.u32 %v10967_v21, 16  ;;  %v11005_v25 = vld [vmem:[#allocation2 + $0x5c] sm:$0x1] }
  0xd6   : > { %v1487_v53 = vrot.slane %v1485_v51, 5  ;;  %v11002_v60 = vrot.slane %v1491_v62, 5  ;;  %v1497_v2 = vrot.slane %v1495_v40, 4  ;;  %v1515_v6 = vshll.u32 %v10982_v46, 16  ;;  %13031 = vst [vmem:[#allocation6_spill] sm:$0xff] %v11005_v25 }
  0xd7   : > { %8831 = vmatpush3.bf16.msra.mxu1 %v9880_v27  ;;  %v1464_v27 = vor.u32 %v1463_v54, %v1460_v58  ;;  %v11007_v58 = vld [vmem:[#allocation2 + $0x64] sm:$0xf]  ;;  %v13033_v54 = vcombine.low %v10698_v15, %v10715_v24  ;;  %v1446_v7 = vsel %vm10118_vm6, %v1441_v55, %v10917_v14  ;;  %v1508_v28 = vrot.slane %v1506_v37, 4 }
  0xd8   : > { %8864 = vmatprep.subr.bf16.mxu1 %v10955_v4  ;;  %13032 = vst [vmem:[#allocation7_spill] sm:$0xff] %v11007_v58  ;;  %v1511_v35 = vrot.slane %v1509_v19, 5  ;;  %v1519_v23 = vshrl.u32 %v10982_v46, 16  ;;  %v1456_v51 = vsel %vm10118_vm6, %v1451_v52, %v1455_v33  ;;  %v1479_v40 = vrot.slane %v1477_v44, 5  ;;  %v11024_v19 = vld [vmem:[#allocation2 + $0x68] sm:$0x1] }
  0xd9   : > { %8613 = vmatmul.mubr.bf16.gmra.mrb[20].mxu0 %v13028_v43  ;;  %v1465_v62 = vrot.slane %v1464_v27, 4  ;;  %v11018_v43 = vrot.slane %v1515_v6, 5  ;;  %v1530_v24 = vshrl.u32 %v10992_v26, 16  ;;  %v1498_v14 = vor.u32 %v1497_v2, %v11002_v60  ;;  %13034 = vst [vmem:[#allocation19_spill] sm:$0xff] %v11024_v19  ;;  %v13037_v6 = vld [vmem:[#allocation9_spill] sm:$0xff] }
  0xda   : > { %8801 = vmatmul.mubr.bf16.gmra.mrb[16].mxu1 %v13029_v16  ;;  %8616 = vmatprep.mubr.bf16.mxu0 %v13030_v39  ;;  %v1475_v16 = vrot.slane %v1474_v0, 4  ;;  %v1501_v39 = vshll.u32 %v10990_v59, 16  ;;  %v1521_v15 = vrot.slane %v1519_v23, 4  ;;  %v1512_v55 = vor.u32 %v1511_v35, %v1508_v28  ;;  %v11050_v23 = vld [vmem:[#allocation2 + $0x70] sm:$0xf] }
  0xdb   : > { %8804 = vmatprep.mubr.bf16.mxu1 %v13033_v54  ;;  %v1488_v54 = vor.u32 %v1487_v53, %v1484_v5  ;;  %v1533_v37 = vshll.u32 %v10992_v26, 16  ;;  %v11028_v33 = vcombine.low %v10874_v47, %v10879_v41  ;;  %v1525_v27 = vshll.u32 %v11005_v25, 16  ;;  %v11147_v59 = vld [vmem:[#allocation2 + $0x98] sm:$0x1] }
  0xdc   : > { %v1522_v52 = vor.u32 %v1521_v15, %v11018_v43  ;;  %v1539_v44 = vshll.u32 %v11007_v58, 16  ;;  %v11033_v0 = vcombine.low %v1422_v1, %v1432_v31  ;;  %v1532_v5 = vrot.slane %v1530_v24, 4  ;;  %v11048_v31 = vld [vmem:[#allocation2 + $0x6c] sm:$0xf]  ;;  %13054 = vst [vmem:[#allocation31_spill] sm:$0xff] %v11147_v59 }
  0xdd   : > { %13035 = vst [vmem:[#allocation20_spill] sm:$0xff] %v11028_v33  ;;  %v1535_v53 = vrot.slane %v1533_v37, 5  ;;  %v1543_v2 = vshrl.u32 %v11007_v58, 16  ;;  %v11037_v28 = vcombine.low %v1446_v7, %v1456_v51  ;;  %v11041_v47 = vcombine.low %v10906_v61, %v10908_v57  ;;  %v13041_v7 = vld [vmem:[#allocation10_spill] sm:$0xff] }
  0xde   : > { %13036 = vst [vmem:[#allocation21_spill] sm:$0xff] %v11033_v0  ;;  %v1470_v35 = vsel %vm10118_vm6, %v1465_v62, %v10964_v17  ;;  %v1480_v1 = vsel %vm10118_vm6, %v1475_v16, %v1479_v40  ;;  %v13040_v15 = vcombine.low %v10706_v50, %v10727_v34  ;;  %v1489_v51 = vrot.slane %v1488_v54, 4  ;;  %v11064_v50 = vld [vmem:[#allocation2 + $0x7c] sm:$0xf] }
  0xdf   : > { %13038 = vst [vmem:[#allocation9_spill] sm:$0xff] %v11037_v28  ;;  %13039 = vst [vmem:[#allocation22_spill] sm:$0xff] %v11041_v47  ;;  %v1499_v61 = vrot.slane %v1498_v14, 4  ;;  %v1503_v24 = vrot.slane %v1501_v39, 5  ;;  %v1513_v37 = vrot.slane %v1512_v55, 4  ;;  %v13042_v17 = vcombine.low %v10731_v38, %v10751_v63 }
  0xe0   : > { %v1523_v62 = vrot.slane %v1522_v52, 4  ;;  %v1527_v40 = vrot.slane %v1525_v27, 5  ;;  %v11061_v16 = vrot.slane %v1539_v44, 5  ;;  %v1549_v25 = vshll.u32 %v11024_v19, 16  ;;  %v11071_v55 = vld [vmem:[#allocation2 + $0x74] sm:$0x1] }
  0xe1   : > { %8617 = vmatmul.mubr.bf16.gmra.mrb[24].mxu0 %v13037_v6  ;;  %v11056_v6 = vld [vmem:[#allocation2 + $0x78] sm:$0xf]  ;;  %v11068_v34 = vcombine.low %v10943_v10, %v10950_v11  ;;  %v1536_v39 = vor.u32 %v1535_v53, %v1532_v5  ;;  %v1545_v54 = vrot.slane %v1543_v2, 4  ;;  %v1554_v14 = vshrl.u32 %v11048_v31, 16  ;;  %13044 = vst [vmem:[#allocation23_spill] sm:$0xff] %v11071_v55 }
  0xe2   : > { %8805 = vmatmul.mubr.bf16.gmra.mrb[20].mxu1 %v13040_v15  ;;  %8620 = vmatprep.mubr.bf16.mxu0 %v13041_v7  ;;  %v11073_v38 = vcombine.low %v1470_v35, %v1480_v1  ;;  %v1557_v63 = vshll.u32 %v11048_v31, 16  ;;  %v1563_v52 = vshll.u32 %v11050_v23, 16  ;;  %v1567_v27 = vshrl.u32 %v11050_v23, 16  ;;  %v11087_v2 = vld [vmem:[#allocation2 + $0x84] sm:$0xf] }
  0xe3   : > { %8808 = vmatprep.mubr.bf16.mxu1 %v13042_v17  ;;  %13043 = vst [vmem:[#allocation10_spill] sm:$0xff] %v11068_v34  ;;  %v1494_v44 = vsel %vm10118_vm6, %v1489_v51, %v11002_v60  ;;  %v1504_v10 = vsel %vm10118_vm6, %v1499_v61, %v1503_v24  ;;  %v1518_v5 = vsel %vm10118_vm6, %v1513_v37, %v11018_v43  ;;  %v1578_v53 = vshrl.u32 %v11056_v6, 16  ;;  %v11095_v7 = vld [vmem:[#allocation2 + $0x88] sm:$0xf] }
  0xe4   : > { %13045 = vst [vmem:[#allocation24_spill] sm:$0xff] %v11073_v38  ;;  %v1528_v35 = vsel %vm10118_vm6, %v1523_v62, %v1527_v40  ;;  %v11091_v1 = vrot.slane %v1549_v25, 5  ;;  %v1581_v15 = vshll.u32 %v11056_v6, 16  ;;  %v1587_v60 = vshll.u32 %v11064_v50, 16  ;;  %v11105_v40 = vld [vmem:[#allocation2 + $0x80] sm:$0x1] }
  0xe5   : > { %v11097_v51 = vrot.slane %v1536_v39, 4  ;;  %v1546_v61 = vor.u32 %v1545_v54, %v11061_v16  ;;  %v1556_v43 = vrot.slane %v1554_v14, 4  ;;  %v1591_v24 = vshrl.u32 %v11064_v50, 16  ;;  %13046 = vst [vmem:[#allocation25_spill] sm:$0xff] %v11105_v40 }
  0xe6   : > { %v1559_v37 = vrot.slane %v1557_v63, 5  ;;  %v11102_v17 = vrot.slane %v1563_v52, 5  ;;  %v1569_v25 = vrot.slane %v1567_v27, 4  ;;  %v1573_v62 = vshll.u32 %v11071_v55, 16  ;;  %v11117_v63 = vld [vmem:[#allocation2 + $0x8c] sm:$0x1] }
  0xe7   : > { %v13047_v19 = vcombine.low %v10743_v13, %v10761_v8  ;;  %v11111_v39 = vcombine.low %v1494_v44, %v1504_v10  ;;  %v11115_v54 = vcombine.low %v10967_v21, %v10982_v46  ;;  %v1583_v14 = vrot.slane %v1581_v15, 5  ;;  %13049 = vst [vmem:[#allocation27_spill] sm:$0xff] %v11117_v63  ;;  %v11119_v52 = vld [vmem:[#allocation2 + $0x90] sm:$0xf]  ;;  %v11128_v10 = vld [vmem:[#allocation2 + $0x94] sm:$0xf] }
  0xe8   : > { %v13050_v27 = vcombine.low %v10770_v36, %v10791_v49  ;;  %v11124_v13 = vrot.slane %v1587_v60, 5  ;;  %v1593_v8 = vrot.slane %v1591_v24, 4  ;;  %v1605_v44 = vshll.u32 %v11087_v2, 16  ;;  %13051 = vst [vmem:[#allocation28_spill] sm:$0xff] %v11128_v10 }
  0xe9   : > { %8621 = vmatmul.mubr.bf16.gmra.mrb[28].mxu0 %v10631_v30  ;;  %13048 = vst [vmem:[#allocation26_spill] sm:$0xff] %v11115_v54  ;;  %v1580_v30 = vrot.slane %v1578_v53, 4  ;;  %v11130_v21 = vcombine.low %v1518_v5, %v1528_v35  ;;  %v11134_v53 = vcombine.low %v10992_v26, %v11007_v58  ;;  %v11136_v15 = vrot.slane %v1546_v61, 4 }
  0xea   : > { %8809 = vmatmul.mubr.bf16.gmra.mrb[24].mxu1 %v13047_v19  ;;  %8640 = vmatprep.mubr.bf16.mxu0 %v10898_v12  ;;  %v1602_v19 = vshrl.u32 %v11087_v2, 16  ;;  %v1611_v36 = vshll.u32 %v11095_v7, 16  ;;  %v1560_v49 = vor.u32 %v1559_v37, %v1556_v43  ;;  %v1615_v24 = vshrl.u32 %v11095_v7, 16  ;;  %v9887_v43 = vld [vmem:[%s12914_s1 + $0xc8] sm:$0xff]  }
  0xeb   : > { %8812 = vmatprep.mubr.bf16.mxu1 %v13050_v27  ;;  %13052 = vst [vmem:[#allocation29_spill] sm:$0xff] %v11130_v21  ;;  %13053 = vst [vmem:[#allocation30_spill] sm:$0xff] %v11134_v53  ;;  %v1607_v27 = vrot.slane %v1605_v44, 5  ;;  %v1570_v12 = vor.u32 %v1569_v25, %v11102_v17  ;;  %v1584_v55 = vor.u32 %v1583_v14, %v1580_v30  ;;  %v1597_v46 = vshll.u32 %v11105_v40, 16  ;;  %v256_v40 = vld [vmem:[%s10100_s10 + $0x78] sm:$0xf] }
  0xec   : > { %v1604_v60 = vrot.slane %v1602_v19, 4  ;;  %v11142_v5 = vrot.slane %v1611_v36, 5  ;;  %v1594_v35 = vor.u32 %v1593_v8, %v11124_v13  ;;  %v1617_v26 = vrot.slane %v1615_v24, 4  ;;  %v11156_v19 = vld [vmem:[#allocation2 + $0x9c] sm:$0xf]  ;;  %v11162_v8 = vld [vmem:[%s12914_s1 + $0xd0] sm:$0xff]  }
  0xed   : > { %v1621_v61 = vshll.u32 %v11117_v63, 16  ;;  %v1626_v58 = vshrl.u32 %v11119_v52, 16  ;;  %v11152_v37 = vrot.slane %v1573_v62, 5  ;;  %v1629_v30 = vshll.u32 %v11119_v52, 16 }
  0xee   : > { %v1608_v25 = vor.u32 %v1607_v27, %v1604_v60  ;;  %v1635_v14 = vshll.u32 %v11128_v10, 16  ;;  %v11164_v44 = vrot.slane %v1560_v49, 4  ;;  %v11168_v62 = vcombine.low %v11048_v31, %v11050_v23 }
  0xef   : > { %v1618_v36 = vor.u32 %v1617_v26, %v11142_v5  ;;  %v1628_v60 = vrot.slane %v1626_v58, 4  ;;  %v13056_v27 = vcombine.low %v10781_v18, %v10803_v56  ;;  %v11175_v24 = vrot.slane %v1570_v12, 4  ;;  %v11190_v56 = vld [vmem:[#allocation2 + $0xa0] sm:$0xf] }
  0xf0   : > { %13055 = vst [vmem:[#allocation32_spill] sm:$0xff] %v11168_v62  ;;  %v1631_v63 = vrot.slane %v1629_v30, 5  ;;  %v1639_v49 = vshrl.u32 %v11128_v10, 16  ;;  %v11182_v31 = vrot.slane %v1584_v55, 4  ;;  %v11184_v58 = vrot.slane %v1594_v35, 4 }
  0xf1   : > { %8641 = vmatmul.mubr.bf16.vlgmr.msra.gmra.mrb[0].mxu0 %v10927_v29  ;;  %v11177_v29 = vrot.slane %v1597_v46, 5  ;;  %v11186_v26 = vrot.slane %v1621_v61, 5  ;;  %v11188_v18 = vrot.slane %v1635_v14, 5  ;;  %v11192_v12 = vrot.slane %v1608_v25, 4  ;;  %v9888_v25 = vld [vmem:[%s12914_s1 + $0x1c8] sm:$0xff]  }
  0xf2   : > { %8813 = vmatmul.mubr.bf16.gmra.mrb[28].mxu1 %v13056_v27  ;;  %8673 = vmatpush3.bf16.msra.mxu0 %v10903_v42  ;;  %v11194_v42 = vrot.slane %v1618_v36, 4  ;;  %v1641_v46 = vrot.slane %v1639_v49, 4  ;;  %v1645_v30 = vshll.u32 %v11147_v59, 16  ;;  %v11197_v27 = vld [vmem:[#allocation2 + $0xa8] sm:$0xf]  ;;  %v1542_v55 = vsel %vm10118_vm6, %v11097_v51, %v11061_v16 }
  0xf3   : > { %8832 = vmatprep.mubr.bf16.mxu1 %v10962_v20  ;;  %8644 = vmatprep.mubr.bf16.mxu0 %v10971_v22  ;;  %v1632_v35 = vor.u32 %v1631_v63, %v1628_v60  ;;  %v1650_v61 = vshrl.u32 %v11156_v19, 16  ;;  %v1653_v14 = vshll.u32 %v11156_v19, 16  ;;  %v11205_v22 = vld [vmem:[#allocation2 + $0xac] sm:$0xf]  ;;  %v1552_v36 = vsel %vm10118_vm6, %v11136_v15, %v11091_v1  ;;  %v11237_v60 = vld [vmem:[#allocation2 + $0xa4] sm:$0x1] }
  0xf4   : > { %8674 = vmatprep.subr.bf16.mxu0 %v9887_v43  ;;  %v1566_v16 = vsel %vm10118_vm6, %v11164_v44, %v11102_v17  ;;  %v1659_v51 = vshll.u32 %v11190_v56, 16  ;;  %v1663_v63 = vshrl.u32 %v11190_v56, 16  ;;  %v1576_v1 = vsel %vm10118_vm6, %v11175_v24, %v11152_v37  ;;  %13057 = vst [vmem:[#allocation33_spill] sm:$0xff] %v11237_v60 }
  0xf5   : > { %v1590_v17 = vsel %vm10118_vm6, %v11182_v31, %v11124_v13  ;;  %v1600_v15 = vsel %vm10118_vm6, %v11184_v58, %v11177_v29  ;;  %v1642_v44 = vor.u32 %v1641_v46, %v11188_v18  ;;  %v1614_v49 = vsel %vm10118_vm6, %v11192_v12, %v11142_v5  ;;  %v11250_v31 = vld [vmem:[#allocation2 + $0xb4] sm:$0xf]  ;;  %v11259_v12 = vld [vmem:[#allocation2 + $0xb8] sm:$0xf] }
  0xf6   : > { %8675 = vmatpush3.bf16.msra.mxu0 %v9887_v43  ;;  %v9895_v43 = vld [vmem:[%s12914_s1 + $0xd8] sm:$0xff]   ;;  %v1624_v37 = vsel %vm10118_vm6, %v11194_v42, %v11186_v26  ;;  %v11247_v13 = vrot.slane %v1645_v30, 5  ;;  %v1674_v24 = vshrl.u32 %v11197_v27, 16  ;;  %v11253_v29 = vrot.slane %v1632_v35, 4  ;;  %v9892_v26 = vld [vmem:[%s12914_s1 + $0x1d0] sm:$0xff]  }
  0xf7   : > { %8676 = vmatprep.subr.bf16.mxu0 %v11162_v8  ;;  %v11255_v58 = vrot.slane %v1650_v61, 4  ;;  %v1677_v46 = vshll.u32 %v11197_v27, 16  ;;  %v1683_v5 = vshll.u32 %v11205_v22, 16  ;;  %v1655_v42 = vrot.slane %v1653_v14, 5 }
  0xf8   : > { %v11266_v30 = vrot.slane %v1659_v51, 5  ;;  %v1665_v35 = vrot.slane %v1663_v63, 4  ;;  %v1687_v61 = vshrl.u32 %v11205_v22, 16  ;;  %v1669_v14 = vshll.u32 %v11237_v60, 16 }
  0xf9   : > { %8645 = vmatmul.mubr.bf16.gmra.mrb[4].mxu0 %v11028_v33  ;;  %v11269_v33 = vld [vmem:[#allocation2 + $0xb0] sm:$0x1]  ;;  %v1676_v51 = vrot.slane %v1674_v24, 4  ;;  %v1679_v20 = vrot.slane %v1677_v46, 5  ;;  %v11280_v63 = vcombine.low %v1542_v55, %v1552_v36  ;;  %v11293_v24 = vcombine.low %v11087_v2, %v11095_v7  ;;  %v9903_v2 = vld [vmem:[%s12914_s1 + $0xe8] sm:$0xff]  }
  0xfa   : > { %8833 = vmatmul.mubr.bf16.vlgmr.msra.gmra.mrb[0].mxu1 %v10976_v9  ;;  %8648 = vmatprep.mubr.bf16.mxu0 %v11041_v47  ;;  %v9899_v47 = vld [vmem:[%s12914_s1 + $0xe0] sm:$0xff]   ;;  %v11276_v9 = vrot.slane %v1642_v44, 4  ;;  %v1689_v59 = vrot.slane %v1687_v61, 4  ;;  %v11289_v44 = vcombine.low %v1566_v16, %v1576_v1  ;;  %v1701_v55 = vshll.u32 %v11250_v31, 16 }
  0xfb   : > { %8865 = vmatpush3.bf16.msra.mxu1 %v10955_v4  ;;  %8836 = vmatprep.mubr.bf16.mxu1 %v11033_v0  ;;  %13058 = vst [vmem:[#allocation34_spill] sm:$0xff] %v11280_v63  ;;  %v11284_v4 = vcombine.low %v11056_v6, %v11064_v50  ;;  %v11286_v0 = vrot.slane %v1683_v5, 5  ;;  %13061 = vst [vmem:[#allocation37_spill] sm:$0xff] %v11293_v24  ;;  %v9896_v6 = vld [vmem:[%s12914_s1 + $0x1d8] sm:$0xff]   ;;  %v11300_v36 = vcombine.low %v1590_v17, %v1600_v15 }
  0xfc   : > { %8866 = vmatprep.subr.bf16.mxu1 %v9888_v25  ;;  %8677 = vmatpush3.bf16.msra.mxu0 %v11162_v8  ;;  %13060 = vst [vmem:[#allocation36_spill] sm:$0xff] %v11289_v44  ;;  %v1698_v8 = vshrl.u32 %v11250_v31, 16  ;;  %v11302_v46 = vcombine.low %v1614_v49, %v1624_v37  ;;  %v11306_v16 = vcombine.low %v11119_v52, %v11128_v10  ;;  %v1707_v1 = vshll.u32 %v11259_v12, 16  ;;  %v257_v49 = vld [vmem:[%s10100_s10 + $0x7c] sm:$0xf] }
  0xfd   : > { %13059 = vst [vmem:[#allocation35_spill] sm:$0xff] %v11284_v4  ;;  %8678 = vmatprep.subr.bf16.mxu0 %v9895_v43  ;;  %v1656_v5 = vor.u32 %v1655_v42, %v11255_v58  ;;  %v1666_v61 = vor.u32 %v1665_v35, %v11266_v30  ;;  %v1693_v17 = vshll.u32 %v11269_v33, 16  ;;  %v1711_v15 = vshrl.u32 %v11259_v12, 16  ;;  %v11322_v10 = vld [vmem:[#allocation2 + $0xbc] sm:$0x1] }
  0xfe   : > { %13062 = vst [vmem:[#allocation38_spill] sm:$0xff] %v11306_v16  ;;  %v11317_v52 = vrot.slane %v1669_v14, 5  ;;  %v1680_v37 = vor.u32 %v1679_v20, %v1676_v51  ;;  %v11320_v60 = vrot.slane %v1698_v8, 4  ;;  %13063 = vst [vmem:[#allocation39_spill] sm:$0xff] %v11322_v10  ;;  %v1638_v58 = vsel %vm10118_vm6, %v11253_v29, %v11188_v18  ;;  %v692_v29 = vld [vmem:[#allocation2 + $0xc0] sm:$0xf] }
  0xff   : > { %8867 = vmatpush3.bf16.msra.mxu1 %v9888_v25  ;;  %v1690_v25 = vor.u32 %v1689_v59, %v11286_v0  ;;  %v1703_v20 = vrot.slane %v1701_v55, 5  ;;  %v517_v42 = vshrl.u32 %v256_v40, 16  ;;  %v9900_v59 = vld [vmem:[%s12914_s1 + $0x1e0] sm:$0xff]   ;;  %v11338_v35 = vrot.slane %v1707_v1, 5  ;;  %v9907_v8 = vld [vmem:[%s12914_s1 + $0xf0] sm:$0xff]  }
 0x100   : > { %8868 = vmatprep.subr.bf16.mxu1 %v9892_v26  ;;  %8679 = vmatpush3.bf16.msra.mxu0 %v9895_v43  ;;  %v1648_v43 = vsel %vm10118_vm6, %v11276_v9, %v11247_v13  ;;  %v1713_v14 = vrot.slane %v1711_v15, 4  ;;  %v520_v51 = vshll.u32 %v256_v40, 16  ;;  %v525_v18 = vshrl.u32 %v257_v49, 16  ;;  %v696_v1 = vld [vmem:[#allocation2 + $0xc8] sm:$0x1] }
 0x101   : > { %8649 = vmatmul.mubr.bf16.gmra.mrb[8].mxu0 %v11068_v34  ;;  %8680 = vmatprep.subr.bf16.mxu0 %v9899_v47  ;;  %v11341_v9 = vrot.slane %v1656_v5, 4  ;;  %v11343_v13 = vrot.slane %v1666_v61, 4  ;;  %v11348_v55 = vrot.slane %v1693_v17, 5  ;;  %v11350_v40 = vrot.slane %v1680_v37, 4 }
 0x102   : > { %8837 = vmatmul.mubr.bf16.gmra.mrb[4].mxu1 %v11037_v28  ;;  %8652 = vmatprep.mubr.bf16.mxu0 %v11115_v54  ;;  %v519_v54 = vrot.slane %v517_v42, 7  ;;  %v11352_v15 = vrot.slane %v1690_v25, 4  ;;  %v527_v34 = vrot.slane %v525_v18, 7  ;;  %v11356_v5 = vcombine.low %v11156_v19, %v11190_v56  ;;  %v11359_v28 = vld [vmem:[#allocation2 + $0xc] sm:$0xe] }
 0x103   : > { %8840 = vmatprep.mubr.bf16.mxu1 %v11073_v38  ;;  %8869 = vmatpush3.bf16.msra.mxu1 %v9892_v26  ;;  %v528_v26 = vshll.u32 %v257_v49, 16  ;;  %v1717_v61 = vshll.u32 %v11322_v10, 16  ;;  %v1704_v37 = vor.u32 %v1703_v20, %v11320_v60  ;;  %v1714_v25 = vor.u32 %v1713_v14, %v11338_v35  ;;  %v9911_v10 = vld [vmem:[%s12914_s1 + $0xf8] sm:$0xff]  }
 0x104   : > { %8870 = vmatprep.subr.bf16.mxu1 %v9896_v6  ;;  %8681 = vmatpush3.bf16.msra.mxu0 %v9899_v47  ;;  %13064 = vst [vmem:[#allocation40_spill] sm:$0xff] %v11356_v5  ;;  %v522_v38 = vor.u32 %v520_v51, %v519_v54  ;;  %v523_v17 = vrot.slane %v519_v54, 4  ;;  %v9904_v47 = vld [vmem:[%s12914_s1 + $0x1e8] sm:$0xff]   ;;  %v532_v42 = vrot.slane %v527_v34, 4  ;;  %v11366_v18 = vcombine.low %v1638_v58, %v1648_v43  ;;  %v11399_v14 = vld [vmem:[#allocation2 + $0x18] sm:$0xe] }
 0x105   : > { %8682 = vmatprep.subr.bf16.mxu0 %v9903_v2  ;;  %v530_v49 = vor.u32 %v528_v26, %v527_v34  ;;  %v1662_v54 = vsel %vm10118_vm6, %v11341_v9, %v11266_v30  ;;  %v12957_v60 = vrot.slane %v10773_v3, 5  ;;  %v11380_v34 = vcombine.low %v11197_v27, %v11205_v22 }
 0x106   : > { %v693_v51 = vsel %vm10131_vm9, %v522_v38, %v692_v29  ;;  %v697_v43 = vsel %vm10137_vm10, %v532_v42, %v696_v1  ;;  %v1748_v38 = vld [vmem:[#allocation2 + $0x30] sm:$0xe]  ;;  %v1672_v20 = vsel %vm10118_vm6, %v11343_v13, %v11317_v52  ;;  %v1686_v27 = vsel %vm10118_vm6, %v11350_v40, %v11286_v0  ;;  %v1749_v29 = vld [vmem:[#allocation2 + $0x3c] sm:$0xe]  ;;  %v1750_v1 = vld [vmem:[#allocation2 + $0x48] sm:$0xe] }
 0x107   : > { %8871 = vmatpush3.bf16.msra.mxu1 %v9896_v6  ;;  %v531_v58 = vsel %vm10126_vm7, %v523_v17, %v530_v49  ;;  %694 = vst [vmem:[#allocation2 + $0xc0] sm:$0xf] %v693_v51  ;;  %698 = vst [vmem:[#allocation2 + $0xc8] sm:$0x1] %v697_v43  ;;  %v9908_v52 = vld [vmem:[%s12914_s1 + $0x1f0] sm:$0xff]   ;;  %v11406_v9 = vrot.slane %v1704_v37, 4  ;;  %v11428_v19 = vcombine.low %v1662_v54, %v1672_v20 }
 0x108   : > { %8872 = vmatprep.subr.bf16.mxu1 %v9900_v59  ;;  %8683 = vmatpush3.bf16.msra.mxu0 %v9903_v2  ;;  %v1696_v2 = vsel %vm10118_vm6, %v11352_v15, %v11348_v55  ;;  %695 = vst [vmem:[#allocation2 + $0xc4] sm:$0xf] %v531_v58  ;;  %v11408_v0 = vrot.slane %v1714_v25, 4  ;;  %v11410_v13 = vrot.slane %v1717_v61, 5  ;;  %v11416_v40 = vrot.slane %v12957_v60, 4  ;;  %v13068_v15 = vld [vmem:[#allocation11_spill] sm:$0xff] }
 0x109   : > { %8653 = vmatmul.mubr.bf16.gmra.mrb[12].mxu0 %v11134_v53  ;;  %8684 = vmatprep.subr.bf16.mxu0 %v9907_v8  ;;  %v11422_v17 = vld [vmem:[%s12914_s1 + $0x200] sm:$0xff]   ;;  %v7502_v37 = vrot.slane %v1748_v38, 9  ;;  %v1832_v61 = vrot.slane %v10879_v41, 5  ;;  %v7503_v49 = vrot.slane %v1749_v29, 9  ;;  %v1839_v42 = vrot.slane %v10908_v57, 5  ;;  %v9912_v57 = vld [vmem:[%s12914_s1 + $0x1f8] sm:$0xff]  }
 0x10a   : > { %8841 = vmatmul.mubr.bf16.gmra.mrb[8].mxu1 %v11111_v39  ;;  %8656 = vmatprep.mubr.bf16.mxu0 %v11168_v62  ;;  %v11430_v51 = vld [vmem:[#allocation2 + $0x1c] sm:$0xf]  ;;  %v11435_v43 = vcombine.low %v1686_v27, %v1696_v2  ;;  %v1842_v54 = vrot.slane %v10960_v45, 5  ;;  %v7504_v2 = vrot.slane %v1750_v1, 9  ;;  %v1751_v29 = vld [vmem:[#allocation2 + $0x54] sm:$0xe] }
 0x10b   : > { %8844 = vmatprep.mubr.bf16.mxu1 %v11130_v21  ;;  %8873 = vmatpush3.bf16.msra.mxu1 %v9900_v59  ;;  %v1835_v59 = vrot.slane %v10915_v48, 5  ;;  %v1833_v30 = vsel %vm10567_vm13, %v7502_v37, %v1832_v61  ;;  %v1834_v41 = vrot.slane %v1832_v61, 4  ;;  %v1841_v48 = vrot.slane %v1839_v42, 4  ;;  %v11484_v60 = vld [vmem:[%s12914_s1 + $0x300] sm:$0xff]   ;;  %v1753_v6 = vld [vmem:[#allocation2 + $0x6c] sm:$0xe] }
 0x10c   : > { %8874 = vmatprep.subr.bf16.mxu1 %v9904_v47  ;;  %8685 = vmatpush3.bf16.msra.mxu0 %v9907_v8  ;;  %v11439_v8 = vcombine.low %v11250_v31, %v11259_v12  ;;  %v1840_v27 = vsel %vm10567_vm13, %v7503_v49, %v1839_v42  ;;  %v1846_v31 = vrot.slane %v10950_v11, 5  ;;  %v11465_v49 = vld [vmem:[#allocation2 + $0x20] sm:$0x1] }
 0x10d   : > { %8686 = vmatprep.subr.bf16.mxu0 %v9911_v10  ;;  %v1836_v20 = vsel %vm10567_vm13, %v1834_v41, %v1835_v59  ;;  %v1843_v59 = vsel %vm10567_vm13, %v1841_v48, %v1842_v54  ;;  %v13070_v41 = vld [vmem:[#allocation18_spill] sm:$0xff]  ;;  %v11472_v54 = vld [vmem:[#allocation2 + $0x28] sm:$0xf] }
 0x10e   : > { %v11445_v38 = vld [vmem:[#allocation2 + $0xc0] sm:$0xf]  ;;  %v11458_v25 = vcombine.low %v1833_v30, %v1836_v20  ;;  %v1849_v26 = vrot.slane %v13070_v41, 5  ;;  %v11475_v55 = vcombine.low %v1840_v27, %v1843_v59  ;;  %v7505_v27 = vrot.slane %v1751_v29, 9  ;;  %v13072_v59 = vld [vmem:[#allocation17_spill] sm:$0xff] }
 0x10f   : > { %8875 = vmatpush3.bf16.msra.mxu1 %v9904_v47  ;;  %v11452_v37 = vld [vmem:[#allocation2 + $0xc4] sm:$0xf]  ;;  %v1722_v61 = vshrl.u32 %v11445_v38, 16  ;;  %v1725_v45 = vshll.u32 %v11445_v38, 16  ;;  %v11456_v47 = vld [vmem:[#allocation2 + $0xc8] sm:$0x1] }
 0x110   : > { %8876 = vmatprep.subr.bf16.mxu1 %v9908_v52  ;;  %8687 = vmatpush3.bf16.msra.mxu0 %v9911_v10  ;;  %v1731_v11 = vshll.u32 %v11452_v37, 16  ;;  %v1735_v1 = vshrl.u32 %v11452_v37, 16  ;;  %v1752_v10 = vld [vmem:[#allocation2 + $0x60] sm:$0xe]  ;;  %13071 = vst [vmem:[#allocation4_spill] sm:$0xff] %v11475_v55  ;;  %v1741_v41 = vshll.u32 %v11456_v47, 16 }
 0x111   : > { %8657 = vmatmul.mubr.bf16.gmra.mrb[16].mxu0 %v11284_v4  ;;  %8912 = vmatprep.subr.bf16.mxu0 %v11422_v17  ;;  %v1724_v30 = vrot.slane %v1722_v61, 4  ;;  %v1727_v48 = vrot.slane %v1725_v45, 5  ;;  %v1847_v61 = vsel %vm10567_vm13, %v7504_v2, %v1846_v31  ;;  %v1848_v45 = vrot.slane %v1846_v31, 4  ;;  %v13074_v2 = vld [vmem:[#allocation7_spill] sm:$0xff] }
 0x112   : > { %8845 = vmatmul.mubr.bf16.gmra.mrb[12].mxu1 %v11280_v63  ;;  %8660 = vmatprep.mubr.bf16.mxu0 %v11293_v24  ;;  %v11478_v42 = vrot.slane %v1731_v11, 5  ;;  %v11488_v20 = vrot.slane %v1735_v1, 4  ;;  %v13073_v11 = vld [vmem:[#allocation6_spill] sm:$0xff]  ;;  %v7506_v53 = vrot.slane %v1752_v10, 9  ;;  %v1860_v31 = vrot.slane %v13074_v2, 5 }
 0x113   : > { %8848 = vmatprep.mubr.bf16.mxu1 %v11289_v44  ;;  %8877 = vmatpush3.bf16.msra.mxu1 %v9908_v52  ;;  %v1853_v52 = vrot.slane %v13072_v59, 5  ;;  %v1856_v24 = vrot.slane %v13073_v11, 5  ;;  %v1850_v62 = vsel %vm10567_vm13, %v1848_v45, %v1849_v26  ;;  %v1728_v44 = vor.u32 %v1727_v48, %v1724_v30  ;;  %v1754_v63 = vld [vmem:[#allocation2 + $0x78] sm:$0xe]  ;;  %v1755_v11 = vld [vmem:[#allocation2 + $0x84] sm:$0xe] }
 0x114   : > { %8878 = vmatprep.subr.bf16.mxu1 %v9912_v57  ;;  %v11499_v1 = vcombine.low %v1847_v61, %v1850_v62  ;;  %v11503_v55 = vrot.slane %v1741_v41, 5  ;;  %v1861_v4 = vsel %vm10567_vm13, %v7506_v53, %v1860_v31  ;;  %v1862_v21 = vrot.slane %v1860_v31, 4  ;;  %v13075_v26 = vld [vmem:[#allocation19_spill] sm:$0xff]  ;;  %v1756_v45 = vld [vmem:[#allocation2 + $0x90] sm:$0xe] }
 0x115   : > { %v1854_v29 = vsel %vm10567_vm13, %v7505_v27, %v1853_v52  ;;  %v1855_v59 = vrot.slane %v1853_v52, 4  ;;  %v1863_v10 = vrot.slane %v13075_v26, 5  ;;  %v7507_v48 = vrot.slane %v1753_v6, 9  ;;  %v13076_v27 = vld [vmem:[#allocation23_spill] sm:$0xff] }
 0x116   : > { %v1870_v52 = vrot.slane %v13076_v27, 5  ;;  %v1757_v2 = vld [vmem:[#allocation2 + $0x9c] sm:$0xe]  ;;  %v7510_v62 = vrot.slane %v1756_v45, 9 }
 0x117   : > { %8879 = vmatpush3.bf16.msra.mxu1 %v9912_v57  ;;  %v1857_v30 = vsel %vm10567_vm13, %v1855_v59, %v1856_v24  ;;  %v1867_v57 = vrot.slane %v11050_v23, 5  ;;  %v1864_v61 = vsel %vm10567_vm13, %v1862_v21, %v1863_v10  ;;  %v11526_v24 = vrot.slane %v1728_v44, 4  ;;  %v13077_v59 = vld [vmem:[#allocation25_spill] sm:$0xff] }
 0x118   : > { %9104 = vmatprep.subr.bf16.mxu1 %v11484_v60  ;;  %v11519_v41 = vcombine.low %v1854_v29, %v1857_v30  ;;  %v11528_v23 = vcombine.low %v1861_v4, %v1864_v61  ;;  %v7508_v29 = vrot.slane %v1754_v63, 9  ;;  %v1874_v21 = vrot.slane %v11064_v50, 5  ;;  %v1758_v30 = vld [vmem:[#allocation2 + $0xa8] sm:$0xe]  ;;  %v13078_v4 = vld [vmem:[#allocation27_spill] sm:$0xff] }
 0x119   : > { %8661 = vmatmul.mubr.bf16.gmra.mrb[20].mxu0 %v11306_v16  ;;  %v1868_v6 = vsel %vm10567_vm13, %v7507_v48, %v1867_v57  ;;  %v1869_v31 = vrot.slane %v1867_v57, 4  ;;  %v1877_v26 = vrot.slane %v13077_v59, 5  ;;  %v7509_v10 = vrot.slane %v1755_v11, 9  ;;  %v13079_v57 = vld [vmem:[#allocation28_spill] sm:$0xff]  ;;  %v13080_v16 = vld [vmem:[#allocation31_spill] sm:$0xff] }
 0x11a   : > { %8849 = vmatmul.mubr.bf16.gmra.mrb[16].mxu1 %v11300_v36  ;;  %8664 = vmatprep.mubr.bf16.mxu0 %v11356_v5  ;;  %v1881_v44 = vrot.slane %v11095_v7, 5  ;;  %v1884_v61 = vrot.slane %v13078_v4, 5  ;;  %v1875_v48 = vsel %vm10567_vm13, %v7508_v29, %v1874_v21  ;;  %v1876_v63 = vrot.slane %v1874_v21, 4  ;;  %v1759_v5 = vld [vmem:[#allocation2 + $0xb4] sm:$0xe] }
 0x11b   : > { %8852 = vmatprep.mubr.bf16.mxu1 %v11302_v46  ;;  %v1871_v27 = vsel %vm10567_vm13, %v1869_v31, %v1870_v52  ;;  %v1888_v50 = vrot.slane %v13079_v57, 5  ;;  %v1891_v52 = vrot.slane %v13080_v16, 5  ;;  %v7511_v31 = vrot.slane %v1757_v2, 9  ;;  %v1760_v7 = vld [vmem:[#allocation2 + $0xc0] sm:$0xe] }
 0x11c   : > { %v11539_v53 = vcombine.low %v1868_v6, %v1871_v27  ;;  %v1882_v11 = vsel %vm10567_vm13, %v7509_v10, %v1881_v44  ;;  %v1883_v59 = vrot.slane %v1881_v44, 4  ;;  %v1878_v45 = vsel %vm10567_vm13, %v1876_v63, %v1877_v26  ;;  %v13081_v10 = vld [vmem:[#allocation33_spill] sm:$0xff] }
 0x11d   : > { %v1889_v6 = vsel %vm10567_vm13, %v7510_v62, %v1888_v50  ;;  %v1890_v27 = vrot.slane %v1888_v50, 4  ;;  %v1895_v29 = vrot.slane %v11190_v56, 5  ;;  %v11552_v21 = vcombine.low %v1875_v48, %v1878_v45 }
 0x11e   : > { %v1885_v4 = vsel %vm10567_vm13, %v1883_v59, %v1884_v61  ;;  %v1898_v44 = vrot.slane %v13081_v10, 5  ;;  %v7512_v57 = vrot.slane %v1758_v30, 9  ;;  %v1902_v61 = vrot.slane %v11205_v22, 5 }
 0x11f   : > { %v11558_v16 = vcombine.low %v1882_v11, %v1885_v4  ;;  %v1892_v2 = vsel %vm10567_vm13, %v1890_v27, %v1891_v52  ;;  %v1896_v62 = vsel %vm10567_vm13, %v7511_v31, %v1895_v29  ;;  %v1897_v26 = vrot.slane %v1895_v29, 4  ;;  %v13082_v11 = vld [vmem:[#allocation39_spill] sm:$0xff] }
 0x120   : > { %v11566_v56 = vcombine.low %v1889_v6, %v1892_v2  ;;  %v1905_v30 = vrot.slane %v11269_v33, 5  ;;  %v7513_v48 = vrot.slane %v1759_v5, 9  ;;  %v1909_v50 = vrot.slane %v11259_v12, 5  ;;  %v1747_v5 = vld [vmem:[#allocation2 + $0x24] sm:$0xe] }
 0x121   : > { %8665 = vmatmul.mubr.bf16.gmra.mrb[24].mxu0 %v11380_v34  ;;  %v1899_v63 = vsel %vm10567_vm13, %v1897_v26, %v1898_v44  ;;  %v1912_v59 = vrot.slane %v13082_v11, 5  ;;  %v7514_v52 = vrot.slane %v1760_v7, 9  ;;  %v1903_v45 = vsel %vm10567_vm13, %v7512_v57, %v1902_v61  ;;  %v10010_v11 = vld [vmem:[#allocation2 + $0x2c] sm:$0x1] }
 0x122   : > { %8853 = vmatmul.mubr.bf16.gmra.mrb[20].mxu1 %v11366_v18  ;;  %8668 = vmatprep.mubr.bf16.mxu0 %v11439_v8  ;;  %v11575_v31 = vcombine.low %v1896_v62, %v1899_v63  ;;  %v1904_v6 = vrot.slane %v1902_v61, 4  ;;  %v1916_v22 = vrot.slane %v11452_v37, 5  ;;  %v11582_v33 = vcombine.low %v11445_v38, %v11452_v37 }
 0x123   : > { %8856 = vmatprep.mubr.bf16.mxu1 %v11428_v19  ;;  %v1910_v27 = vsel %vm10567_vm13, %v7513_v48, %v1909_v50  ;;  %v1911_v12 = vrot.slane %v1909_v50, 4  ;;  %v1919_v29 = vrot.slane %v11456_v47, 5  ;;  %v13083_v7 = vor.u32 %v11488_v20, %v11478_v42 }
 0x124   : > { %v1906_v10 = vsel %vm10567_vm13, %v1904_v6, %v1905_v30  ;;  %v1917_v44 = vsel %vm10567_vm13, %v7514_v52, %v1916_v22  ;;  %v1918_v57 = vrot.slane %v1916_v22, 4  ;;  %v13084_v38 = vsel %vm10118_vm6, %v11408_v0, %v11410_v13  ;;  %v13086_v13 = vld [vmem:[#allocation14_spill] sm:$0xff] }
 0x125   : > { %v1739_v4 = vrot.slane %v13083_v7, 4  ;;  %v13085_v37 = vsel %vm10118_vm6, %v11406_v9, %v11338_v35  ;;  %v11606_v20 = vcombine.low %v1903_v45, %v1906_v10  ;;  %v1913_v2 = vsel %vm10567_vm13, %v1911_v12, %v1912_v59  ;;  %v9916_v10 = vld [vmem:[%s12914_s1 + $0x308] sm:$0xff]  }
 0x126   : > { %v11604_v47 = vcombine.low %v13085_v37, %v13084_v38  ;;  %v11610_v62 = vcombine.low %v1910_v27, %v1913_v2  ;;  %v1920_v26 = vsel %vm10567_vm13, %v1918_v57, %v1919_v29  ;;  %v13087_v35 = vrot.slane %v11430_v51, 5  ;;  %v13096_v29 = vld [vmem:[#allocation21_spill] sm:$0xff]  ;;  %v13099_v57 = vld [vmem:[#allocation24_spill] sm:$0xff]  ;;  %v9918_v38 = vld [vmem:[%s12914_s1 + $0x310] sm:$0xff]  }
 0x127   : > { %v11615_v0 = vcombine.low %v1917_v44, %v1920_v26  ;;  %v7501_v61 = vrot.slane %v1747_v5, 9  ;;  %v1734_v30 = vsel %vm10118_vm6, %v11526_v24, %v11478_v42  ;;  %v1744_v48 = vsel %vm10118_vm6, %v1739_v4, %v11503_v55  ;;  %v9915_v55 = vld [vmem:[%s12914_s1 + $0x208] sm:$0xff]   ;;  %v9921_v37 = vld [vmem:[%s12914_s1 + $0x220] sm:$0xff]   ;;  %v9920_v2 = vld [vmem:[%s12914_s1 + $0x318] sm:$0xff]  }
 0x128   : > { %v1820_v9 = vrot.slane %v13087_v35, 4  ;;  %v13088_v63 = vrot.slane %v11472_v54, 5  ;;  %v1828_v59 = vrot.slane %v10010_v11, 5  ;;  %v13089_v52 = vrot.slane %v10773_v3, 5  ;;  %v13092_v3 = vld [vmem:[#allocation16_spill] sm:$0xff]  ;;  %v13098_v44 = vld [vmem:[#allocation9_spill] sm:$0xff] }
 0x129   : > { %8669 = vmatmul.mubr.bf16.gmra.mrb[28].mxu0 %v11582_v33  ;;  %v13090_v45 = vrot.slane %v11359_v28, 9  ;;  %v13091_v22 = vrot.slane %v13068_v15, 5  ;;  %v11642_v24 = vcombine.low %v1734_v30, %v1744_v48  ;;  %v13093_v28 = vmov %v13087_v35  ;;  %v9919_v54 = vld [vmem:[%s12914_s1 + $0x218] sm:$0xff]   ;;  %v13100_v26 = vld [vmem:[#allocation29_spill] sm:$0xff]  ;;  %v13101_v35 = vld [vmem:[#allocation4_spill] sm:$0xff] }
 0x12a   : > { %8857 = vmatmul.mubr.bf16.gmra.mrb[24].mxu1 %v11435_v43  ;;  %8688 = vmatprep.mubr.bf16.mxu0 %v13086_v13  ;;  %v1827_v50 = vrot.slane %v13088_v63, 4  ;;  %v13095_v27 = vrot.slane %v11465_v49, 5  ;;  %v13097_v7 = vmov %v13088_v63  ;;  %v9924_v30 = vld [vmem:[%s12914_s1 + $0x328] sm:$0xff]   ;;  %v13102_v48 = vld [vmem:[#allocation34_spill] sm:$0xff]  ;;  %v9927_v63 = vld [vmem:[%s12914_s1 + $0x238] sm:$0xff]  }
 0x12b   : > { %8860 = vmatprep.mubr.bf16.mxu1 %v11604_v47  ;;  %v1812_v6 = vsel %vm10567_vm13, %v13090_v45, %v13089_v52  ;;  %v1815_v42 = vsel %vm10567_vm13, %v11416_v40, %v13091_v22  ;;  %v13094_v40 = vrot.slane %v11399_v14, 9  ;;  %v1826_v51 = vsel %vm10567_vm13, %v7501_v61, %v13097_v7  ;;  %v9925_v61 = vld [vmem:[%s12914_s1 + $0x230] sm:$0xff]   ;;  %v9928_v52 = vld [vmem:[%s12914_s1 + $0x338] sm:$0xff]   ;;  %v9930_v45 = vld [vmem:[%s12914_s1 + $0x340] sm:$0xff]  }
 0x12c   : > { %v11647_v5 = vcombine.low %v1812_v6, %v1815_v42  ;;  %v1822_v12 = vsel %vm10567_vm13, %v1820_v9, %v13095_v27  ;;  %v1829_v14 = vsel %vm10567_vm13, %v1827_v50, %v1828_v59  ;;  %v9922_v9 = vld [vmem:[%s12914_s1 + $0x320] sm:$0xff]   ;;  %v9926_v11 = vld [vmem:[%s12914_s1 + $0x330] sm:$0xff]   ;;  %v9931_v22 = vld [vmem:[%s12914_s1 + $0x248] sm:$0xff]  }
 0x12d   : > { %v1819_v15 = vsel %vm10567_vm13, %v13094_v40, %v13093_v28  ;;  %v11675_v49 = vcombine.low %v1826_v51, %v1829_v14  ;;  %v13103_v50 = vld [vmem:[#allocation36_spill] sm:$0xff]  ;;  %v13105_v42 = vld [vmem:[#allocation13_spill] sm:$0xff]  ;;  %v9933_v28 = vld [vmem:[%s12914_s1 + $0x250] sm:$0xff]  }
 0x12e   : > { %v11673_v4 = vcombine.low %v1819_v15, %v1822_v12  ;;  %v9929_v59 = vld [vmem:[%s12914_s1 + $0x240] sm:$0xff]   ;;  %v9932_v40 = vld [vmem:[%s12914_s1 + $0x348] sm:$0xff]   ;;  %v9935_v27 = vld [vmem:[%s12914_s1 + $0x258] sm:$0xff]  }
 0x12f   : > { %v13104_v6 = vld [vmem:[#allocation12_spill] sm:$0xff]  ;;  %v13108_v12 = vld [vmem:[#allocation22_spill] sm:$0xff]  ;;  %v9936_v51 = vld [vmem:[%s12914_s1 + $0x358] sm:$0xff]  }
 0x130   : > { %v13107_v15 = vld [vmem:[#allocation20_spill] sm:$0xff]  ;;  %v13109_v14 = vld [vmem:[#allocation10_spill] sm:$0xff] }
 0x131   : > { %8689 = vmatmul.mubr.bf16.vlgmr.msra.gmra.mrb[0].mxu0 %v13092_v3  ;;  %v9937_v7 = vld [vmem:[%s12914_s1 + $0x260] sm:$0xff]  }
 0x132   : > { %8861 = vmatmul.mubr.bf16.gmra.mrb[28].mxu1 %v11642_v24  ;;  %8913 = vmatpush3.bf16.msra.mxu0 %v11422_v17  ;;  %v9917_v17 = vld [vmem:[%s12914_s1 + $0x210] sm:$0xff]  }
 0x133   : > { %8880 = vmatprep.mubr.bf16.mxu1 %v11647_v5  ;;  %8692 = vmatprep.mubr.bf16.mxu0 %v13096_v29 }
 0x134   : > { %8914 = vmatprep.subr.bf16.mxu0 %v9915_v55 }
 0x136   : > { %8915 = vmatpush3.bf16.msra.mxu0 %v9915_v55  ;;  %v13106_v55 = vld [vmem:[#allocation15_spill] sm:$0xff] }
 0x137   : > { %8916 = vmatprep.subr.bf16.mxu0 %v9917_v17 }
 0x139   : > { %8693 = vmatmul.mubr.bf16.gmra.mrb[4].mxu0 %v13098_v44 }
 0x13a   : > { %8881 = vmatmul.mubr.bf16.vlgmr.msra.gmra.mrb[0].mxu1 %v11673_v4  ;;  %8696 = vmatprep.mubr.bf16.mxu0 %v13099_v57 }
 0x13b   : > { %9105 = vmatpush3.bf16.msra.mxu1 %v11484_v60  ;;  %8884 = vmatprep.mubr.bf16.mxu1 %v11675_v49  ;;  %v9923_v60 = vld [vmem:[%s12914_s1 + $0x228] sm:$0xff]  }
 0x13c   : > { %9106 = vmatprep.subr.bf16.mxu1 %v9916_v10  ;;  %8917 = vmatpush3.bf16.msra.mxu0 %v9917_v17  ;;  %v9934_v17 = vld [vmem:[%s12914_s1 + $0x350] sm:$0xff]  }
 0x13d   : > { %8918 = vmatprep.subr.bf16.mxu0 %v9919_v54 }
 0x13f   : > { %9107 = vmatpush3.bf16.msra.mxu1 %v9916_v10  ;;  %v9939_v10 = vld [vmem:[%s12914_s1 + $0x268] sm:$0xff]  }
 0x140   : > { %9108 = vmatprep.subr.bf16.mxu1 %v9918_v38  ;;  %8919 = vmatpush3.bf16.msra.mxu0 %v9919_v54  ;;  %v13110_v54 = vld [vmem:[#allocation26_spill] sm:$0xff] }
 0x141   : > { %8697 = vmatmul.mubr.bf16.gmra.mrb[8].mxu0 %v11111_v39  ;;  %8920 = vmatprep.subr.bf16.mxu0 %v9921_v37 }
 0x142   : > { %8885 = vmatmul.mubr.bf16.gmra.mrb[4].mxu1 %v11458_v25  ;;  %8700 = vmatprep.mubr.bf16.mxu0 %v13100_v26 }
 0x143   : > { %8888 = vmatprep.mubr.bf16.mxu1 %v13101_v35  ;;  %9109 = vmatpush3.bf16.msra.mxu1 %v9918_v38  ;;  %v9938_v38 = vld [vmem:[%s12914_s1 + $0x360] sm:$0xff]  }
 0x144   : > { %9110 = vmatprep.subr.bf16.mxu1 %v9920_v2  ;;  %8921 = vmatpush3.bf16.msra.mxu0 %v9921_v37  ;;  %v9941_v37 = vld [vmem:[%s12914_s1 + $0x270] sm:$0xff]  }
 0x145   : > { %8922 = vmatprep.subr.bf16.mxu0 %v9923_v60 }
 0x147   : > { %9111 = vmatpush3.bf16.msra.mxu1 %v9920_v2  ;;  %v9940_v2 = vld [vmem:[%s12914_s1 + $0x368] sm:$0xff]  }
 0x148   : > { %9112 = vmatprep.subr.bf16.mxu1 %v9922_v9  ;;  %8923 = vmatpush3.bf16.msra.mxu0 %v9923_v60  ;;  %v13111_v60 = vld [vmem:[#allocation30_spill] sm:$0xff] }
 0x149   : > { %8701 = vmatmul.mubr.bf16.gmra.mrb[12].mxu0 %v13102_v48  ;;  %8924 = vmatprep.subr.bf16.mxu0 %v9925_v61 }
 0x14a   : > { %8889 = vmatmul.mubr.bf16.gmra.mrb[8].mxu1 %v11499_v1  ;;  %8704 = vmatprep.mubr.bf16.mxu0 %v13103_v50 }
 0x14b   : > { %8892 = vmatprep.mubr.bf16.mxu1 %v11519_v41  ;;  %9113 = vmatpush3.bf16.msra.mxu1 %v9922_v9  ;;  %v9943_v9 = vld [vmem:[%s12914_s1 + $0x278] sm:$0xff]  }
 0x14c   : > { %9114 = vmatprep.subr.bf16.mxu1 %v9924_v30  ;;  %8925 = vmatpush3.bf16.msra.mxu0 %v9925_v61  ;;  %v13112_v61 = vld [vmem:[#allocation32_spill] sm:$0xff] }
 0x14d   : > { %8926 = vmatprep.subr.bf16.mxu0 %v9927_v63 }
 0x14f   : > { %9115 = vmatpush3.bf16.msra.mxu1 %v9924_v30  ;;  %v9942_v30 = vld [vmem:[%s12914_s1 + $0x370] sm:$0xff]  }
 0x150   : > { %9116 = vmatprep.subr.bf16.mxu1 %v9926_v11  ;;  %8927 = vmatpush3.bf16.msra.mxu0 %v9927_v63  ;;  %v9945_v63 = vld [vmem:[%s12914_s1 + $0x280] sm:$0xff]  }
 0x151   : > { %8705 = vmatmul.mubr.bf16.gmra.mrb[16].mxu0 %v11300_v36  ;;  %8960 = vmatprep.subr.bf16.mxu0 %v9929_v59 }
 0x152   : > { %8893 = vmatmul.mubr.bf16.gmra.mrb[12].mxu1 %v11528_v23  ;;  %8708 = vmatprep.mubr.bf16.mxu0 %v11302_v46 }
 0x153   : > { %8896 = vmatprep.mubr.bf16.mxu1 %v11539_v53  ;;  %9117 = vmatpush3.bf16.msra.mxu1 %v9926_v11  ;;  %v9944_v11 = vld [vmem:[%s12914_s1 + $0x378] sm:$0xff]  }
 0x154   : > { %9118 = vmatprep.subr.bf16.mxu1 %v9928_v52 }
 0x157   : > { %9119 = vmatpush3.bf16.msra.mxu1 %v9928_v52  ;;  %v13114_v52 = vld [vmem:[#allocation37_spill] sm:$0xff] }
 0x158   : > { %9152 = vmatprep.subr.bf16.mxu1 %v9930_v45 }
 0x159   : > { %8709 = vmatmul.mubr.bf16.gmra.mrb[20].mxu0 %v11366_v18 }
 0x15a   : > { %8897 = vmatmul.mubr.bf16.gmra.mrb[16].mxu1 %v11552_v21  ;;  %8712 = vmatprep.mubr.bf16.mxu0 %v11428_v19 }
 0x15b   : > { %8900 = vmatprep.mubr.bf16.mxu1 %v11558_v16 }
 0x161   : > { %8713 = vmatmul.mubr.bf16.gmra.mrb[24].mxu0 %v11435_v43 }
 0x162   : > { %8901 = vmatmul.mubr.bf16.gmra.mrb[20].mxu1 %v11566_v56  ;;  %8716 = vmatprep.mubr.bf16.mxu0 %v11604_v47 }
 0x163   : > { %8904 = vmatprep.mubr.bf16.mxu1 %v11575_v31 }
 0x169   : > { %8717 = vmatmul.mubr.bf16.gmra.mrb[28].mxu0 %v11642_v24 }
 0x16a   : > { %8905 = vmatmul.mubr.bf16.gmra.mrb[24].mxu1 %v11606_v20  ;;  %8928 = vmatprep.mubr.bf16.mxu0 %v13104_v6  ;;  %v13115_v6 = vld [vmem:[#allocation38_spill] sm:$0xff] }
 0x16b   : > { %8908 = vmatprep.mubr.bf16.mxu1 %v11610_v62 }
 0x171   : > { %8929 = vmatmul.mubr.bf16.vlgmr.msra.gmra.mrb[32].mxu0 %v13105_v42  ;;  %v9947_v42 = vld [vmem:[%s12914_s1 + $0x288] sm:$0xff]  }
 0x172   : > { %8909 = vmatmul.mubr.bf16.gmra.mrb[28].mxu1 %v11615_v0  ;;  %8961 = vmatpush3.bf16.msra.mxu0 %v9929_v59  ;;  %v13113_v59 = vld [vmem:[#allocation35_spill] sm:$0xff] }
 0x173   : > { %9120 = vmatprep.mubr.bf16.mxu1 %v13086_v13  ;;  %8932 = vmatprep.mubr.bf16.mxu0 %v13106_v55 }
 0x174   : > { %8962 = vmatprep.subr.bf16.mxu0 %v9931_v22 }
 0x176   : > { %8963 = vmatpush3.bf16.msra.mxu0 %v9931_v22  ;;  %v13116_v22 = vld [vmem:[#allocation40_spill] sm:$0xff] }
 0x177   : > { %8964 = vmatprep.subr.bf16.mxu0 %v9933_v28 }
 0x179   : > { %8933 = vmatmul.mubr.bf16.gmra.mrb[36].mxu0 %v13107_v15 }
 0x17a   : > { %9121 = vmatmul.mubr.bf16.vlgmr.msra.gmra.mrb[32].mxu1 %v13092_v3  ;;  %8936 = vmatprep.mubr.bf16.mxu0 %v13108_v12  ;;  %v9952_v12 = vld [vmem:[%s12914_s1 + $0x398] sm:$0xff]  }
 0x17b   : > { %9153 = vmatpush3.bf16.msra.mxu1 %v9930_v45  ;;  %9124 = vmatprep.mubr.bf16.mxu1 %v13096_v29  ;;  %v9946_v45 = vld [vmem:[%s12914_s1 + $0x380] sm:$0xff]  }
 0x17c   : > { %9154 = vmatprep.subr.bf16.mxu1 %v9932_v40  ;;  %8965 = vmatpush3.bf16.msra.mxu0 %v9933_v28 }
 0x17d   : > { %8966 = vmatprep.subr.bf16.mxu0 %v9935_v27 }
 0x17f   : > { %9155 = vmatpush3.bf16.msra.mxu1 %v9932_v40 }
 0x180   : > { %9156 = vmatprep.subr.bf16.mxu1 %v9934_v17  ;;  %8967 = vmatpush3.bf16.msra.mxu0 %v9935_v27 }
 0x181   : > { %8937 = vmatmul.mubr.bf16.gmra.mrb[40].mxu0 %v13109_v14  ;;  %8968 = vmatprep.subr.bf16.mxu0 %v9937_v7 }
 0x182   : > { %9125 = vmatmul.mubr.bf16.gmra.mrb[36].mxu1 %v13098_v44  ;;  %8940 = vmatprep.mubr.bf16.mxu0 %v13110_v54 }
 0x183   : > { %9128 = vmatprep.mubr.bf16.mxu1 %v13099_v57  ;;  %9157 = vmatpush3.bf16.msra.mxu1 %v9934_v17 }
 0x184   : > { %9158 = vmatprep.subr.bf16.mxu1 %v9936_v51  ;;  %8969 = vmatpush3.bf16.msra.mxu0 %v9937_v7 }
 0x185   : > { %8970 = vmatprep.subr.bf16.mxu0 %v9939_v10 }
 0x187   : > { %9159 = vmatpush3.bf16.msra.mxu1 %v9936_v51 }
 0x188   : > { %9160 = vmatprep.subr.bf16.mxu1 %v9938_v38  ;;  %8971 = vmatpush3.bf16.msra.mxu0 %v9939_v10  ;;  %v9955_v10 = vld [vmem:[%s12914_s1 + $0x2a8] sm:$0xff]  }
 0x189   : > { %8941 = vmatmul.mubr.bf16.gmra.mrb[44].mxu0 %v13111_v60  ;;  %8972 = vmatprep.subr.bf16.mxu0 %v9941_v37  ;;  %v11892_v60 = vld [vmem:[#allocation2 + $0x30] sm:$0xf] }
 0x18a   : > { %9129 = vmatmul.mubr.bf16.gmra.mrb[40].mxu1 %v11111_v39  ;;  %8944 = vmatprep.mubr.bf16.mxu0 %v13112_v61 }
 0x18b   : > { %9132 = vmatprep.mubr.bf16.mxu1 %v13100_v26  ;;  %9161 = vmatpush3.bf16.msra.mxu1 %v9938_v38  ;;  %v11881_v38 = vld [vmem:[#allocation2 + $0x58] sm:$0xf] }
 0x18c   : > { %9162 = vmatprep.subr.bf16.mxu1 %v9940_v2  ;;  %8973 = vmatpush3.bf16.msra.mxu0 %v9941_v37  ;;  %v9957_v37 = vld [vmem:[%s12914_s1 + $0x2b0] sm:$0xff]  }
 0x18d   : > { %8974 = vmatprep.subr.bf16.mxu0 %v9943_v9 }
 0x18f   : > { %9163 = vmatpush3.bf16.msra.mxu1 %v9940_v2 }
 0x190   : > { %9164 = vmatprep.subr.bf16.mxu1 %v9942_v30  ;;  %8975 = vmatpush3.bf16.msra.mxu0 %v9943_v9 }
 0x191   : > { %8945 = vmatmul.mubr.bf16.gmra.mrb[48].mxu0 %v13113_v59  ;;  %9008 = vmatprep.subr.bf16.mxu0 %v9945_v63 }
 0x192   : > { %9133 = vmatmul.mubr.bf16.gmra.mrb[44].mxu1 %v13102_v48  ;;  %8948 = vmatprep.mubr.bf16.mxu0 %v13114_v52 }
 0x193   : > { %9136 = vmatprep.mubr.bf16.mxu1 %v13103_v50  ;;  %9165 = vmatpush3.bf16.msra.mxu1 %v9942_v30  ;;  %v11898_v30 = vld [vmem:[#allocation2 + $0x5c] sm:$0x1] }
 0x194   : > { %9166 = vmatprep.subr.bf16.mxu1 %v9944_v11 }
 0x197   : > { %9167 = vmatpush3.bf16.msra.mxu1 %v9944_v11  ;;  %v1954_v11 = vld [vmem:[#allocation2 + $0x20] sm:$0x1] }
 0x198   : > { %9200 = vmatprep.subr.bf16.mxu1 %v9946_v45 }
 0x199   : > { %8949 = vmatmul.mubr.bf16.gmra.mrb[52].mxu0 %v13115_v6  ;;  %v2458_v6 = vrot.slane %v11898_v30, 5 }
 0x19a   : > { %9137 = vmatmul.mubr.bf16.gmra.mrb[48].mxu1 %v11300_v36  ;;  %8952 = vmatprep.mubr.bf16.mxu0 %v13116_v22  ;;  %v1955_v22 = vld [vmem:[#allocation2 + $0x2c] sm:$0x1] }
 0x19b   : > { %9140 = vmatprep.mubr.bf16.mxu1 %v11302_v46 }
 0x1a1   : > { %8953 = vmatmul.mubr.bf16.gmra.mrb[56].mxu0 %v11380_v34  ;;  %v9949_v34 = vld [vmem:[%s12914_s1 + $0x290] sm:$0xff]  }
 0x1a2   : > { %9141 = vmatmul.mubr.bf16.gmra.mrb[52].mxu1 %v11366_v18  ;;  %8956 = vmatprep.mubr.bf16.mxu0 %v11439_v8  ;;  %v9948_v8 = vld [vmem:[%s12914_s1 + $0x388] sm:$0xff]  }
 0x1a3   : > { %9144 = vmatprep.mubr.bf16.mxu1 %v11428_v19 }
 0x1a9   : > { %8957 = vmatmul.mubr.bf16.gmra.mrb[60].mxu0 %v11582_v33  ;;  %v11841_v33 = vld [vmem:[#allocation2 + $0x18] sm:$0xf] }
 0x1aa   : > { %9145 = vmatmul.mubr.bf16.gmra.mrb[56].mxu1 %v11435_v43  ;;  %8976 = vmatprep.mubr.bf16.mxu0 %v13086_v13  ;;  %v9951_v13 = vld [vmem:[%s12914_s1 + $0x298] sm:$0xff]  }
 0x1ab   : > { %9148 = vmatprep.mubr.bf16.mxu1 %v11604_v47 }
 0x1b1   : > { %8977 = vmatmul.mubr.bf16.vlgmr.msra.gmra.mrb[32].mxu0 %v13092_v3  ;;  %v1971_v3 = vshrl.u32 %v11841_v33, 16 }
 0x1b2   : > { %9149 = vmatmul.mubr.bf16.gmra.mrb[60].mxu1 %v11642_v24  ;;  %9009 = vmatpush3.bf16.msra.mxu0 %v9945_v63  ;;  %v2359_v63 = vld [vmem:[#allocation2 + $0x54] sm:$0xe] }
 0x1b3   : > { %9168 = vmatprep.mubr.bf16.mxu1 %v11647_v5  ;;  %8980 = vmatprep.mubr.bf16.mxu0 %v13096_v29  ;;  %v11847_v5 = vld [vmem:[#allocation2 + $0x1c] sm:$0xf]  ;;  %v9950_v29 = vld [vmem:[%s12914_s1 + $0x390] sm:$0xff]   ;;  %v1973_v40 = vrot.slane %v1971_v3, 4  ;;  %v7520_v52 = vrot.slane %v2359_v63, 9 }
 0x1b4   : > { %9010 = vmatprep.subr.bf16.mxu0 %v9947_v42  ;;  %v1984_v55 = vshrl.u32 %v11847_v5, 16  ;;  %v1980_v28 = vshll.u32 %v11847_v5, 16  ;;  %v11944_v63 = vld [vmem:[#allocation2 + $0x40] sm:$0xf] }
 0x1b6   : > { %9011 = vmatpush3.bf16.msra.mxu0 %v9947_v42  ;;  %v11871_v7 = vrot.slane %v1980_v28, 5  ;;  %v1986_v51 = vrot.slane %v1984_v55, 4  ;;  %v2019_v42 = vshrl.u32 %v11892_v60, 16  ;;  %v1990_v55 = vshll.u32 %v1954_v11, 16 }
 0x1b7   : > { %9012 = vmatprep.subr.bf16.mxu0 %v9949_v34 }
 0x1b9   : > { %8981 = vmatmul.mubr.bf16.gmra.mrb[36].mxu0 %v13098_v44  ;;  %v1974_v44 = vshll.u32 %v11841_v33, 16 }
 0x1ba   : > { %9169 = vmatmul.mubr.bf16.vlgmr.msra.gmra.mrb[32].mxu1 %v11673_v4  ;;  %8984 = vmatprep.mubr.bf16.mxu0 %v13099_v57  ;;  %v11859_v4 = vld [vmem:[#allocation2 + $0x24] sm:$0xf]  ;;  %v11864_v57 = vld [vmem:[#allocation2 + $0x28] sm:$0xf] }
 0x1bb   : > { %9201 = vmatpush3.bf16.msra.mxu1 %v9946_v45  ;;  %9172 = vmatprep.mubr.bf16.mxu1 %v11675_v49  ;;  %v9953_v49 = vld [vmem:[%s12914_s1 + $0x2a0] sm:$0xff]   ;;  %v1995_v15 = vshrl.u32 %v11859_v4, 16  ;;  %v1998_v27 = vshll.u32 %v11859_v4, 16  ;;  %v1976_v17 = vrot.slane %v1974_v44, 5  ;;  %v2004_v14 = vshll.u32 %v11864_v57, 16  ;;  %v9956_v44 = vld [vmem:[%s12914_s1 + $0x3a8] sm:$0xff]  }
 0x1bc   : > { %9202 = vmatprep.subr.bf16.mxu1 %v9948_v8  ;;  %9013 = vmatpush3.bf16.msra.mxu0 %v9949_v34  ;;  %v2008_v54 = vshrl.u32 %v11864_v57, 16  ;;  %v11902_v34 = vld [vmem:[#allocation2 + $0x34] sm:$0xf] }
 0x1bd   : > { %9014 = vmatprep.subr.bf16.mxu0 %v9951_v13  ;;  %v11890_v2 = vrot.slane %v1995_v15, 4  ;;  %v2000_v9 = vrot.slane %v1998_v27, 5  ;;  %v11896_v61 = vrot.slane %v2004_v14, 5  ;;  %v2021_v14 = vrot.slane %v2019_v42, 4 }
 0x1be   : > { %v2010_v59 = vrot.slane %v2008_v54, 4  ;;  %v2028_v54 = vshll.u32 %v11902_v34, 16 }
 0x1bf   : > { %9203 = vmatpush3.bf16.msra.mxu1 %v9948_v8  ;;  %v2022_v8 = vshll.u32 %v11892_v60, 16  ;;  %v2001_v28 = vor.u32 %v2000_v9, %v11890_v2 }
 0x1c0   : > { %9204 = vmatprep.subr.bf16.mxu1 %v9950_v29  ;;  %9015 = vmatpush3.bf16.msra.mxu0 %v9951_v13  ;;  %v11905_v13 = vld [vmem:[#allocation2 + $0x3c] sm:$0xf]  ;;  %v11961_v42 = vrot.slane %v2028_v54, 5 }
 0x1c1   : > { %8985 = vmatmul.mubr.bf16.gmra.mrb[40].mxu0 %v11111_v39  ;;  %9016 = vmatprep.subr.bf16.mxu0 %v9953_v49  ;;  %v9954_v39 = vld [vmem:[%s12914_s1 + $0x3a0] sm:$0xff]   ;;  %v2043_v2 = vshrl.u32 %v11905_v13, 16  ;;  %v2046_v11 = vshll.u32 %v11905_v13, 16 }
 0x1c2   : > { %9173 = vmatmul.mubr.bf16.gmra.mrb[36].mxu1 %v11458_v25  ;;  %8988 = vmatprep.mubr.bf16.mxu0 %v13100_v26  ;;  %v2455_v25 = vrot.slane %v11881_v38, 5  ;;  %v1977_v26 = vor.u32 %v1976_v17, %v1973_v40  ;;  %v9959_v40 = vld [vmem:[%s12914_s1 + $0x2b8] sm:$0xff]   ;;  %v2014_v17 = vshll.u32 %v1955_v22, 16 }
 0x1c3   : > { %9176 = vmatprep.mubr.bf16.mxu1 %v13101_v35  ;;  %9205 = vmatpush3.bf16.msra.mxu1 %v9950_v29  ;;  %v1987_v35 = vor.u32 %v1986_v51, %v11871_v7  ;;  %v1956_v51 = vld [vmem:[#allocation2 + $0x38] sm:$0x1] }
 0x1c4   : > { %9206 = vmatprep.subr.bf16.mxu1 %v9952_v12  ;;  %9017 = vmatpush3.bf16.msra.mxu0 %v9953_v49  ;;  %v2457_v45 = vrot.slane %v2455_v25, 4  ;;  %v11909_v3 = vsel %vm10567_vm13, %v7520_v52, %v2455_v25  ;;  %v11925_v15 = vrot.slane %v1977_v26, 4  ;;  %v11938_v25 = vld [vmem:[#allocation2 + $0x70] sm:$0xf]  ;;  %v2024_v26 = vrot.slane %v2022_v8, 5 }
 0x1c5   : > { %9018 = vmatprep.subr.bf16.mxu0 %v9955_v10  ;;  %13117 = vst [vmem:[#allocation3_spill] sm:$0xff] %v11909_v3  ;;  %v11927_v27 = vrot.slane %v1987_v35, 4  ;;  %v2469_v35 = vrot.slane %v11938_v25, 5  ;;  %v2038_v9 = vshll.u32 %v1956_v51, 16  ;;  %v2056_v49 = vshrl.u32 %v11944_v63, 16 }
 0x1c6   : > { %v11913_v29 = vsel %vm10567_vm13, %v2457_v45, %v2458_v6  ;;  %v11948_v45 = vrot.slane %v1990_v55, 5  ;;  %v11957_v6 = vrot.slane %v2014_v17, 5  ;;  %v2025_v55 = vor.u32 %v2024_v26, %v2021_v14  ;;  %v11982_v14 = vld [vmem:[#allocation2 + $0x48] sm:$0xf]  ;;  %v11994_v26 = vld [vmem:[#allocation2 + $0x7c] sm:$0xf] }
 0x1c7   : > { %9207 = vmatpush3.bf16.msra.mxu1 %v9952_v12  ;;  %13118 = vst [vmem:[#allocation5_spill] sm:$0xff] %v11913_v29  ;;  %v2011_v12 = vor.u32 %v2010_v59, %v11896_v61  ;;  %v11977_v17 = vrot.slane %v2038_v9, 5  ;;  %v11998_v9 = vld [vmem:[#allocation2 + $0x88] sm:$0xf] }
 0x1c8   : > { %9208 = vmatprep.subr.bf16.mxu1 %v9954_v39  ;;  %9019 = vmatpush3.bf16.msra.mxu0 %v9955_v10  ;;  %v2032_v10 = vshrl.u32 %v11902_v34, 16  ;;  %13122 = vst [vmem:[#allocation17_spill] sm:$0xff] %v11998_v9 }
 0x1c9   : > { %8989 = vmatmul.mubr.bf16.gmra.mrb[44].mxu0 %v13102_v48  ;;  %9020 = vmatprep.subr.bf16.mxu0 %v9957_v37  ;;  %v9958_v48 = vld [vmem:[%s12914_s1 + $0x3b0] sm:$0xff]   ;;  %v11959_v22 = vrot.slane %v2011_v12, 4  ;;  %v9960_v12 = vld [vmem:[%s12914_s1 + $0x3b8] sm:$0xff]  }
 0x1ca   : > { %9177 = vmatmul.mubr.bf16.gmra.mrb[40].mxu1 %v11499_v1  ;;  %8992 = vmatprep.mubr.bf16.mxu0 %v13103_v50  ;;  %v11941_v1 = vld [vmem:[#allocation2 + $0x74] sm:$0x1]  ;;  %v2361_v50 = vld [vmem:[#allocation2 + $0x6c] sm:$0xe]  ;;  %v2034_v8 = vrot.slane %v2032_v10, 4  ;;  %v11979_v10 = vrot.slane %v2046_v11, 5 }
 0x1cb   : > { %9180 = vmatprep.mubr.bf16.mxu1 %v11519_v41  ;;  %9209 = vmatpush3.bf16.msra.mxu1 %v9954_v39  ;;  %v7522_v59 = vrot.slane %v2361_v50, 9  ;;  %v2472_v52 = vrot.slane %v11941_v1, 5  ;;  %v11953_v41 = vld [vmem:[%s12914_s1 + $0x2c0] sm:$0xff]   ;;  %v11955_v39 = vrot.slane %v2001_v28, 4  ;;  %v11967_v50 = vrot.slane %v2043_v2, 4 }
 0x1cc   : > { %9210 = vmatprep.subr.bf16.mxu1 %v9956_v44  ;;  %9021 = vmatpush3.bf16.msra.mxu0 %v9957_v37  ;;  %v2471_v37 = vrot.slane %v2469_v35, 4  ;;  %v1983_v2 = vsel %vm10118_vm6, %v11925_v15, %v11871_v7  ;;  %v12009_v7 = vld [vmem:[%s12914_s1 + $0x3c0] sm:$0xff]   ;;  %v2035_v15 = vor.u32 %v2034_v8, %v11961_v42  ;;  %v12012_v11 = vld [vmem:[#allocation2 + $0x8c] sm:$0x1]  ;;  %v13156_v58 = vld [vmem:[#allocation3_spill] sm:$0xff] }
 0x1cd   : > { %9022 = vmatprep.subr.bf16.mxu0 %v9959_v40  ;;  %v11965_v51 = vsel %vm10567_vm13, %v7522_v59, %v2469_v35  ;;  %v11996_v35 = vld [vmem:[#allocation2 + $0x80] sm:$0x1]  ;;  %13123 = vst [vmem:[#allocation6_spill] sm:$0xff] %v12012_v11  ;;  %v2362_v59 = vld [vmem:[#allocation2 + $0x78] sm:$0xe]  ;;  %v2486_v54 = vrot.slane %v12012_v11, 5 }
 0x1ce   : > { %13119 = vst [vmem:[#allocation11_spill] sm:$0xff] %v11965_v51  ;;  %v11972_v28 = vsel %vm10567_vm13, %v2471_v37, %v2472_v52  ;;  %13121 = vst [vmem:[#allocation18_spill] sm:$0xff] %v11996_v35  ;;  %v2476_v52 = vrot.slane %v11994_v26, 5  ;;  %v2483_v37 = vrot.slane %v11998_v9, 5  ;;  %v12021_v8 = vld [vmem:[#allocation2 + $0x4c] sm:$0xf] }
 0x1cf   : > { %9211 = vmatpush3.bf16.msra.mxu1 %v9956_v44  ;;  %13120 = vst [vmem:[#allocation8_spill] sm:$0xff] %v11972_v28  ;;  %v2052_v44 = vshll.u32 %v11944_v63, 16  ;;  %v2067_v28 = vshrl.u32 %v11982_v14, 16  ;;  %v2070_v51 = vshll.u32 %v11982_v14, 16 }
 0x1d0   : > { %9212 = vmatprep.subr.bf16.mxu1 %v9958_v48  ;;  %9023 = vmatpush3.bf16.msra.mxu0 %v9959_v40  ;;  %v11992_v40 = vld [vmem:[#allocation2 + $0x44] sm:$0x1]  ;;  %v2478_v29 = vrot.slane %v2476_v52, 4 }
 0x1d1   : > { %8993 = vmatmul.mubr.bf16.gmra.mrb[48].mxu0 %v11300_v36  ;;  %9056 = vmatprep.subr.bf16.mxu0 %v11953_v41  ;;  %v1993_v36 = vsel %vm10118_vm6, %v11927_v27, %v11948_v45  ;;  %v7523_v27 = vrot.slane %v2362_v59, 9  ;;  %v2363_v45 = vld [vmem:[#allocation2 + $0x84] sm:$0xe]  ;;  %v2485_v59 = vrot.slane %v2483_v37, 4  ;;  %v2062_v11 = vshll.u32 %v11992_v40, 16 }
 0x1d2   : > { %9181 = vmatmul.mubr.bf16.gmra.mrb[44].mxu1 %v11528_v23  ;;  %8996 = vmatprep.mubr.bf16.mxu0 %v11302_v46  ;;  %v2479_v23 = vrot.slane %v11996_v35, 5  ;;  %v12017_v46 = vrot.slane %v2025_v55, 4  ;;  %v7524_v3 = vrot.slane %v2363_v45, 9  ;;  %v12031_v35 = vrot.slane %v2052_v44, 5 }
 0x1d3   : > { %9184 = vmatprep.mubr.bf16.mxu1 %v11539_v53  ;;  %9213 = vmatpush3.bf16.msra.mxu1 %v9958_v48  ;;  %v2049_v53 = vor.u32 %v11979_v10, %v11967_v50  ;;  %v2058_v48 = vrot.slane %v2056_v49, 4  ;;  %v12029_v55 = vsel %vm10567_vm13, %v7523_v27, %v2476_v52  ;;  %v12042_v50 = vrot.slane %v2035_v15, 4  ;;  %v1958_v52 = vld [vmem:[#allocation2 + $0x50] sm:$0x1]  ;;  %v12068_v27 = vld [vmem:[#allocation2 + $0x98] sm:$0x1] }
 0x1d4   : > { %9214 = vmatprep.subr.bf16.mxu1 %v9960_v12  ;;  %13124 = vst [vmem:[#allocation7_spill] sm:$0xff] %v12029_v55  ;;  %v12036_v9 = vsel %vm10567_vm13, %v2478_v29, %v2479_v23  ;;  %v12040_v45 = vsel %vm10567_vm13, %v7524_v3, %v2483_v37  ;;  %v2080_v49 = vshrl.u32 %v12021_v8, 16  ;;  %v12049_v44 = vsel %vm10567_vm13, %v2485_v59, %v2486_v54  ;;  %v12070_v37 = vld [vmem:[#allocation2 + $0xa0] sm:$0xf] }
 0x1d5   : > { %13125 = vst [vmem:[#allocation19_spill] sm:$0xff] %v12036_v9  ;;  %13126 = vst [vmem:[#allocation23_spill] sm:$0xff] %v12040_v45  ;;  %v2069_v29 = vrot.slane %v2067_v28, 4  ;;  %v2072_v40 = vrot.slane %v2070_v51, 5  ;;  %v2076_v3 = vshll.u32 %v12021_v8, 16  ;;  %v12058_v23 = vcombine.low %v1983_v2, %v1993_v36 }
 0x1d6   : > { %13127 = vst [vmem:[#allocation25_spill] sm:$0xff] %v12049_v44  ;;  %v2007_v51 = vsel %vm10118_vm6, %v11955_v39, %v11896_v61  ;;  %v12066_v28 = vld [vmem:[#allocation2 + $0x94] sm:$0xf]  ;;  %v2059_v2 = vor.u32 %v2058_v48, %v12031_v35  ;;  %v12079_v36 = vld [vmem:[#allocation2 + $0xa4] sm:$0x1]  ;;  %v2493_v59 = vrot.slane %v12068_v27, 5 }
 0x1d7   : > { %9215 = vmatpush3.bf16.msra.mxu1 %v9960_v12  ;;  %v2364_v61 = vld [vmem:[#allocation2 + $0x90] sm:$0xe]  ;;  %v2490_v39 = vrot.slane %v12066_v28, 5  ;;  %v12084_v12 = vrot.slane %v2049_v53, 4  ;;  %v2497_v10 = vrot.slane %v12070_v37, 5  ;;  %v2500_v54 = vrot.slane %v12079_v36, 5 }
 0x1d8   : > { %9248 = vmatprep.subr.bf16.mxu1 %v12009_v7  ;;  %v12088_v48 = vld [vmem:[#allocation2 + $0x54] sm:$0xf]  ;;  %v12090_v45 = vrot.slane %v2062_v11, 5  ;;  %v2082_v9 = vrot.slane %v2080_v49, 4  ;;  %v12098_v55 = vrot.slane %v2076_v3, 5 }
 0x1d9   : > { %8997 = vmatmul.mubr.bf16.gmra.mrb[52].mxu0 %v11366_v18  ;;  %v2017_v18 = vsel %vm10118_vm6, %v11959_v22, %v11957_v6  ;;  %v2073_v6 = vor.u32 %v2072_v40, %v2069_v29  ;;  %v2086_v22 = vshll.u32 %v1958_v52, 16  ;;  %v2492_v15 = vrot.slane %v2490_v39, 4 }
 0x1da   : > { %9185 = vmatmul.mubr.bf16.gmra.mrb[48].mxu1 %v11552_v21  ;;  %9000 = vmatprep.mubr.bf16.mxu0 %v11428_v19  ;;  %v7525_v21 = vrot.slane %v2364_v61, 9  ;;  %v2365_v19 = vld [vmem:[#allocation2 + $0x9c] sm:$0xe]  ;;  %v2499_v53 = vrot.slane %v2497_v10, 4  ;;  %v12096_v61 = vrot.slane %v2059_v2, 4  ;;  %v2091_v11 = vshrl.u32 %v12088_v48, 16 }
 0x1db   : > { %9188 = vmatprep.mubr.bf16.mxu1 %v11558_v16  ;;  %v7526_v44 = vrot.slane %v2365_v19, 9  ;;  %v12102_v29 = vsel %vm10567_vm13, %v2492_v15, %v2493_v59  ;;  %v2094_v49 = vshll.u32 %v12088_v48, 16  ;;  %v12116_v3 = vrot.slane %v2073_v6, 4  ;;  %v12134_v19 = vld [vmem:[#allocation2 + $0x60] sm:$0xf] }
 0x1dc   : > { %v12094_v16 = vsel %vm10567_vm13, %v7525_v21, %v2490_v39  ;;  %13129 = vst [vmem:[#allocation28_spill] sm:$0xff] %v12102_v29  ;;  %v12114_v2 = vsel %vm10567_vm13, %v2499_v53, %v2500_v54  ;;  %v12118_v39 = vrot.slane %v2086_v22, 5  ;;  %v2104_v15 = vshrl.u32 %v11881_v38, 16  ;;  %v12136_v6 = vld [vmem:[#allocation2 + $0xac] sm:$0xf] }
 0x1dd   : > { %13128 = vst [vmem:[#allocation27_spill] sm:$0xff] %v12094_v16  ;;  %v12106_v40 = vsel %vm10567_vm13, %v7526_v44, %v2497_v10  ;;  %13131 = vst [vmem:[#allocation33_spill] sm:$0xff] %v12114_v2  ;;  %v12124_v44 = vcombine.low %v2007_v51, %v2017_v18  ;;  %v2031_v54 = vsel %vm10118_vm6, %v12017_v46, %v11961_v42  ;;  %v12138_v22 = vld [vmem:[#allocation2 + $0xb0] sm:$0x1]  ;;  %v12149_v51 = vld [vmem:[#allocation2 + $0xbc] sm:$0x1] }
 0x1de   : > { %13130 = vst [vmem:[#allocation31_spill] sm:$0xff] %v12106_v40  ;;  %13132 = vst [vmem:[#allocation39_spill] sm:$0xff] %v12138_v22  ;;  %v2041_v42 = vsel %vm10118_vm6, %v12042_v50, %v11977_v17  ;;  %v2083_v46 = vor.u32 %v2082_v9, %v12098_v55  ;;  %v2366_v18 = vld [vmem:[#allocation2 + $0xa8] sm:$0xe]  ;;  %v2504_v53 = vrot.slane %v12136_v6, 5  ;;  %v2507_v10 = vrot.slane %v12138_v22, 5 }
 0x1df   : > { %v7527_v52 = vrot.slane %v2366_v18, 9  ;;  %v2514_v59 = vrot.slane %v12149_v51, 5  ;;  %v2093_v17 = vrot.slane %v2091_v11, 4  ;;  %v2110_v9 = vshll.u32 %v11898_v30, 16  ;;  %v12158_v16 = vld [vmem:[#allocation2 + $0x64] sm:$0xf] }
 0x1e0   : > { %v2506_v50 = vrot.slane %v2504_v53, 4  ;;  %v2096_v40 = vrot.slane %v2094_v49, 5  ;;  %v2106_v29 = vrot.slane %v2104_v15, 4  ;;  %v12164_v18 = vrot.slane %v2083_v46, 4 }
 0x1e1   : > { %9001 = vmatmul.mubr.bf16.gmra.mrb[56].mxu0 %v11435_v43  ;;  %v12140_v43 = vld [vmem:[#allocation2 + $0xb8] sm:$0xf]  ;;  %v2118_v15 = vshll.u32 %v12134_v19, 16 }
 0x1e2   : > { %13133 = vst [vmem:[#allocation14_spill] sm:$0xff] %v12140_v43  ;;  %9189 = vmatmul.mubr.bf16.gmra.mrb[52].mxu1 %v11566_v56  ;;  %9004 = vmatprep.mubr.bf16.mxu0 %v11604_v47  ;;  %v2100_v56 = vshll.u32 %v11881_v38, 16  ;;  %v2367_v47 = vld [vmem:[#allocation2 + $0xb4] sm:$0xe]  ;;  %v2511_v21 = vrot.slane %v12140_v43, 5  ;;  %v2115_v43 = vshrl.u32 %v12134_v19, 16  ;;  %v12169_v11 = vsel %vm10567_vm13, %v2506_v50, %v2507_v10 }
 0x1e3   : > { %9192 = vmatprep.mubr.bf16.mxu1 %v11575_v31  ;;  %v7528_v2 = vrot.slane %v2367_v47, 9  ;;  %v12162_v31 = vsel %vm10567_vm13, %v7527_v52, %v2504_v53  ;;  %13135 = vst [vmem:[#allocation21_spill] sm:$0xff] %v12169_v11  ;;  %v12184_v53 = vrot.slane %v2110_v9, 5  ;;  %v2128_v10 = vshrl.u32 %v12158_v16, 16  ;;  %v12188_v50 = vld [vmem:[#allocation2 + $0x6c] sm:$0xf] }
 0x1e4   : > { %13134 = vst [vmem:[#allocation16_spill] sm:$0xff] %v12162_v31  ;;  %v2513_v22 = vrot.slane %v2511_v21, 4  ;;  %v12175_v49 = vrot.slane %v2100_v56, 5  ;;  %v2124_v47 = vshll.u32 %v12158_v16, 16  ;;  %v12205_v9 = vld [vmem:[#allocation2 + $0xc4] sm:$0xf] }
 0x1e5   : > { %v12173_v30 = vsel %vm10567_vm13, %v7528_v2, %v2511_v21  ;;  %v12193_v21 = vcombine.low %v2031_v54, %v2041_v42  ;;  %v12207_v2 = vld [vmem:[#allocation2 + $0xc8] sm:$0x1]  ;;  %v13139_v54 = vcombine.low %v11841_v33, %v11847_v5  ;;  %v2518_v42 = vrot.slane %v12205_v9, 5  ;;  %v2369_v33 = vld [vmem:[#allocation2 + $0xcc] sm:$0xe] }
 0x1e6   : > { %13136 = vst [vmem:[#allocation9_spill] sm:$0xff] %v12173_v30  ;;  %v12182_v46 = vsel %vm10567_vm13, %v2513_v22, %v2514_v59  ;;  %v2055_v59 = vsel %vm10118_vm6, %v12084_v12, %v12031_v35  ;;  %v2065_v22 = vsel %vm10118_vm6, %v12096_v61, %v12090_v45  ;;  %v2079_v35 = vsel %vm10118_vm6, %v12116_v3, %v12098_v55  ;;  %v12219_v12 = vld [vmem:[#allocation2 + $0xd4] sm:$0x1]  ;;  %v2368_v61 = vld [vmem:[#allocation2 + $0xc0] sm:$0xe] }
 0x1e7   : > { %13137 = vst [vmem:[#allocation24_spill] sm:$0xff] %v12182_v46  ;;  %v2097_v45 = vor.u32 %v2096_v40, %v2093_v17  ;;  %13140 = vst [vmem:[#allocation4_spill] sm:$0xff] %v12219_v12  ;;  %v2521_v52 = vrot.slane %v12207_v2, 5  ;;  %v7529_v56 = vrot.slane %v2368_v61, 9  ;;  %v2139_v55 = vshrl.u32 %v12188_v50, 16 }
 0x1e8   : > { %v2142_v40 = vshll.u32 %v12188_v50, 16  ;;  %v2520_v3 = vrot.slane %v2518_v42, 4  ;;  %v7530_v17 = vrot.slane %v2369_v33, 9  ;;  %v2152_v46 = vshrl.u32 %v11938_v25, 16 }
 0x1e9   : > { %9005 = vmatmul.mubr.bf16.gmra.mrb[60].mxu0 %v11642_v24  ;;  %v12209_v24 = vld [vmem:[#allocation2 + $0xd0] sm:$0xf]  ;;  %v2148_v30 = vshll.u32 %v11938_v25, 16  ;;  %v2089_v61 = vsel %vm10118_vm6, %v12164_v18, %v12118_v39  ;;  %v2098_v11 = vrot.slane %v2097_v45, 4  ;;  %v9967_v39 = vld [vmem:[%s12914_s1 + $0x2c8] sm:$0xff]   ;;  %v2130_v45 = vrot.slane %v2128_v10, 4 }
 0x1ea   : > { %13138 = vst [vmem:[#allocation29_spill] sm:$0xff] %v12209_v24  ;;  %9193 = vmatmul.mubr.bf16.gmra.mrb[56].mxu1 %v11606_v20  ;;  %9024 = vmatprep.mubr.bf16.mxu0 %v13139_v54  ;;  %v2107_v20 = vor.u32 %v2106_v29, %v12175_v49  ;;  %v2525_v5 = vrot.slane %v12209_v24, 5  ;;  %v2528_v54 = vrot.slane %v12219_v12, 5  ;;  %v12241_v31 = vsel %vm10567_vm13, %v2520_v3, %v2521_v52  ;;  %v12258_v3 = vld [vmem:[#allocation2 + $0x78] sm:$0xf] }
 0x1eb   : > { %9196 = vmatprep.mubr.bf16.mxu1 %v11610_v62  ;;  %v12233_v62 = vsel %vm10567_vm13, %v7529_v56, %v2518_v42  ;;  %13141 = vst [vmem:[#allocation34_spill] sm:$0xff] %v12241_v31  ;;  %v2117_v12 = vrot.slane %v2115_v43, 4  ;;  %v2120_v24 = vrot.slane %v2118_v15, 5  ;;  %v12256_v52 = vrot.slane %v2124_v47, 5 }
 0x1ec   : > { %v2527_v29 = vrot.slane %v2525_v5, 4  ;;  %v12245_v33 = vsel %vm10567_vm13, %v7530_v17, %v2525_v5  ;;  %v2108_v18 = vrot.slane %v2107_v20, 4  ;;  %v13144_v15 = vcombine.low %v11859_v4, %v11864_v57  ;;  %v12265_v5 = vld [vmem:[#allocation2 + $0x68] sm:$0x1]  ;;  %v9971_v4 = vld [vmem:[%s12914_s1 + $0x2d0] sm:$0xff]  }
 0x1ed   : > { %13142 = vst [vmem:[#allocation36_spill] sm:$0xff] %v12245_v33  ;;  %v2144_v17 = vrot.slane %v2142_v40, 5  ;;  %v2154_v56 = vrot.slane %v2152_v46, 4  ;;  %v12271_v10 = vcombine.low %v2055_v59, %v2065_v22  ;;  %v12273_v47 = vcombine.low %v2079_v35, %v2089_v61  ;;  %v12288_v59 = vld [vmem:[#allocation2 + $0x84] sm:$0xf]  ;;  %v13148_v33 = vld [vmem:[#allocation18_spill] sm:$0xff] }
 0x1ee   : > { %v12251_v42 = vsel %vm10567_vm13, %v2527_v29, %v2528_v54  ;;  %v2141_v54 = vrot.slane %v2139_v55, 4  ;;  %v12267_v29 = vrot.slane %v2148_v30, 5  ;;  %v13145_v57 = vcombine.low %v11892_v60, %v11902_v34 }
 0x1ef   : > { %13143 = vst [vmem:[#allocation12_spill] sm:$0xff] %v12251_v42  ;;  %v2176_v30 = vshrl.u32 %v11994_v26, 16  ;;  %v2172_v46 = vshll.u32 %v11994_v26, 16  ;;  %v2103_v22 = vsel %vm10118_vm6, %v2098_v11, %v12175_v49  ;;  %v2121_v35 = vor.u32 %v2120_v24, %v2117_v12  ;;  %v13146_v11 = vld [vmem:[#allocation17_spill] sm:$0xff] }
 0x1f0   : > { %v2131_v55 = vor.u32 %v2130_v45, %v12256_v52  ;;  %v2134_v60 = vshll.u32 %v12265_v5, 16  ;;  %v2113_v34 = vsel %vm10118_vm6, %v2108_v18, %v12184_v53  ;;  %v2145_v40 = vor.u32 %v2144_v17, %v2141_v54  ;;  %v12311_v17 = vld [vmem:[#allocation2 + $0x90] sm:$0xf] }
 0x1f1   : > { %9025 = vmatmul.mubr.bf16.vlgmr.msra.gmra.mrb[32].mxu0 %v13144_v15  ;;  %v2155_v61 = vor.u32 %v2154_v56, %v12267_v29  ;;  %v2158_v15 = vshll.u32 %v11941_v1, 16  ;;  %v2190_v43 = vshll.u32 %v12288_v59, 16  ;;  %v2200_v49 = vshrl.u32 %v13146_v11, 16  ;;  %v9968_v56 = vld [vmem:[%s12914_s1 + $0x3c8] sm:$0xff]  }
 0x1f2   : > { %9197 = vmatmul.mubr.bf16.gmra.mrb[60].mxu1 %v11615_v0  ;;  %9057 = vmatpush3.bf16.msra.mxu0 %v11953_v41  ;;  %v2163_v0 = vshrl.u32 %v12258_v3, 16  ;;  %v2166_v41 = vshll.u32 %v12258_v3, 16  ;;  %v2196_v24 = vshll.u32 %v13146_v11, 16  ;;  %v12304_v20 = vrot.slane %v2172_v46, 5 }
 0x1f3   : > { %9216 = vmatprep.mubr.bf16.mxu1 %v12058_v23  ;;  %9028 = vmatprep.mubr.bf16.mxu0 %v13145_v57  ;;  %v2187_v57 = vshrl.u32 %v12288_v59, 16  ;;  %v2178_v53 = vrot.slane %v2176_v30, 4  ;;  %v12309_v1 = vcombine.low %v2103_v22, %v2113_v34  ;;  %v2132_v18 = vrot.slane %v2131_v55, 4 }
 0x1f4   : > { %9058 = vmatprep.subr.bf16.mxu0 %v9967_v39  ;;  %v2165_v12 = vrot.slane %v2163_v0, 4  ;;  %v2168_v45 = vrot.slane %v2166_v41, 5  ;;  %v2136_v54 = vrot.slane %v2134_v60, 5  ;;  %v13147_v42 = vcombine.low %v11905_v13, %v11944_v63  ;;  %v9975_v0 = vld [vmem:[%s12914_s1 + $0x2d8] sm:$0xff]  }
 0x1f5   : > { %v2146_v41 = vrot.slane %v2145_v40, 4  ;;  %v2156_v30 = vrot.slane %v2155_v61, 4  ;;  %v2160_v46 = vrot.slane %v2158_v15, 5  ;;  %v2182_v31 = vshll.u32 %v13148_v33, 16 }
 0x1f6   : > { %9059 = vmatpush3.bf16.msra.mxu0 %v9967_v39  ;;  %v2122_v39 = vrot.slane %v2121_v35, 4  ;;  %v13149_v22 = vcombine.low %v11982_v14, %v12021_v8  ;;  %v2189_v35 = vrot.slane %v2187_v57, 4  ;;  %v2192_v55 = vrot.slane %v2190_v43, 5  ;;  %v9972_v14 = vld [vmem:[%s12914_s1 + $0x3d0] sm:$0xff]  }
 0x1f7   : > { %9060 = vmatprep.subr.bf16.mxu0 %v9971_v4  ;;  %v12324_v60 = vrot.slane %v2196_v24, 5  ;;  %v2202_v13 = vrot.slane %v2200_v49, 4  ;;  %v2169_v63 = vor.u32 %v2168_v45, %v2165_v12  ;;  %v2211_v33 = vshrl.u32 %v12311_v17, 16  ;;  %v13150_v12 = vld [vmem:[#allocation6_spill] sm:$0xff] }
 0x1f8   : > { %v2214_v34 = vshll.u32 %v12311_v17, 16  ;;  %v7906_v8 = vcombine.low %v12134_v19, %v12158_v16  ;;  %v2224_v43 = vshrl.u32 %v12066_v28, 16  ;;  %v2220_v40 = vshll.u32 %v12066_v28, 16  ;;  %v9979_v19 = vld [vmem:[%s12914_s1 + $0x2e0] sm:$0xff]  }
 0x1f9   : > { %9029 = vmatmul.mubr.bf16.gmra.mrb[36].mxu0 %v13147_v42  ;;  %v2179_v42 = vor.u32 %v2178_v53, %v12304_v20  ;;  %v2137_v61 = vsel %vm10118_vm6, %v2132_v18, %v2136_v54  ;;  %v7907_v15 = vcombine.low %v12188_v50, %v11938_v25  ;;  %v2161_v16 = vsel %vm10118_vm6, %v2156_v30, %v2160_v46  ;;  %v9976_v54 = vld [vmem:[%s12914_s1 + $0x3d8] sm:$0xff]  }
 0x1fa   : > { %9217 = vmatmul.mubr.bf16.vlgmr.msra.gmra.mrb[32].mxu1 %v12124_v44  ;;  %9032 = vmatprep.mubr.bf16.mxu0 %v13149_v22  ;;  %v12355_v57 = vrot.slane %v2182_v31, 5  ;;  %v2193_v49 = vor.u32 %v2192_v55, %v2189_v35  ;;  %v2203_v24 = vor.u32 %v2202_v13, %v12324_v60  ;;  %v2206_v45 = vshll.u32 %v13150_v12, 16  ;;  %v12377_v22 = vld [vmem:[%s12915_s2] ss:$0 sm:$0xff]  ;;  %v9983_v13 = vld [vmem:[%s12914_s1 + $0x2e8] sm:$0xff]  }
 0x1fb   : > { %9249 = vmatpush3.bf16.msra.mxu1 %v12009_v7  ;;  %9220 = vmatprep.mubr.bf16.mxu1 %v12193_v21  ;;  %v2127_v7 = vsel %vm10118_vm6, %v2122_v39, %v12256_v52  ;;  %v12353_v52 = vld [vmem:[#allocation2 + $0x9c] sm:$0xf]  ;;  %v12359_v53 = vrot.slane %v2169_v63, 4  ;;  %v2213_v39 = vrot.slane %v2211_v33, 4  ;;  %v2216_v18 = vrot.slane %v2214_v34, 5 }
 0x1fc   : > { %9250 = vmatprep.subr.bf16.mxu1 %v9968_v56  ;;  %9061 = vmatpush3.bf16.msra.mxu0 %v9971_v4  ;;  %v2151_v4 = vsel %vm10118_vm6, %v2146_v41, %v12267_v29  ;;  %v12361_v29 = vrot.slane %v2179_v42, 4  ;;  %v12366_v31 = vrot.slane %v2220_v40, 5  ;;  %v2226_v41 = vrot.slane %v2224_v43, 4  ;;  %v12390_v33 = vld [vmem:[#allocation2 + $0xa8] sm:$0xf] }
 0x1fd   : > { %9062 = vmatprep.subr.bf16.mxu0 %v9975_v0  ;;  %v2235_v30 = vshrl.u32 %v12353_v52, 16  ;;  %v2238_v46 = vshll.u32 %v12353_v52, 16  ;;  %v12379_v35 = vcombine.low %v2127_v7, %v2137_v61  ;;  %v7908_v55 = vcombine.low %v12258_v3, %v11994_v26 }
 0x1fe   : > { %v2208_v63 = vrot.slane %v2206_v45, 5  ;;  %v2230_v42 = vshll.u32 %v12068_v27, 16  ;;  %v2175_v26 = vsel %vm10118_vm6, %v12359_v53, %v12304_v20  ;;  %v2185_v3 = vsel %vm10118_vm6, %v12361_v29, %v12355_v57 }
 0x1ff   : > { %9251 = vmatpush3.bf16.msra.mxu1 %v9968_v56  ;;  %v13151_v56 = vcombine.low %v12088_v48, %v11881_v38  ;;  %v2194_v38 = vrot.slane %v2193_v49, 4  ;;  %v2204_v48 = vrot.slane %v2203_v24, 4  ;;  %v2217_v34 = vor.u32 %v2216_v18, %v2213_v39 }
 0x200   : > { %9252 = vmatprep.subr.bf16.mxu1 %v9972_v14  ;;  %9063 = vmatpush3.bf16.msra.mxu0 %v9975_v0  ;;  %v12381_v0 = vcombine.low %v2151_v4, %v2161_v16  ;;  %v2227_v20 = vor.u32 %v2226_v41, %v12366_v31  ;;  %v2240_v7 = vrot.slane %v2238_v46, 5  ;;  %v2248_v43 = vshrl.u32 %v12070_v37, 16 }
 0x201   : > { %9033 = vmatmul.mubr.bf16.gmra.mrb[40].mxu0 %v13151_v56  ;;  %9064 = vmatprep.subr.bf16.mxu0 %v9979_v19  ;;  %v2244_v4 = vshll.u32 %v12070_v37, 16  ;;  %v2259_v16 = vshrl.u32 %v12390_v33, 16  ;;  %v2262_v57 = vshll.u32 %v12390_v33, 16  ;;  %v2199_v12 = vsel %vm10118_vm6, %v2194_v38, %v12324_v60 }
 0x202   : > { %9221 = vmatmul.mubr.bf16.gmra.mrb[36].mxu1 %v12271_v10  ;;  %9036 = vmatprep.mubr.bf16.mxu0 %v7906_v8  ;;  %v2237_v8 = vrot.slane %v2235_v30, 4  ;;  %v2209_v45 = vsel %vm10118_vm6, %v2204_v48, %v2208_v63  ;;  %v12424_v53 = vrot.slane %v2230_v42, 5  ;;  %v12428_v18 = vrot.slane %v2217_v34, 4 }
 0x203   : > { %9224 = vmatprep.mubr.bf16.mxu1 %v12273_v47  ;;  %9253 = vmatpush3.bf16.msra.mxu1 %v9972_v14  ;;  %v9980_v14 = vld [vmem:[%s12914_s1 + $0x3e0] sm:$0xff]   ;;  %v2272_v41 = vshrl.u32 %v12136_v6, 16  ;;  %v2268_v30 = vshll.u32 %v12136_v6, 16  ;;  %v12434_v46 = vrot.slane %v2227_v20, 4  ;;  %v2254_v38 = vshll.u32 %v12079_v36, 16  ;;  %v9991_v36 = vld [vmem:[%s12914_s1 + $0x2f8] sm:$0xff]  }
 0x204   : > { %v8690_v27 = vpop.f32.mrb[0].mxu0  ;;  %9254 = vmatprep.subr.bf16.mxu1 %v9976_v54  ;;  %9065 = vmatpush3.bf16.msra.mxu0 %v9979_v19  ;;  %v9987_v19 = vld [vmem:[%s12914_s1 + $0x2f0] sm:$0xff]   ;;  %v2241_v56 = vor.u32 %v2240_v7, %v2237_v8  ;;  %v12444_v48 = vrot.slane %v2244_v4, 5  ;;  %v12446_v63 = vrot.slane %v2248_v43, 4  ;;  %v12448_v42 = vrot.slane %v2259_v16, 4 }
 0x205   : > { %v9296_v40 = vadd.f32 %v8690_v27, %v12377_v22  ;;  %v3697_v61 = vpop.f32.mrb[1].mxu0  ;;  %9066 = vmatprep.subr.bf16.mxu0 %v9983_v13  ;;  %v12450_v34 = vrot.slane %v2262_v57, 5  ;;  %v7909_v25 = vcombine.low %v12288_v59, %v13146_v11  ;;  %v7910_v50 = vcombine.low %v12311_v17, %v12066_v28  ;;  %v12495_v16 = vld [vmem:[#allocation2 + $0xc0] sm:$0xf] }
 0x206   : > { %v9297_v49 = vadd.f32 %v12377_v22, %v3697_v61  ;;  %v8691_v24 = vpop.f32.mrb[2].mxu0  ;;  %v7911_v27 = vcombine.low %v12353_v52, %v12070_v37  ;;  %v12468_v20 = vrot.slane %v2268_v30, 5  ;;  %v12470_v8 = vrot.slane %v2272_v41, 4  ;;  %v13152_v61 = vld [vmem:[#allocation39_spill] sm:$0xff]  ;;  %v13153_v30 = vld [vmem:[#allocation14_spill] sm:$0xff] }
 0x207   : > { %3858 = vst [vmem:[%s12404_s23 + $0x10] sm:$0xff] %v9296_v40  ;;  %v9298_v29 = vadd.f32 %v8691_v24, %v12377_v22  ;;  %v3700_v39 = vpop.f32.mrb[3].mxu0  ;;  %9255 = vmatpush3.bf16.msra.mxu1 %v9976_v54  ;;  %v9984_v54 = vld [vmem:[%s12914_s1 + $0x3e8] sm:$0xff]   ;;  %v2223_v28 = vsel %vm10118_vm6, %v12428_v18, %v12366_v31  ;;  %v2233_v59 = vsel %vm10118_vm6, %v12434_v46, %v12424_v53  ;;  %v12482_v11 = vrot.slane %v2241_v56, 4 }
 0x208   : > { %3856 = vst [vmem:[%s12404_s23] sm:$0xff] %v9297_v49  ;;  %v9299_v60 = vadd.f32 %v12377_v22, %v3700_v39  ;;  %9256 = vmatprep.subr.bf16.mxu1 %v9980_v14  ;;  %9067 = vmatpush3.bf16.msra.mxu0 %v9983_v13  ;;  %v12457_v13 = vcombine.low %v2175_v26, %v2185_v3  ;;  %v12484_v17 = vrot.slane %v2254_v38, 5  ;;  %v9988_v3 = vld [vmem:[%s12914_s1 + $0x3f0] sm:$0xff]   ;;  %v2278_v4 = vshll.u32 %v13152_v61, 16 }
 0x209   : > { %3859 = vst [vmem:[%s12404_s23 + $0x18] sm:$0xff] %v9298_v29  ;;  %9037 = vmatmul.mubr.bf16.gmra.mrb[44].mxu0 %v7907_v15  ;;  %9068 = vmatprep.subr.bf16.mxu0 %v9987_v19  ;;  %v12464_v15 = vcombine.low %v2199_v12, %v2209_v45  ;;  %v2251_v43 = vor.u32 %v12446_v63, %v12444_v48  ;;  %v2292_v63 = vshll.u32 %v13153_v30, 16 }
 0x20a   : > { %9225 = vmatmul.mubr.bf16.gmra.mrb[40].mxu1 %v12309_v1  ;;  %3857 = vst [vmem:[%s12404_s23 + $0x8] sm:$0xff] %v9299_v60  ;;  %9040 = vmatprep.mubr.bf16.mxu0 %v7908_v55  ;;  %v12472_v55 = vld [vmem:[#allocation2 + $0xb4] sm:$0xf]  ;;  %v2265_v40 = vor.u32 %v12450_v34, %v12448_v42  ;;  %v2275_v41 = vor.u32 %v12470_v8, %v12468_v20  ;;  %v2296_v60 = vshrl.u32 %v13153_v30, 16  ;;  %v2307_v42 = vshrl.u32 %v12495_v16, 16 }
 0x20b   : > { %9228 = vmatprep.mubr.bf16.mxu1 %v12379_v35  ;;  %9257 = vmatpush3.bf16.msra.mxu1 %v9980_v14  ;;  %v2283_v12 = vshrl.u32 %v12472_v55, 16  ;;  %v2286_v45 = vshll.u32 %v12472_v55, 16  ;;  %v2310_v8 = vshll.u32 %v12495_v16, 16  ;;  %v7912_v61 = vcombine.low %v12390_v33, %v12136_v6 }
 0x20c   : > { %v8694_v26 = vpop.f32.mrb[4].mxu0  ;;  %9258 = vmatprep.subr.bf16.mxu1 %v9984_v54  ;;  %9069 = vmatpush3.bf16.msra.mxu0 %v9987_v19 }
 0x20d   : > { %v8882_v14 = vpop.f32.mrb[0].mxu1  ;;  %v9300_v7 = vadd.f32 %v8694_v26, %v12377_v22  ;;  %v3713_v31 = vpop.f32.mrb[5].mxu0  ;;  %9070 = vmatprep.subr.bf16.mxu0 %v9991_v36  ;;  %v2320_v26 = vshrl.u32 %v12205_v9, 16 }
 0x20e   : > { %v9328_v57 = vadd.f32 %v8882_v14, %v12377_v22  ;;  %v4889_v19 = vpop.f32.mrb[1].mxu1  ;;  %v9301_v49 = vadd.f32 %v12377_v22, %v3713_v31  ;;  %v8695_v24 = vpop.f32.mrb[6].mxu0  ;;  %v2316_v14 = vshll.u32 %v12205_v9, 16  ;;  %v2252_v31 = vrot.slane %v2251_v43, 4 }
 0x20f   : > { %v9329_v53 = vadd.f32 %v12377_v22, %v4889_v19  ;;  %v8883_v29 = vpop.f32.mrb[2].mxu1  ;;  %3862 = vst [vmem:[%s12404_s23 + $0x30] sm:$0xff] %v9300_v7  ;;  %v9302_v39 = vadd.f32 %v8695_v24, %v12377_v22  ;;  %v3716_v18 = vpop.f32.mrb[7].mxu0  ;;  %9259 = vmatpush3.bf16.msra.mxu1 %v9984_v54  ;;  %v9992_v54 = vld [vmem:[%s12914_s1 + $0x3f8] sm:$0xff]   ;;  %v12525_v7 = vcombine.low %v2223_v28, %v2233_v59  ;;  %v2285_v19 = vrot.slane %v2283_v12, 4 }
 0x210   : > { %7806 = vst [vmem:[%s12404_s23 + $0x110] sm:$0xff] %v9328_v57  ;;  %v9330_v46 = vadd.f32 %v8883_v29, %v12377_v22  ;;  %v4892_v56 = vpop.f32.mrb[3].mxu1  ;;  %3860 = vst [vmem:[%s12404_s23 + $0x20] sm:$0xff] %v9301_v49  ;;  %v9303_v38 = vadd.f32 %v12377_v22, %v3716_v18  ;;  %9260 = vmatprep.subr.bf16.mxu1 %v9988_v3  ;;  %9071 = vmatpush3.bf16.msra.mxu0 %v9991_v36  ;;  %v2280_v57 = vrot.slane %v2278_v4, 5 }
 0x211   : > { %7804 = vst [vmem:[%s12404_s23 + $0x100] sm:$0xff] %v9329_v53  ;;  %v9331_v34 = vadd.f32 %v12377_v22, %v4892_v56  ;;  %3863 = vst [vmem:[%s12404_s23 + $0x38] sm:$0xff] %v9302_v39  ;;  %9041 = vmatmul.mubr.bf16.gmra.mrb[48].mxu0 %v7909_v25  ;;  %v2247_v36 = vsel %vm10118_vm6, %v12482_v11, %v12444_v48  ;;  %v2266_v25 = vrot.slane %v2265_v40, 4  ;;  %v2288_v49 = vrot.slane %v2286_v45, 5 }
 0x212   : > { %7807 = vst [vmem:[%s12404_s23 + $0x118] sm:$0xff] %v9330_v46  ;;  %9229 = vmatmul.mubr.bf16.gmra.mrb[44].mxu1 %v12381_v0  ;;  %3861 = vst [vmem:[%s12404_s23 + $0x28] sm:$0xff] %v9303_v38  ;;  %9044 = vmatprep.mubr.bf16.mxu0 %v7910_v50  ;;  %v2276_v28 = vrot.slane %v2275_v41, 4  ;;  %v12535_v59 = vrot.slane %v2292_v63, 5  ;;  %v2298_v24 = vrot.slane %v2296_v60, 4  ;;  %v2309_v53 = vrot.slane %v2307_v42, 4 }
 0x213   : > { %7805 = vst [vmem:[%s12404_s23 + $0x108] sm:$0xff] %v9331_v34  ;;  %9232 = vmatprep.mubr.bf16.mxu1 %v12457_v13  ;;  %9261 = vmatpush3.bf16.msra.mxu1 %v9988_v3  ;;  %v2312_v40 = vrot.slane %v2310_v8, 5  ;;  %v12538_v29 = vrot.slane %v2316_v14, 5  ;;  %v2322_v6 = vrot.slane %v2320_v26, 4  ;;  %v2257_v45 = vsel %vm10118_vm6, %v2252_v31, %v12484_v17  ;;  %v12552_v63 = vld [vmem:[#allocation2 + $0xcc] sm:$0xf] }
 0x214   : > { %v8698_v50 = vpop.f32.mrb[8].mxu0  ;;  %9262 = vmatprep.subr.bf16.mxu1 %v9992_v54  ;;  %v2271_v39 = vsel %vm10118_vm6, %v2266_v25, %v12468_v20  ;;  %v2289_v56 = vor.u32 %v2288_v49, %v2285_v19  ;;  %v2302_v38 = vshll.u32 %v12149_v51, 16  ;;  %v2281_v34 = vsel %vm10118_vm6, %v2276_v28, %v2280_v57 }
 0x215   : > { %v8886_v48 = vpop.f32.mrb[4].mxu1  ;;  %v9304_v11 = vadd.f32 %v8698_v50, %v12377_v22  ;;  %v3729_v43 = vpop.f32.mrb[9].mxu0  ;;  %v2299_v8 = vor.u32 %v2298_v24, %v12535_v59  ;;  %v2323_v26 = vor.u32 %v2322_v6, %v12538_v29  ;;  %v2326_v14 = vshll.u32 %v12207_v2, 16  ;;  %v13154_v2 = vld [vmem:[#allocation29_spill] sm:$0xff] }
 0x216   : > { %v9332_v33 = vadd.f32 %v8886_v48, %v12377_v22  ;;  %v4905_v3 = vpop.f32.mrb[5].mxu1  ;;  %v9305_v4 = vadd.f32 %v12377_v22, %v3729_v43  ;;  %v8699_v12 = vpop.f32.mrb[10].mxu0  ;;  %v7913_v31 = vcombine.low %v12472_v55, %v13153_v30  ;;  %v2331_v25 = vshrl.u32 %v12552_v63, 16 }
 0x217   : > { %v9333_v18 = vadd.f32 %v12377_v22, %v4905_v3  ;;  %v8887_v41 = vpop.f32.mrb[6].mxu1  ;;  %3866 = vst [vmem:[%s12404_s23 + $0x50] sm:$0xff] %v9304_v11  ;;  %v9306_v60 = vadd.f32 %v8699_v12, %v12377_v22  ;;  %v3732_v46 = vpop.f32.mrb[11].mxu0  ;;  %9263 = vmatpush3.bf16.msra.mxu1 %v9992_v54  ;;  %v2313_v54 = vor.u32 %v2312_v40, %v2309_v53  ;;  %v2334_v57 = vshll.u32 %v12552_v63, 16 }
 0x218   : > { %7810 = vst [vmem:[%s12404_s23 + $0x130] sm:$0xff] %v9332_v33  ;;  %v9334_v20 = vadd.f32 %v8887_v41, %v12377_v22  ;;  %v4908_v17 = vpop.f32.mrb[7].mxu1  ;;  %3864 = vst [vmem:[%s12404_s23 + $0x40] sm:$0xff] %v9305_v4  ;;  %v9307_v42 = vadd.f32 %v12377_v22, %v3732_v46  ;;  %v12578_v37 = vcombine.low %v2247_v36, %v2257_v45  ;;  %v2340_v19 = vshll.u32 %v13154_v2, 16 }
 0x219   : > { %7808 = vst [vmem:[%s12404_s23 + $0x120] sm:$0xff] %v9333_v18  ;;  %v9335_v51 = vadd.f32 %v12377_v22, %v4908_v17  ;;  %3867 = vst [vmem:[%s12404_s23 + $0x58] sm:$0xff] %v9306_v60  ;;  %9045 = vmatmul.mubr.bf16.gmra.mrb[52].mxu0 %v7911_v27  ;;  %v12580_v52 = vcombine.low %v2271_v39, %v2281_v34  ;;  %v2344_v27 = vshrl.u32 %v13154_v2, 16  ;;  %v2300_v50 = vrot.slane %v2299_v8, 4  ;;  %v13155_v17 = vld [vmem:[#allocation4_spill] sm:$0xff] }
 0x21a   : > { %7811 = vst [vmem:[%s12404_s23 + $0x138] sm:$0xff] %v9334_v20  ;;  %9233 = vmatmul.mubr.bf16.gmra.mrb[48].mxu1 %v12464_v15  ;;  %3865 = vst [vmem:[%s12404_s23 + $0x48] sm:$0xff] %v9307_v42  ;;  %9048 = vmatprep.mubr.bf16.mxu0 %v7912_v61  ;;  %v2290_v61 = vrot.slane %v2289_v56, 4  ;;  %v2304_v28 = vrot.slane %v2302_v38, 5  ;;  %v7914_v55 = vcombine.low %v12495_v16, %v12205_v9  ;;  %v2314_v36 = vrot.slane %v2313_v54, 4 }
 0x21b   : > { %7809 = vst [vmem:[%s12404_s23 + $0x128] sm:$0xff] %v9335_v51  ;;  %9236 = vmatprep.mubr.bf16.mxu1 %v12525_v7  ;;  %v2324_v48 = vrot.slane %v2323_v26, 4  ;;  %v2328_v11 = vrot.slane %v2326_v14, 5  ;;  %v2333_v3 = vrot.slane %v2331_v25, 4  ;;  %v2336_v4 = vrot.slane %v2334_v57, 5 }
 0x21c   : > { %v8702_v49 = vpop.f32.mrb[12].mxu0  ;;  %v12592_v39 = vrot.slane %v2340_v19, 5  ;;  %v2346_v18 = vrot.slane %v2344_v27, 4  ;;  %v2295_v38 = vsel %vm10118_vm6, %v2290_v61, %v12535_v59  ;;  %v2305_v20 = vsel %vm10118_vm6, %v2300_v50, %v2304_v28  ;;  %v10011_v26 = vld [vmem:[#allocation2 + $0x1c] sm:$0xf] }
 0x21d   : > { %v8890_v30 = vpop.f32.mrb[8].mxu1  ;;  %v9308_v24 = vadd.f32 %v8702_v49, %v12377_v22  ;;  %v3745_v53 = vpop.f32.mrb[13].mxu0  ;;  %v2350_v42 = vshll.u32 %v13155_v17, 16  ;;  %v2319_v34 = vsel %vm10118_vm6, %v2314_v36, %v12538_v29  ;;  %v2329_v8 = vsel %vm10118_vm6, %v2324_v48, %v2328_v11  ;;  %v2354_v29 = vld [vmem:[#allocation2 + $0x18] sm:$0xe] }
 0x21e   : > { %v9336_v43 = vadd.f32 %v8890_v30, %v12377_v22  ;;  %v4921_v40 = vpop.f32.mrb[9].mxu1  ;;  %v9309_v6 = vadd.f32 %v12377_v22, %v3745_v53  ;;  %v8703_v33 = vpop.f32.mrb[14].mxu0  ;;  %v2337_v51 = vor.u32 %v2336_v4, %v2333_v3  ;;  %v2347_v54 = vor.u32 %v2346_v18, %v12592_v39  ;;  %v10012_v49 = vld [vmem:[#allocation2 + $0x20] sm:$0x1] }
 0x21f   : > { %v9337_v9 = vadd.f32 %v12377_v22, %v4921_v40  ;;  %v8891_v16 = vpop.f32.mrb[10].mxu1  ;;  %3870 = vst [vmem:[%s12404_s23 + $0x70] sm:$0xff] %v9308_v24  ;;  %v9310_v12 = vadd.f32 %v8703_v33, %v12377_v22  ;;  %v3748_v45 = vpop.f32.mrb[15].mxu0  ;;  %v2420_v14 = vrot.slane %v10011_v26, 5  ;;  %v12618_v25 = vcombine.low %v2295_v38, %v2305_v20  ;;  %v10014_v38 = vld [vmem:[#allocation2 + $0x34] sm:$0xf] }
 0x220   : > { %7814 = vst [vmem:[%s12404_s23 + $0x150] sm:$0xff] %v9336_v43  ;;  %v9338_v41 = vadd.f32 %v8891_v16, %v12377_v22  ;;  %v4924_v60 = vpop.f32.mrb[11].mxu1  ;;  %3868 = vst [vmem:[%s12404_s23 + $0x60] sm:$0xff] %v9309_v6  ;;  %v9311_v46 = vadd.f32 %v12377_v22, %v3748_v45  ;;  %v7915_v19 = vcombine.low %v12552_v63, %v13154_v2  ;;  %v2423_v61 = vrot.slane %v10012_v49, 5  ;;  %v2355_v16 = vld [vmem:[#allocation2 + $0x24] sm:$0xe] }
 0x221   : > { %7812 = vst [vmem:[%s12404_s23 + $0x140] sm:$0xff] %v9337_v9  ;;  %v9339_v56 = vadd.f32 %v12377_v22, %v4924_v60  ;;  %3871 = vst [vmem:[%s12404_s23 + $0x78] sm:$0xff] %v9310_v12  ;;  %9049 = vmatmul.mubr.bf16.gmra.mrb[56].mxu0 %v7913_v31  ;;  %v12625_v24 = vcombine.low %v2319_v34, %v2329_v8  ;;  %v2352_v53 = vrot.slane %v2350_v42, 5  ;;  %v2338_v11 = vrot.slane %v2337_v51, 4  ;;  %v10013_v12 = vld [vmem:[#allocation2 + $0x28] sm:$0xf] }
 0x222   : > { %7815 = vst [vmem:[%s12404_s23 + $0x158] sm:$0xff] %v9338_v41  ;;  %9237 = vmatmul.mubr.bf16.gmra.mrb[52].mxu1 %v12578_v37  ;;  %3869 = vst [vmem:[%s12404_s23 + $0x68] sm:$0xff] %v9311_v46  ;;  %9052 = vmatprep.mubr.bf16.mxu0 %v7914_v55  ;;  %v2348_v43 = vrot.slane %v2347_v54, 4  ;;  %v7515_v3 = vrot.slane %v2354_v29, 9  ;;  %v2422_v4 = vrot.slane %v2420_v14, 4  ;;  %v2427_v45 = vrot.slane %v10013_v12, 5 }
 0x223   : > { %7813 = vst [vmem:[%s12404_s23 + $0x148] sm:$0xff] %v9339_v56  ;;  %9240 = vmatprep.mubr.bf16.mxu1 %v12580_v52  ;;  %v2343_v18 = vsel %vm10118_vm6, %v2338_v11, %v12592_v39  ;;  %v2356_v56 = vld [vmem:[#allocation2 + $0x30] sm:$0xe]  ;;  %v2434_v20 = vrot.slane %v10014_v38, 5  ;;  %v7516_v8 = vrot.slane %v2355_v16, 9 }
 0x224   : > { %v8706_v59 = vpop.f32.mrb[16].mxu0  ;;  %v2353_v41 = vsel %vm10118_vm6, %v2348_v43, %v2352_v53  ;;  %v2421_v46 = vsel %vm10567_vm13, %v7515_v3, %v2420_v14  ;;  %v10015_v39 = vld [vmem:[#allocation2 + $0x2c] sm:$0x1]  ;;  %v10016_v53 = vld [vmem:[#allocation2 + $0x38] sm:$0x1] }
 0x225   : > { %v8894_v31 = vpop.f32.mrb[12].mxu1  ;;  %v9312_v57 = vadd.f32 %v8706_v59, %v12377_v22  ;;  %v3761_v27 = vpop.f32.mrb[17].mxu0  ;;  %v2430_v32 = vrot.slane %v10015_v39, 5  ;;  %v12654_v59 = vcombine.low %v2343_v18, %v2353_v41  ;;  %v2357_v11 = vld [vmem:[#allocation2 + $0x3c] sm:$0xe] }
 0x226   : > { %v9340_v50 = vadd.f32 %v8894_v31, %v12377_v22  ;;  %v4937_v28 = vpop.f32.mrb[13].mxu1  ;;  %v9313_v55 = vadd.f32 %v12377_v22, %v3761_v27  ;;  %v8707_v30 = vpop.f32.mrb[18].mxu0  ;;  %v2429_v31 = vrot.slane %v2427_v45, 4  ;;  %v10017_v43 = vld [vmem:[#allocation2 + $0x40] sm:$0xf]  ;;  %v7518_v18 = vrot.slane %v2357_v11, 9 }
 0x227   : > { %v9341_v36 = vadd.f32 %v12377_v22, %v4937_v28  ;;  %v8895_v48 = vpop.f32.mrb[14].mxu1  ;;  %3874 = vst [vmem:[%s12404_s23 + $0x90] sm:$0xff] %v9312_v57  ;;  %v9314_v63 = vadd.f32 %v8707_v30, %v12377_v22  ;;  %v3764_v2 = vpop.f32.mrb[19].mxu0  ;;  %v2436_v30 = vrot.slane %v2434_v20, 4  ;;  %v2358_v3 = vld [vmem:[#allocation2 + $0x48] sm:$0xe] }
 0x228   : > { %7818 = vst [vmem:[%s12404_s23 + $0x170] sm:$0xff] %v9340_v50  ;;  %v9342_v40 = vadd.f32 %v8895_v48, %v12377_v22  ;;  %v4940_v6 = vpop.f32.mrb[15].mxu1  ;;  %3872 = vst [vmem:[%s12404_s23 + $0x80] sm:$0xff] %v9313_v55  ;;  %v9315_v33 = vadd.f32 %v12377_v22, %v3764_v2  ;;  %v2431_v2 = vsel %vm10567_vm13, %v2429_v31, %v2430_v32  ;;  %v10019_v38 = vld [vmem:[#allocation2 + $0x44] sm:$0x1]  ;;  %v7519_v32 = vrot.slane %v2358_v3, 9 }
 0x229   : > { %7816 = vst [vmem:[%s12404_s23 + $0x160] sm:$0xff] %v9341_v36  ;;  %v9343_v9 = vadd.f32 %v12377_v22, %v4940_v6  ;;  %3875 = vst [vmem:[%s12404_s23 + $0x98] sm:$0xff] %v9314_v63  ;;  %9053 = vmatmul.mubr.bf16.gmra.mrb[60].mxu0 %v7915_v19  ;;  %v2437_v36 = vrot.slane %v10016_v53, 5  ;;  %v2428_v63 = vsel %vm10567_vm13, %v7516_v8, %v2427_v45  ;;  %v10020_v31 = vld [vmem:[#allocation2 + $0x50] sm:$0x1]  ;;  %v2465_v3 = vrot.slane %v12265_v5, 5 }
 0x22a   : > { %7819 = vst [vmem:[%s12404_s23 + $0x178] sm:$0xff] %v9342_v40  ;;  %9241 = vmatmul.mubr.bf16.gmra.mrb[56].mxu1 %v12618_v25  ;;  %3873 = vst [vmem:[%s12404_s23 + $0x88] sm:$0xff] %v9315_v33  ;;  %9072 = vmatprep.mubr.bf16.mxu0 %v12058_v23  ;;  %v2424_v23 = vsel %vm10567_vm13, %v2422_v4, %v2423_v61  ;;  %v7517_v61 = vrot.slane %v2356_v56, 9  ;;  %v2441_v40 = vrot.slane %v10017_v43, 5  ;;  %v10018_v4 = vld [vmem:[#allocation2 + $0x4c] sm:$0xf] }
 0x22b   : > { %7817 = vst [vmem:[%s12404_s23 + $0x168] sm:$0xff] %v9343_v9  ;;  %9244 = vmatprep.mubr.bf16.mxu1 %v12625_v24  ;;  %v8084_v49 = vcombine.low %v2421_v46, %v2424_v23  ;;  %v2438_v33 = vsel %vm10567_vm13, %v2436_v30, %v2437_v36  ;;  %v2448_v9 = vrot.slane %v10018_v4, 5  ;;  %v8085_v12 = vcombine.low %v2428_v63, %v2431_v2  ;;  %v2360_v53 = vld [vmem:[#allocation2 + $0x60] sm:$0xe] }
 0x22c   : > { %v8710_v60 = vpop.f32.mrb[20].mxu0  ;;  %v2443_v56 = vrot.slane %v2441_v40, 4 }
 0x22d   : > { %v8898_v17 = vpop.f32.mrb[16].mxu1  ;;  %v9316_v42 = vadd.f32 %v8710_v60, %v12377_v22  ;;  %v3777_v34 = vpop.f32.mrb[21].mxu0 }
 0x22e   : > { %v9344_v51 = vadd.f32 %v8898_v17, %v12377_v22  ;;  %v4953_v54 = vpop.f32.mrb[17].mxu1  ;;  %v9317_v26 = vadd.f32 %v12377_v22, %v3777_v34  ;;  %v8711_v14 = vpop.f32.mrb[22].mxu0 }
 0x22f   : > { %v9345_v57 = vadd.f32 %v12377_v22, %v4953_v54  ;;  %v8899_v27 = vpop.f32.mrb[18].mxu1  ;;  %3878 = vst [vmem:[%s12404_s23 + $0xb0] sm:$0xff] %v9316_v42  ;;  %v9318_v19 = vadd.f32 %v8711_v14, %v12377_v22  ;;  %v3780_v29 = vpop.f32.mrb[23].mxu0  ;;  %v2450_v14 = vrot.slane %v2448_v9, 4 }
 0x230   : > { %7822 = vst [vmem:[%s12404_s23 + $0x190] sm:$0xff] %v9344_v51  ;;  %v9346_v50 = vadd.f32 %v8899_v27, %v12377_v22  ;;  %v4956_v28 = vpop.f32.mrb[19].mxu1  ;;  %3876 = vst [vmem:[%s12404_s23 + $0xa0] sm:$0xff] %v9317_v26  ;;  %v9319_v55 = vadd.f32 %v12377_v22, %v3780_v29 }
 0x231   : > { %7820 = vst [vmem:[%s12404_s23 + $0x180] sm:$0xff] %v9345_v57  ;;  %v9347_v48 = vadd.f32 %v12377_v22, %v4956_v28  ;;  %3879 = vst [vmem:[%s12404_s23 + $0xb8] sm:$0xff] %v9318_v19  ;;  %9073 = vmatmul.mubr.bf16.vlgmr.msra.gmra.mrb[32].mxu0 %v12124_v44  ;;  %v2435_v44 = vsel %vm10567_vm13, %v7517_v61, %v2434_v20  ;;  %v2444_v20 = vrot.slane %v10019_v38, 5  ;;  %v2451_v57 = vrot.slane %v10020_v31, 5 }
 0x232   : > { %7823 = vst [vmem:[%s12404_s23 + $0x198] sm:$0xff] %v9346_v50  ;;  %9245 = vmatmul.mubr.bf16.gmra.mrb[60].mxu1 %v12654_v59  ;;  %3877 = vst [vmem:[%s12404_s23 + $0xa8] sm:$0xff] %v9319_v55  ;;  %9076 = vmatprep.mubr.bf16.mxu0 %v12193_v21  ;;  %v8086_v39 = vcombine.low %v2435_v44, %v2438_v33  ;;  %v2442_v19 = vsel %vm10567_vm13, %v7518_v18, %v2441_v40  ;;  %v10021_v50 = vld [vmem:[#allocation2 + $0x64] sm:$0xf] }
 0x233   : > { %7821 = vst [vmem:[%s12404_s23 + $0x188] sm:$0xff] %v9347_v48  ;;  %9264 = vmatprep.mubr.bf16.mxu1 %v8084_v49  ;;  %v2445_v29 = vsel %vm10567_vm13, %v2443_v56, %v2444_v20  ;;  %v2449_v61 = vsel %vm10567_vm13, %v7519_v32, %v2448_v9  ;;  %v2462_v28 = vrot.slane %v10021_v50, 5  ;;  %v13162_v32 = vld [vmem:[#allocation7_spill] sm:$0xff]  ;;  %v13182_v50 = vld [vmem:[#allocation36_spill] sm:$0xff] }
 0x234   : > { %v8714_v6 = vpop.f32.mrb[24].mxu0  ;;  %v8087_v63 = vcombine.low %v2442_v19, %v2445_v29  ;;  %v13175_v19 = vld [vmem:[#allocation21_spill] sm:$0xff] }
 0x235   : > { %v8902_v16 = vpop.f32.mrb[20].mxu1  ;;  %v9320_v21 = vadd.f32 %v8714_v6, %v12377_v22  ;;  %v3793_v45 = vpop.f32.mrb[25].mxu0 }
 0x236   : > { %v9348_v41 = vadd.f32 %v8902_v16, %v12377_v22  ;;  %v4969_v60 = vpop.f32.mrb[21].mxu1  ;;  %v9321_v46 = vadd.f32 %v12377_v22, %v3793_v45  ;;  %v8715_v23 = vpop.f32.mrb[26].mxu0 }
 0x237   : > { %v9349_v17 = vadd.f32 %v12377_v22, %v4969_v60  ;;  %v8903_v42 = vpop.f32.mrb[22].mxu1  ;;  %3882 = vst [vmem:[%s12404_s23 + $0xd0] sm:$0xff] %v9320_v21  ;;  %v9322_v34 = vadd.f32 %v8715_v23, %v12377_v22  ;;  %v3796_v8 = vpop.f32.mrb[27].mxu0  ;;  %v2464_v21 = vrot.slane %v2462_v28, 4 }
 0x238   : > { %7826 = vst [vmem:[%s12404_s23 + $0x1b0] sm:$0xff] %v9348_v41  ;;  %v9350_v51 = vadd.f32 %v8903_v42, %v12377_v22  ;;  %v4972_v54 = vpop.f32.mrb[23].mxu1  ;;  %3880 = vst [vmem:[%s12404_s23 + $0xc0] sm:$0xff] %v9321_v46  ;;  %v9323_v26 = vadd.f32 %v12377_v22, %v3796_v8  ;;  %v13160_v8 = vld [vmem:[#allocation8_spill] sm:$0xff] }
 0x239   : > { %7824 = vst [vmem:[%s12404_s23 + $0x1a0] sm:$0xff] %v9349_v17  ;;  %v9351_v27 = vadd.f32 %v12377_v22, %v4972_v54  ;;  %3883 = vst [vmem:[%s12404_s23 + $0xd8] sm:$0xff] %v9322_v34  ;;  %9077 = vmatmul.mubr.bf16.gmra.mrb[36].mxu0 %v12271_v10  ;;  %v2452_v10 = vsel %vm10567_vm13, %v2450_v14, %v2451_v57  ;;  %v2466_v18 = vsel %vm10567_vm13, %v2464_v21, %v2465_v3  ;;  %v13157_v17 = vld [vmem:[#allocation5_spill] sm:$0xff]  ;;  %v13159_v34 = vld [vmem:[#allocation11_spill] sm:$0xff] }
 0x23a   : > { %7827 = vst [vmem:[%s12404_s23 + $0x1b8] sm:$0xff] %v9350_v51  ;;  %9265 = vmatmul.mubr.bf16.vlgmr.msra.gmra.mrb[32].mxu1 %v8085_v12  ;;  %3881 = vst [vmem:[%s12404_s23 + $0xc8] sm:$0xff] %v9323_v26  ;;  %9080 = vmatprep.mubr.bf16.mxu0 %v12273_v47  ;;  %v8088_v33 = vcombine.low %v2449_v61, %v2452_v10  ;;  %v7521_v12 = vrot.slane %v2360_v53, 9  ;;  %v13158_v42 = vcombine.low %v13156_v58, %v13157_v17  ;;  %v13163_v51 = vld [vmem:[#allocation19_spill] sm:$0xff]  ;;  %v13166_v26 = vld [vmem:[#allocation25_spill] sm:$0xff] }
 0x23b   : > { %7825 = vst [vmem:[%s12404_s23 + $0x1a8] sm:$0xff] %v9351_v27  ;;  %9268 = vmatprep.mubr.bf16.mxu1 %v8086_v39  ;;  %v13161_v39 = vcombine.low %v13159_v34, %v13160_v8  ;;  %v13165_v54 = vld [vmem:[#allocation23_spill] sm:$0xff]  ;;  %v13172_v57 = vld [vmem:[#allocation33_spill] sm:$0xff] }
 0x23c   : > { %v8718_v49 = vpop.f32.mrb[28].mxu0  ;;  %v2463_v5 = vsel %vm10567_vm13, %v7521_v12, %v2462_v28  ;;  %v13167_v14 = vcombine.low %v13165_v54, %v13166_v26  ;;  %v13183_v28 = vld [vmem:[#allocation12_spill] sm:$0xff] }
 0x23d   : > { %v8906_v55 = vpop.f32.mrb[24].mxu1  ;;  %v9324_v47 = vadd.f32 %v8718_v49, %v12377_v22  ;;  %v3809_v30 = vpop.f32.mrb[29].mxu0  ;;  %v8090_v56 = vcombine.low %v2463_v5, %v2466_v18  ;;  %v13178_v49 = vld [vmem:[#allocation24_spill] sm:$0xff] }
 0x23e   : > { %v9352_v36 = vadd.f32 %v8906_v55, %v12377_v22  ;;  %v4985_v48 = vpop.f32.mrb[25].mxu1  ;;  %v9325_v2 = vadd.f32 %v12377_v22, %v3809_v30  ;;  %v8719_v11 = vpop.f32.mrb[30].mxu0  ;;  %v13184_v55 = vcombine.low %v13182_v50, %v13183_v28 }
 0x23f   : > { %v9353_v43 = vadd.f32 %v12377_v22, %v4985_v48  ;;  %v8907_v40 = vpop.f32.mrb[26].mxu1  ;;  %3886 = vst [vmem:[%s12404_s23 + $0xf0] sm:$0xff] %v9324_v47  ;;  %v9326_v6 = vadd.f32 %v8719_v11, %v12377_v22  ;;  %v3812_v44 = vpop.f32.mrb[31].mxu0 }
 0x240   : > { %7830 = vst [vmem:[%s12404_s23 + $0x1d0] sm:$0xff] %v9352_v36  ;;  %v9354_v4 = vadd.f32 %v8907_v40, %v12377_v22  ;;  %v4988_v9 = vpop.f32.mrb[27].mxu1  ;;  %3884 = vst [vmem:[%s12404_s23 + $0xe0] sm:$0xff] %v9325_v2  ;;  %v9327_v16 = vadd.f32 %v12377_v22, %v3812_v44 }
 0x241   : > { %7828 = vst [vmem:[%s12404_s23 + $0x1c0] sm:$0xff] %v9353_v43  ;;  %v9355_v45 = vadd.f32 %v12377_v22, %v4988_v9  ;;  %3887 = vst [vmem:[%s12404_s23 + $0xf8] sm:$0xff] %v9326_v6  ;;  %9081 = vmatmul.mubr.bf16.gmra.mrb[40].mxu0 %v12309_v1 }
 0x242   : > { %7831 = vst [vmem:[%s12404_s23 + $0x1d8] sm:$0xff] %v9354_v4  ;;  %9269 = vmatmul.mubr.bf16.gmra.mrb[36].mxu1 %v8087_v63  ;;  %3885 = vst [vmem:[%s12404_s23 + $0xe8] sm:$0xff] %v9327_v16  ;;  %9084 = vmatprep.mubr.bf16.mxu0 %v12379_v35 }
 0x243   : > { %7829 = vst [vmem:[%s12404_s23 + $0x1c8] sm:$0xff] %v9355_v45  ;;  %9272 = vmatprep.mubr.bf16.mxu1 %v8088_v33 }
 0x245   : > { %v8910_v41 = vpop.f32.mrb[28].mxu1 }
 0x246   : > { %v9356_v60 = vadd.f32 %v8910_v41, %v12377_v22  ;;  %v5001_v1 = vpop.f32.mrb[29].mxu1 }
 0x247   : > { %v9357_v46 = vadd.f32 %v12377_v22, %v5001_v1  ;;  %v8911_v23 = vpop.f32.mrb[30].mxu1 }
 0x248   : > { %7834 = vst [vmem:[%s12404_s23 + $0x1f0] sm:$0xff] %v9356_v60  ;;  %v9358_v35 = vadd.f32 %v8911_v23, %v12377_v22  ;;  %v5004_v38 = vpop.f32.mrb[31].mxu1 }
 0x249   : > { %7832 = vst [vmem:[%s12404_s23 + $0x1e0] sm:$0xff] %v9357_v46  ;;  %v9359_v20 = vadd.f32 %v12377_v22, %v5004_v38  ;;  %9085 = vmatmul.mubr.bf16.gmra.mrb[44].mxu0 %v12381_v0  ;;  %v13164_v0 = vcombine.low %v13162_v32, %v13163_v51 }
 0x24a   : > { %7835 = vst [vmem:[%s12404_s23 + $0x1f8] sm:$0xff] %v9358_v35  ;;  %9273 = vmatmul.mubr.bf16.gmra.mrb[40].mxu1 %v13158_v42  ;;  %9088 = vmatprep.mubr.bf16.mxu0 %v12457_v13  ;;  %v13168_v13 = vld [vmem:[#allocation27_spill] sm:$0xff] }
 0x24b   : > { %7833 = vst [vmem:[%s12404_s23 + $0x1e8] sm:$0xff] %v9359_v20  ;;  %9276 = vmatprep.mubr.bf16.mxu1 %v8090_v56 }
 0x251   : > { %9089 = vmatmul.mubr.bf16.gmra.mrb[48].mxu0 %v12464_v15  ;;  %v13169_v15 = vld [vmem:[#allocation28_spill] sm:$0xff] }
 0x252   : > { %9277 = vmatmul.mubr.bf16.gmra.mrb[44].mxu1 %v13161_v39  ;;  %9092 = vmatprep.mubr.bf16.mxu0 %v12525_v7  ;;  %v13170_v31 = vcombine.low %v13168_v13, %v13169_v15  ;;  %v13171_v7 = vld [vmem:[#allocation31_spill] sm:$0xff] }
 0x253   : > { %9280 = vmatprep.mubr.bf16.mxu1 %v13164_v0  ;;  %v13173_v27 = vcombine.low %v13171_v7, %v13172_v57 }
 0x259   : > { %9093 = vmatmul.mubr.bf16.gmra.mrb[52].mxu0 %v12578_v37  ;;  %v13174_v37 = vld [vmem:[#allocation16_spill] sm:$0xff] }
 0x25a   : > { %9281 = vmatmul.mubr.bf16.gmra.mrb[48].mxu1 %v13167_v14  ;;  %9096 = vmatprep.mubr.bf16.mxu0 %v12580_v52  ;;  %v13176_v29 = vcombine.low %v13174_v37, %v13175_v19  ;;  %v13177_v52 = vld [vmem:[#allocation9_spill] sm:$0xff]  ;;  %v12827_v37 = vld [vmem:[%s12915_s2] ss:$0 sm:$0xff] }
 0x25b   : > { %9284 = vmatprep.mubr.bf16.mxu1 %v13170_v31  ;;  %v13179_v61 = vcombine.low %v13177_v52, %v13178_v49 }
 0x261   : > { %9097 = vmatmul.mubr.bf16.gmra.mrb[56].mxu0 %v12618_v25  ;;  %v13180_v25 = vld [vmem:[#allocation34_spill] sm:$0xff] }
 0x262   : > { %9285 = vmatmul.mubr.bf16.gmra.mrb[52].mxu1 %v13173_v27  ;;  %9100 = vmatprep.mubr.bf16.mxu0 %v12625_v24  ;;  %v13181_v10 = vcombine.low %v12233_v62, %v13180_v25 }
 0x263   : > { %9288 = vmatprep.mubr.bf16.mxu1 %v13176_v29 }
 0x269   : > { %9101 = vmatmul.mubr.bf16.gmra.mrb[60].mxu0 %v12654_v59 }
 0x26a   : > { %9289 = vmatmul.mubr.bf16.gmra.mrb[56].mxu1 %v13179_v61 }
 0x26b   : > { %9292 = vmatprep.mubr.bf16.mxu1 %v13181_v10 }
 0x272   : > { %9293 = vmatmul.mubr.bf16.gmra.mrb[60].mxu1 %v13184_v55 }
 0x304   : > { %v9074_v24 = vpop.f32.mrb[32].mxu0 }
 0x305   : > { %v9360_v47 = vadd.f32 %v9074_v24, %v12377_v22  ;;  %v6098_v30 = vpop.f32.mrb[33].mxu0 }
 0x306   : > { %v9361_v53 = vadd.f32 %v12377_v22, %v6098_v30  ;;  %v9075_v36 = vpop.f32.mrb[34].mxu0 }
 0x307   : > { %7966 = vst [vmem:[%s12404_s23 + $0x210] sm:$0xff] %v9360_v47  ;;  %v9362_v59 = vadd.f32 %v9075_v36, %v12377_v22  ;;  %v6101_v48 = vpop.f32.mrb[35].mxu0 }
 0x308   : > { %7964 = vst [vmem:[%s12404_s23 + $0x200] sm:$0xff] %v9361_v53  ;;  %v9363_v62 = vadd.f32 %v12377_v22, %v6101_v48 }
 0x309   : > { %7967 = vst [vmem:[%s12404_s23 + $0x218] sm:$0xff] %v9362_v59 }
 0x30a   : > { %7965 = vst [vmem:[%s12404_s23 + $0x208] sm:$0xff] %v9363_v62 }
 0x30c   : > { %v9078_v63 = vpop.f32.mrb[36].mxu0 }
 0x30d   : > { %v9266_v2 = vpop.f32.mrb[32].mxu1  ;;  %v9364_v11 = vadd.f32 %v9078_v63, %v12377_v22  ;;  %v6114_v43 = vpop.f32.mrb[37].mxu0 }
 0x30e   : > { %v9392_v40 = vadd.f32 %v9266_v2, %v12377_v22  ;;  %v7227_v6 = vpop.f32.mrb[33].mxu1  ;;  %v9365_v44 = vadd.f32 %v12377_v22, %v6114_v43  ;;  %v9079_v33 = vpop.f32.mrb[38].mxu0 }
 0x30f   : > { %v9393_v3 = vadd.f32 %v12377_v22, %v7227_v6  ;;  %v9267_v4 = vpop.f32.mrb[34].mxu1  ;;  %7970 = vst [vmem:[%s12404_s23 + $0x230] sm:$0xff] %v9364_v11  ;;  %v9366_v9 = vadd.f32 %v9079_v33, %v12377_v22  ;;  %v6117_v16 = vpop.f32.mrb[39].mxu0 }
 0x310   : > { %8110 = vst [vmem:[%s12404_s23 + $0x310] sm:$0xff] %v9392_v40  ;;  %v9394_v12 = vadd.f32 %v9267_v4, %v12377_v22  ;;  %v7230_v21 = vpop.f32.mrb[35].mxu1  ;;  %7968 = vst [vmem:[%s12404_s23 + $0x220] sm:$0xff] %v9365_v44  ;;  %v9367_v45 = vadd.f32 %v12377_v22, %v6117_v16 }
 0x311   : > { %8108 = vst [vmem:[%s12404_s23 + $0x300] sm:$0xff] %v9393_v3  ;;  %v9395_v5 = vadd.f32 %v12377_v22, %v7230_v21  ;;  %7971 = vst [vmem:[%s12404_s23 + $0x238] sm:$0xff] %v9366_v9 }
 0x312   : > { %8111 = vst [vmem:[%s12404_s23 + $0x318] sm:$0xff] %v9394_v12  ;;  %7969 = vst [vmem:[%s12404_s23 + $0x228] sm:$0xff] %v9367_v45 }
 0x313   : > { %8109 = vst [vmem:[%s12404_s23 + $0x308] sm:$0xff] %v9395_v5 }
 0x314   : > { %v9082_v18 = vpop.f32.mrb[40].mxu0 }
 0x315   : > { %v9270_v41 = vpop.f32.mrb[36].mxu1  ;;  %v9368_v60 = vadd.f32 %v9082_v18, %v12377_v22  ;;  %v6130_v1 = vpop.f32.mrb[41].mxu0 }
 0x316   : > { %v9396_v46 = vadd.f32 %v9270_v41, %v12377_v22  ;;  %v7243_v23 = vpop.f32.mrb[37].mxu1  ;;  %v9369_v56 = vadd.f32 %v12377_v22, %v6130_v1  ;;  %v9083_v35 = vpop.f32.mrb[42].mxu0 }
 0x317   : > { %v9397_v38 = vadd.f32 %v12377_v22, %v7243_v23  ;;  %v9271_v20 = vpop.f32.mrb[38].mxu1  ;;  %7974 = vst [vmem:[%s12404_s23 + $0x250] sm:$0xff] %v9368_v60  ;;  %v9370_v58 = vadd.f32 %v9083_v35, %v12377_v22  ;;  %v6133_v17 = vpop.f32.mrb[43].mxu0 }
 0x318   : > { %8114 = vst [vmem:[%s12404_s23 + $0x330] sm:$0xff] %v9396_v46  ;;  %v9398_v42 = vadd.f32 %v9271_v20, %v12377_v22  ;;  %v7246_v34 = vpop.f32.mrb[39].mxu1  ;;  %7972 = vst [vmem:[%s12404_s23 + $0x240] sm:$0xff] %v9369_v56  ;;  %v9371_v8 = vadd.f32 %v12377_v22, %v6133_v17 }
 0x319   : > { %8112 = vst [vmem:[%s12404_s23 + $0x320] sm:$0xff] %v9397_v38  ;;  %v9399_v39 = vadd.f32 %v12377_v22, %v7246_v34  ;;  %7975 = vst [vmem:[%s12404_s23 + $0x258] sm:$0xff] %v9370_v58 }
 0x31a   : > { %8115 = vst [vmem:[%s12404_s23 + $0x338] sm:$0xff] %v9398_v42  ;;  %7973 = vst [vmem:[%s12404_s23 + $0x248] sm:$0xff] %v9371_v8 }
 0x31b   : > { %8113 = vst [vmem:[%s12404_s23 + $0x328] sm:$0xff] %v9399_v39 }
 0x31c   : > { %v9086_v32 = vpop.f32.mrb[44].mxu0 }
 0x31d   : > { %v9274_v51 = vpop.f32.mrb[40].mxu1  ;;  %v9372_v0 = vadd.f32 %v9086_v32, %v12377_v22  ;;  %v6146_v54 = vpop.f32.mrb[45].mxu0 }
 0x31e   : > { %v9400_v26 = vadd.f32 %v9274_v51, %v12377_v22  ;;  %v7259_v14 = vpop.f32.mrb[41].mxu1  ;;  %v9373_v13 = vadd.f32 %v12377_v22, %v6146_v54  ;;  %v9087_v15 = vpop.f32.mrb[46].mxu0 }
 0x31f   : > { %v9401_v31 = vadd.f32 %v12377_v22, %v7259_v14  ;;  %v9275_v7 = vpop.f32.mrb[42].mxu1  ;;  %7978 = vst [vmem:[%s12404_s23 + $0x270] sm:$0xff] %v9372_v0  ;;  %v9374_v57 = vadd.f32 %v9087_v15, %v12377_v22  ;;  %v6149_v27 = vpop.f32.mrb[47].mxu0 }
 0x320   : > { %8118 = vst [vmem:[%s12404_s23 + $0x350] sm:$0xff] %v9400_v26  ;;  %v9402_v19 = vadd.f32 %v12827_v37, %v9275_v7  ;;  %v7262_v29 = vpop.f32.mrb[43].mxu1  ;;  %7976 = vst [vmem:[%s12404_s23 + $0x260] sm:$0xff] %v9373_v13  ;;  %v9375_v52 = vadd.f32 %v12827_v37, %v6149_v27 }
 0x321   : > { %8116 = vst [vmem:[%s12404_s23 + $0x340] sm:$0xff] %v9401_v31  ;;  %v9403_v49 = vadd.f32 %v12827_v37, %v7262_v29  ;;  %7979 = vst [vmem:[%s12404_s23 + $0x278] sm:$0xff] %v9374_v57 }
 0x322   : > { %8119 = vst [vmem:[%s12404_s23 + $0x358] sm:$0xff] %v9402_v19  ;;  %7977 = vst [vmem:[%s12404_s23 + $0x268] sm:$0xff] %v9375_v52 }
 0x323   : > { %8117 = vst [vmem:[%s12404_s23 + $0x348] sm:$0xff] %v9403_v49 }
 0x324   : > { %v9090_v22 = vpop.f32.mrb[48].mxu0 }
 0x325   : > { %v9278_v61 = vpop.f32.mrb[44].mxu1  ;;  %v9376_v25 = vadd.f32 %v12827_v37, %v9090_v22  ;;  %v6162_v10 = vpop.f32.mrb[49].mxu0 }
 0x326   : > { %v9404_v50 = vadd.f32 %v12827_v37, %v9278_v61  ;;  %v7275_v28 = vpop.f32.mrb[45].mxu1  ;;  %v9377_v55 = vadd.f32 %v12827_v37, %v6162_v10  ;;  %v9091_v24 = vpop.f32.mrb[50].mxu0 }
 0x327   : > { %v9405_v47 = vadd.f32 %v12827_v37, %v7275_v28  ;;  %v9279_v30 = vpop.f32.mrb[46].mxu1  ;;  %7982 = vst [vmem:[%s12404_s23 + $0x290] sm:$0xff] %v9376_v25  ;;  %v9378_v53 = vadd.f32 %v12827_v37, %v9091_v24  ;;  %v6165_v36 = vpop.f32.mrb[51].mxu0 }
 0x328   : > { %8122 = vst [vmem:[%s12404_s23 + $0x370] sm:$0xff] %v9404_v50  ;;  %v9406_v59 = vadd.f32 %v12827_v37, %v9279_v30  ;;  %v7278_v48 = vpop.f32.mrb[47].mxu1  ;;  %7980 = vst [vmem:[%s12404_s23 + $0x280] sm:$0xff] %v9377_v55  ;;  %v9379_v62 = vadd.f32 %v12827_v37, %v6165_v36 }
 0x329   : > { %8120 = vst [vmem:[%s12404_s23 + $0x360] sm:$0xff] %v9405_v47  ;;  %v9407_v63 = vadd.f32 %v12827_v37, %v7278_v48  ;;  %7983 = vst [vmem:[%s12404_s23 + $0x298] sm:$0xff] %v9378_v53 }
 0x32a   : > { %8123 = vst [vmem:[%s12404_s23 + $0x378] sm:$0xff] %v9406_v59  ;;  %7981 = vst [vmem:[%s12404_s23 + $0x288] sm:$0xff] %v9379_v62 }
 0x32b   : > { %8121 = vst [vmem:[%s12404_s23 + $0x368] sm:$0xff] %v9407_v63 }
 0x32c   : > { %v9094_v2 = vpop.f32.mrb[52].mxu0 }
 0x32d   : > { %v9282_v11 = vpop.f32.mrb[48].mxu1  ;;  %v9380_v43 = vadd.f32 %v12827_v37, %v9094_v2  ;;  %v6178_v40 = vpop.f32.mrb[53].mxu0 }
 0x32e   : > { %v9408_v6 = vadd.f32 %v12827_v37, %v9282_v11  ;;  %v7291_v44 = vpop.f32.mrb[49].mxu1  ;;  %v9381_v33 = vadd.f32 %v12827_v37, %v6178_v40  ;;  %v9095_v3 = vpop.f32.mrb[54].mxu0 }
 0x32f   : > { %v9409_v4 = vadd.f32 %v12827_v37, %v7291_v44  ;;  %v9283_v9 = vpop.f32.mrb[50].mxu1  ;;  %7986 = vst [vmem:[%s12404_s23 + $0x2b0] sm:$0xff] %v9380_v43  ;;  %v9382_v16 = vadd.f32 %v12827_v37, %v9095_v3  ;;  %v6181_v12 = vpop.f32.mrb[55].mxu0 }
 0x330   : > { %8126 = vst [vmem:[%s12404_s23 + $0x390] sm:$0xff] %v9408_v6  ;;  %v9410_v21 = vadd.f32 %v12827_v37, %v9283_v9  ;;  %v7294_v45 = vpop.f32.mrb[51].mxu1  ;;  %7984 = vst [vmem:[%s12404_s23 + $0x2a0] sm:$0xff] %v9381_v33  ;;  %v9383_v5 = vadd.f32 %v12827_v37, %v6181_v12 }
 0x331   : > { %8124 = vst [vmem:[%s12404_s23 + $0x380] sm:$0xff] %v9409_v4  ;;  %v9411_v18 = vadd.f32 %v12827_v37, %v7294_v45  ;;  %7987 = vst [vmem:[%s12404_s23 + $0x2b8] sm:$0xff] %v9382_v16 }
 0x332   : > { %8127 = vst [vmem:[%s12404_s23 + $0x398] sm:$0xff] %v9410_v21  ;;  %7985 = vst [vmem:[%s12404_s23 + $0x2a8] sm:$0xff] %v9383_v5 }
 0x333   : > { %8125 = vst [vmem:[%s12404_s23 + $0x388] sm:$0xff] %v9411_v18 }
 0x334   : > { %v9098_v41 = vpop.f32.mrb[56].mxu0 }
 0x335   : > { %v9286_v60 = vpop.f32.mrb[52].mxu1  ;;  %v9384_v1 = vadd.f32 %v12827_v37, %v9098_v41  ;;  %v6194_v46 = vpop.f32.mrb[57].mxu0 }
 0x336   : > { %v9412_v23 = vadd.f32 %v12827_v37, %v9286_v60  ;;  %v7307_v56 = vpop.f32.mrb[53].mxu1  ;;  %v9385_v35 = vadd.f32 %v12827_v37, %v6194_v46  ;;  %v9099_v38 = vpop.f32.mrb[58].mxu0 }
 0x337   : > { %v9413_v20 = vadd.f32 %v12827_v37, %v7307_v56  ;;  %v9287_v58 = vpop.f32.mrb[54].mxu1  ;;  %7990 = vst [vmem:[%s12404_s23 + $0x2d0] sm:$0xff] %v9384_v1  ;;  %v9386_v17 = vadd.f32 %v12827_v37, %v9099_v38  ;;  %v6197_v42 = vpop.f32.mrb[59].mxu0 }
 0x338   : > { %8130 = vst [vmem:[%s12404_s23 + $0x3b0] sm:$0xff] %v9412_v23  ;;  %v9414_v34 = vadd.f32 %v12827_v37, %v9287_v58  ;;  %v7310_v8 = vpop.f32.mrb[55].mxu1  ;;  %7988 = vst [vmem:[%s12404_s23 + $0x2c0] sm:$0xff] %v9385_v35  ;;  %v9387_v39 = vadd.f32 %v12827_v37, %v6197_v42 }
 0x339   : > { %8128 = vst [vmem:[%s12404_s23 + $0x3a0] sm:$0xff] %v9413_v20  ;;  %v9415_v32 = vadd.f32 %v12827_v37, %v7310_v8  ;;  %7991 = vst [vmem:[%s12404_s23 + $0x2d8] sm:$0xff] %v9386_v17 }
 0x33a   : > { %8131 = vst [vmem:[%s12404_s23 + $0x3b8] sm:$0xff] %v9414_v34  ;;  %7989 = vst [vmem:[%s12404_s23 + $0x2c8] sm:$0xff] %v9387_v39 }
 0x33b   : > { %8129 = vst [vmem:[%s12404_s23 + $0x3a8] sm:$0xff] %v9415_v32 }
 0x33c   : > { %v9102_v51 = vpop.f32.mrb[60].mxu0 }
 0x33d   : > { %v9290_v0 = vpop.f32.mrb[56].mxu1  ;;  %v9388_v54 = vadd.f32 %v12827_v37, %v9102_v51  ;;  %v6210_v26 = vpop.f32.mrb[61].mxu0 }
 0x33e   : > { %v9416_v14 = vadd.f32 %v12827_v37, %v9290_v0  ;;  %v7323_v13 = vpop.f32.mrb[57].mxu1  ;;  %v9389_v15 = vadd.f32 %v12827_v37, %v6210_v26  ;;  %v9103_v31 = vpop.f32.mrb[62].mxu0 }
 0x33f   : > { %v9417_v7 = vadd.f32 %v12827_v37, %v7323_v13  ;;  %v9291_v57 = vpop.f32.mrb[58].mxu1  ;;  %7994 = vst [vmem:[%s12404_s23 + $0x2f0] sm:$0xff] %v9388_v54  ;;  %v9390_v27 = vadd.f32 %v12827_v37, %v9103_v31  ;;  %v6213_v19 = vpop.f32.mrb[63].mxu0 }
 0x340   : > { %8134 = vst [vmem:[%s12404_s23 + $0x3d0] sm:$0xff] %v9416_v14  ;;  %v9418_v29 = vadd.f32 %v12827_v37, %v9291_v57  ;;  %v7326_v52 = vpop.f32.mrb[59].mxu1  ;;  %7992 = vst [vmem:[%s12404_s23 + $0x2e0] sm:$0xff] %v9389_v15  ;;  %v9391_v49 = vadd.f32 %v12827_v37, %v6213_v19 }
 0x341   : > { %8132 = vst [vmem:[%s12404_s23 + $0x3c0] sm:$0xff] %v9417_v7  ;;  %v9419_v22 = vadd.f32 %v12827_v37, %v7326_v52  ;;  %7995 = vst [vmem:[%s12404_s23 + $0x2f8] sm:$0xff] %v9390_v27 }
 0x342   : > { %8135 = vst [vmem:[%s12404_s23 + $0x3d8] sm:$0xff] %v9418_v29  ;;  %7993 = vst [vmem:[%s12404_s23 + $0x2e8] sm:$0xff] %v9391_v49 }
 0x343   : > { %8133 = vst [vmem:[%s12404_s23 + $0x3c8] sm:$0xff] %v9419_v22 }
 0x345   : > { %v9294_v61 = vpop.f32.mrb[60].mxu1 }
 0x346   : > { %v9420_v25 = vadd.f32 %v12827_v37, %v9294_v61  ;;  %v7339_v10 = vpop.f32.mrb[61].mxu1 }
 0x347   : > { %v9421_v50 = vadd.f32 %v12827_v37, %v7339_v10  ;;  %v9295_v28 = vpop.f32.mrb[62].mxu1 }
 0x348   : > { %8138 = vst [vmem:[%s12404_s23 + $0x3f0] sm:$0xff] %v9420_v25  ;;  %v9422_v55 = vadd.f32 %v12827_v37, %v9295_v28  ;;  %v7342_v24 = vpop.f32.mrb[63].mxu1 }
 0x349   : > { %8136 = vst [vmem:[%s12404_s23 + $0x3e0] sm:$0xff] %v9421_v50  ;;  %v9423_v47 = vadd.f32 %v12827_v37, %v7342_v24 }
 0x34a   : > { %8139 = vst [vmem:[%s12404_s23 + $0x3f8] sm:$0xff] %v9422_v55 }
 0x34b   : > { %8137 = vst [vmem:[%s12404_s23 + $0x3e8] sm:$0xff] %v9423_v47 }
 0x34c PF: > { %s13_s12 = sadd.s32 1, %s10029_s12  }
 0x34d   : > { %p10_p4 = scmp.ge.s32.totalorder %s13_s12, 4  }
 0x34f   :  { %12 = sbr.rel (!%p10_p4) target bundleno = 1 (0x1), region = 82 }

</bundles_post_ra>
